<compile_context>
chip_gen: v7x
topology: tpu7x:2x2x1
jax: 0.10.0
libtpu: 0.0.40
codegen_flags: <defaults>
</compile_context>

<pallas_src>
import numpy as np
import jax
import jax.numpy as jnp
from jax.experimental import pallas as pl
from jax.experimental.pallas import tpu as pltpu

WINDOW_SIZE = 11
SIGMA = 1.5
C1 = 0.01 ** 2
C2 = 0.03 ** 2


def gaussian_1d(window_size, sigma):
    # Same formula as the torch module's gaussian().
    xs = np.arange(window_size)
    g = np.exp(-((xs - window_size // 2) ** 2) / (2.0 * sigma ** 2))
    return (g / g.sum()).astype(np.float32)


def _toeplitz_right(n, g):
    """(n, n) matrix M with M[src, dst] = g[src - dst + pad] (band clipped at
    the edges), so that  x @ M  == 'same' 1-D cross-correlation of each row of
    x with g under zero padding."""
    ws = len(g)
    pad = ws // 2
    m = np.zeros((n, n), dtype=np.float32)
    for dst in range(n):
        for k in range(ws):
            src = dst + k - pad
            if 0 <= src < n:
                m[src, dst] = float(g[k])
    return m


def _make_ssim_kernel(C, H, W):
    HIGHEST = jax.lax.Precision.HIGHEST
    CH = C * H

    def kernel(gvb_ref, gh_ref, x1_ref, x2_ref, out_ref, st_ref):
        gvb = gvb_ref[...]          # (C*H, C*H) block-diag vertical taps
        gh = gh_ref[...]            # (W, W)     horizontal taps
        x1 = x1_ref[0]              # (C*H, W)   all channels of this batch elem
        x2 = x2_ref[0]

        # Stack the 5 moment inputs along sublanes so the horizontal (lane)
        # pass is a single MXU matmul for all quantities and channels at once.
        st_ref[0 * CH:1 * CH, :] = x1
        st_ref[1 * CH:2 * CH, :] = x2
        st_ref[2 * CH:3 * CH, :] = x1 * x1
        st_ref[3 * CH:4 * CH, :] = x2 * x2
        st_ref[4 * CH:5 * CH, :] = x1 * x2

        th = jnp.dot(st_ref[...], gh,
                     preferred_element_type=jnp.float32,
                     precision=HIGHEST)                      # (5*C*H, W)

        # Vertical (sublane) pass: block-diagonal Gv handles every channel in
        # one matmul per moment plane (static, sublane-aligned slices).
        def vconv(q):
            return jnp.dot(gvb, th[q * CH:(q + 1) * CH, :],
                           preferred_element_type=jnp.float32,
                           precision=HIGHEST)

        mu1 = vconv(0)
        mu2 = vconv(1)
        s11 = vconv(2)
        s22 = vconv(3)
        s12 = vconv(4)

        mu1_sq = mu1 * mu1
        mu2_sq = mu2 * mu2
        mu1_mu2 = mu1 * mu2
        sigma1_sq = s11 - mu1_sq
        sigma2_sq = s22 - mu2_sq
        sigma12 = s12 - mu1_mu2

        ssim_map = ((2.0 * mu1_mu2 + C1) * (2.0 * sigma12 + C2)) / (
            (mu1_sq + mu2_sq + C1) * (sigma1_sq + sigma2_sq + C2))

        part = jnp.sum(ssim_map, axis=1, keepdims=True)      # (C*H, 1)
        out_ref[0] = jnp.sum(part, axis=0, keepdims=True)    # (1, 1)

    return kernel


def ssim_pallas(img1, img2, window_size=WINDOW_SIZE, size_average=True):
    assert img1.shape == img2.shape and img1.ndim == 4
    B, C, H, W = img1.shape
    g = gaussian_1d(window_size, SIGMA)

    gh = jnp.asarray(_toeplitz_right(W, g))                       # (W, W): x @ Gh
    gv = _toeplitz_right(H, g).T                                  # (H, H): Gv @ x
    gvb = jnp.asarray(np.kron(np.eye(C, dtype=np.float32), gv))   # (C*H, C*H)

    # No spatial padding: boundary handling is baked into Gv/Gh.
    # Present each batch element as one (C*H, W) slab (free reshape in XLA).
    x1 = img1.astype(jnp.float32).reshape(B, C * H, W)
    x2 = img2.astype(jnp.float32).reshape(B, C * H, W)

    kernel = _make_ssim_kernel(C, H, W)

    batch_sums = pl.pallas_call(
        kernel,
        out_shape=jax.ShapeDtypeStruct((B, 1, 1), jnp.float32),
        grid_spec=pltpu.PrefetchScalarGridSpec(
            num_scalar_prefetch=0,
            grid=(B,),
            in_specs=[
                pl.BlockSpec((C * H, C * H), lambda b: (0, 0)),   # Gv (constant)
                pl.BlockSpec((W, W), lambda b: (0, 0)),           # Gh (constant)
                pl.BlockSpec((1, C * H, W), lambda b: (b, 0, 0)),
                pl.BlockSpec((1, C * H, W), lambda b: (b, 0, 0)),
            ],
            out_specs=pl.BlockSpec((1, 1, 1), lambda b: (b, 0, 0)),
            scratch_shapes=[pltpu.VMEM((5 * C * H, W), jnp.float32)],
        ),
        compiler_params=pltpu.CompilerParams(
            dimension_semantics=("parallel",)),   # B >= 2 keeps both TCs busy
    )(gvb, gh, x1, x2)

    batch_sums = batch_sums.reshape(B)
    if size_average:
        # torch .mean() over the whole ssim_map.
        return jnp.sum(batch_sums) / float(B * C * H * W)
    else:
        # torch ssim_map.mean(1).mean(1).mean(1) -> per-batch mean over (C,H,W).
        return batch_sums / float(C * H * W)


def ssim_map_reference_np(img1, img2, window_size=WINDOW_SIZE):
    # float64 numpy reference mirroring the torch semantics (full 2D window).
    g = gaussian_1d(window_size, SIGMA).astype(np.float64)
    w2 = np.outer(g, g)
    pad = window_size // 2

    def conv(x):
        _, _, H, W = x.shape
        xp = np.pad(x, ((0, 0), (0, 0), (pad, pad), (pad, pad)))
        out = np.zeros_like(x)
        for dy in range(window_size):
            for dx in range(window_size):
                out += w2[dy, dx] * xp[:, :, dy:dy + H, dx:dx + W]
        return out

    x1 = img1.astype(np.float64)
    x2 = img2.astype(np.float64)
    mu1, mu2 = conv(x1), conv(x2)
    mu1_sq, mu2_sq, mu1_mu2 = mu1 * mu1, mu2 * mu2, mu1 * mu2
    sigma1_sq = conv(x1 * x1) - mu1_sq
    sigma2_sq = conv(x2 * x2) - mu2_sq
    sigma12 = conv(x1 * x2) - mu1_mu2
    return ((2 * mu1_mu2 + C1) * (2 * sigma12 + C2)) / (
        (mu1_sq + mu2_sq + C1) * (sigma1_sq + sigma2_sq + C2))


if __name__ == "__main__":
    key = jax.random.PRNGKey(0)
    k1, k2 = jax.random.split(key)
    B, C, H, W = 2, 4, 16, 16
    img1 = jax.random.uniform(k1, (B, C, H, W), dtype=jnp.float32)
    img2 = jax.random.uniform(k2, (B, C, H, W), dtype=jnp.float32)

    ref_map = ssim_map_reference_np(np.asarray(img1), np.asarray(img2))

    # size_average=True (global mean, torch default)
    out = jax.block_until_ready(ssim_pallas(img1, img2, size_average=True))
    ref = float(ref_map.mean())
    assert np.allclose(float(out), ref, rtol=1e-4, atol=5e-5), (float(out), ref)

    # size_average=False (per-batch mean over C, H, W)
    out_b = jax.block_until_ready(ssim_pallas(img1, img2, size_average=False))
    ref_b = ref_map.mean(axis=(1, 2, 3))
    assert np.allclose(np.asarray(out_b), ref_b, rtol=1e-4, atol=5e-5), (
        np.asarray(out_b), ref_b)

    print("KERNEL_OK")
</pallas_src>

<mosaic_0001>
module attributes {stable_mosaic.version = 11 : i64} {
  func.func @kernel(%arg0: i32, %arg1: memref<64x64xf32, #tpu.memory_space<vmem>>, %arg2: memref<16x16xf32, #tpu.memory_space<vmem>>, %arg3: memref<1x64x16xf32, #tpu.memory_space<vmem>>, %arg4: memref<1x64x16xf32, #tpu.memory_space<vmem>>, %arg5: memref<1x1x1xf32, #tpu.memory_space<vmem>>, %arg6: memref<320x16xf32, #tpu.memory_space<vmem>>) attributes {dimension_semantics = [#tpu.dimension_semantics<parallel>], iteration_bounds = array<i64: 2>, scalar_prefetch = 0 : i64, scratch_operands = 1 : i64, tpu.core_type = #tpu.core_type<tc>, window_params = [{pipeline_mode = #tpu.pipeline_mode<synchronous>, transform_indices = @transform_0, window_bounds = array<i64: 64, 64>}, {pipeline_mode = #tpu.pipeline_mode<synchronous>, transform_indices = @transform_1, window_bounds = array<i64: 16, 16>}, {transform_indices = @transform_2, window_bounds = array<i64: 1, 64, 16>}, {transform_indices = @transform_3, window_bounds = array<i64: 1, 64, 16>}, {transform_indices = @transform_4, window_bounds = array<i64: 1, 1, 1>}]} {
    %c0 = arith.constant 0 : index
    %c0_0 = arith.constant 0 : index
    %0 = vector.load %arg1[%c0, %c0_0] : memref<64x64xf32, #tpu.memory_space<vmem>>, vector<64x64xf32>
    %c0_1 = arith.constant 0 : index
    %c0_2 = arith.constant 0 : index
    %1 = vector.load %arg2[%c0_1, %c0_2] : memref<16x16xf32, #tpu.memory_space<vmem>>, vector<16x16xf32>
    %c0_3 = arith.constant 0 : index
    %c0_4 = arith.constant 0 : index
    %c0_5 = arith.constant 0 : index
    %2 = vector.load %arg3[%c0_3, %c0_4, %c0_5] : memref<1x64x16xf32, #tpu.memory_space<vmem>>, vector<1x64x16xf32>
    %3 = vector.shape_cast %2 : vector<1x64x16xf32> to vector<64x16xf32>
    %c0_6 = arith.constant 0 : index
    %c0_7 = arith.constant 0 : index
    %c0_8 = arith.constant 0 : index
    %4 = vector.load %arg4[%c0_6, %c0_7, %c0_8] : memref<1x64x16xf32, #tpu.memory_space<vmem>>, vector<1x64x16xf32>
    %5 = vector.shape_cast %4 : vector<1x64x16xf32> to vector<64x16xf32>
    %c0_9 = arith.constant 0 : index
    %c0_10 = arith.constant 0 : index
    %6 = vector.load %arg6[%c0_9, %c0_10] : memref<320x16xf32, #tpu.memory_space<vmem>>, vector<64x16xf32>
    tpu.vector_store %arg6[%c0_9, %c0_10], %3 {strides = array<i32>} : memref<320x16xf32, #tpu.memory_space<vmem>>, vector<64x16xf32>,
    %c64 = arith.constant 64 : index
    %c0_11 = arith.constant 0 : index
    %7 = vector.load %arg6[%c64, %c0_11] : memref<320x16xf32, #tpu.memory_space<vmem>>, vector<64x16xf32>
    tpu.vector_store %arg6[%c64, %c0_11], %5 {strides = array<i32>} : memref<320x16xf32, #tpu.memory_space<vmem>>, vector<64x16xf32>,
    %8 = arith.mulf %3, %3 : vector<64x16xf32>
    %c128 = arith.constant 128 : index
    %c0_12 = arith.constant 0 : index
    %9 = vector.load %arg6[%c128, %c0_12] : memref<320x16xf32, #tpu.memory_space<vmem>>, vector<64x16xf32>
    tpu.vector_store %arg6[%c128, %c0_12], %8 {strides = array<i32>} : memref<320x16xf32, #tpu.memory_space<vmem>>, vector<64x16xf32>,
    %10 = arith.mulf %5, %5 : vector<64x16xf32>
    %c192 = arith.constant 192 : index
    %c0_13 = arith.constant 0 : index
    %11 = vector.load %arg6[%c192, %c0_13] : memref<320x16xf32, #tpu.memory_space<vmem>>, vector<64x16xf32>
    tpu.vector_store %arg6[%c192, %c0_13], %10 {strides = array<i32>} : memref<320x16xf32, #tpu.memory_space<vmem>>, vector<64x16xf32>,
    %12 = arith.mulf %3, %5 : vector<64x16xf32>
    %c256 = arith.constant 256 : index
    %c0_14 = arith.constant 0 : index
    %13 = vector.load %arg6[%c256, %c0_14] : memref<320x16xf32, #tpu.memory_space<vmem>>, vector<64x16xf32>
    tpu.vector_store %arg6[%c256, %c0_14], %12 {strides = array<i32>} : memref<320x16xf32, #tpu.memory_space<vmem>>, vector<64x16xf32>,
    %c0_15 = arith.constant 0 : index
    %c0_16 = arith.constant 0 : index
    %14 = vector.load %arg6[%c0_15, %c0_16] : memref<320x16xf32, #tpu.memory_space<vmem>>, vector<320x16xf32>
    %cst = arith.constant dense<0.000000e+00> : vector<320x16xf32>
    %15 = tpu.matmul %14, %1, %cst {dimension_numbers = #tpu.dot_dimension_numbers<[1], [0], [0], [1], [0, 0, 1, 1], [], []>, precision = #tpu.contract_precision<fp32>} : vector<320x16xf32>, vector<16x16xf32>, vector<320x16xf32> -> vector<320x16xf32>
    %16 = vector.extract_strided_slice %15 {offsets = [0, 0], sizes = [64, 16], strides = [1, 1]} : vector<320x16xf32> to vector<64x16xf32>
    %cst_17 = arith.constant dense<0.000000e+00> : vector<64x16xf32>
    %17 = tpu.matmul %0, %16, %cst_17 {dimension_numbers = #tpu.dot_dimension_numbers<[1], [0], [0], [1], [0, 0, 1, 1], [], []>, precision = #tpu.contract_precision<fp32>} : vector<64x64xf32>, vector<64x16xf32>, vector<64x16xf32> -> vector<64x16xf32>
    %18 = vector.extract_strided_slice %15 {offsets = [64, 0], sizes = [64, 16], strides = [1, 1]} : vector<320x16xf32> to vector<64x16xf32>
    %cst_18 = arith.constant dense<0.000000e+00> : vector<64x16xf32>
    %19 = tpu.matmul %0, %18, %cst_18 {dimension_numbers = #tpu.dot_dimension_numbers<[1], [0], [0], [1], [0, 0, 1, 1], [], []>, precision = #tpu.contract_precision<fp32>} : vector<64x64xf32>, vector<64x16xf32>, vector<64x16xf32> -> vector<64x16xf32>
    %20 = vector.extract_strided_slice %15 {offsets = [128, 0], sizes = [64, 16], strides = [1, 1]} : vector<320x16xf32> to vector<64x16xf32>
    %cst_19 = arith.constant dense<0.000000e+00> : vector<64x16xf32>
    %21 = tpu.matmul %0, %20, %cst_19 {dimension_numbers = #tpu.dot_dimension_numbers<[1], [0], [0], [1], [0, 0, 1, 1], [], []>, precision = #tpu.contract_precision<fp32>} : vector<64x64xf32>, vector<64x16xf32>, vector<64x16xf32> -> vector<64x16xf32>
    %22 = vector.extract_strided_slice %15 {offsets = [192, 0], sizes = [64, 16], strides = [1, 1]} : vector<320x16xf32> to vector<64x16xf32>
    %cst_20 = arith.constant dense<0.000000e+00> : vector<64x16xf32>
    %23 = tpu.matmul %0, %22, %cst_20 {dimension_numbers = #tpu.dot_dimension_numbers<[1], [0], [0], [1], [0, 0, 1, 1], [], []>, precision = #tpu.contract_precision<fp32>} : vector<64x64xf32>, vector<64x16xf32>, vector<64x16xf32> -> vector<64x16xf32>
    %24 = vector.extract_strided_slice %15 {offsets = [256, 0], sizes = [64, 16], strides = [1, 1]} : vector<320x16xf32> to vector<64x16xf32>
    %cst_21 = arith.constant dense<0.000000e+00> : vector<64x16xf32>
    %25 = tpu.matmul %0, %24, %cst_21 {dimension_numbers = #tpu.dot_dimension_numbers<[1], [0], [0], [1], [0, 0, 1, 1], [], []>, precision = #tpu.contract_precision<fp32>} : vector<64x64xf32>, vector<64x16xf32>, vector<64x16xf32> -> vector<64x16xf32>
    %26 = arith.mulf %17, %17 : vector<64x16xf32>
    %27 = arith.mulf %19, %19 : vector<64x16xf32>
    %28 = arith.mulf %17, %19 : vector<64x16xf32>
    %29 = arith.subf %21, %26 : vector<64x16xf32>
    %30 = arith.subf %23, %27 : vector<64x16xf32>
    %31 = arith.subf %25, %28 : vector<64x16xf32>
    %cst_22 = arith.constant 2.000000e+00 : f32
    %32 = vector.broadcast %cst_22 : f32 to vector<64x16xf32>
    %33 = arith.mulf %32, %28 : vector<64x16xf32>
    %cst_23 = arith.constant 9.99999974E-5 : f32
    %34 = vector.broadcast %cst_23 : f32 to vector<64x16xf32>
    %35 = arith.addf %33, %34 : vector<64x16xf32>
    %cst_24 = arith.constant 2.000000e+00 : f32
    %36 = vector.broadcast %cst_24 : f32 to vector<64x16xf32>
    %37 = arith.mulf %36, %31 : vector<64x16xf32>
    %cst_25 = arith.constant 8.99999984E-4 : f32
    %38 = vector.broadcast %cst_25 : f32 to vector<64x16xf32>
    %39 = arith.addf %37, %38 : vector<64x16xf32>
    %40 = arith.mulf %35, %39 : vector<64x16xf32>
    %41 = arith.addf %26, %27 : vector<64x16xf32>
    %cst_26 = arith.constant 9.99999974E-5 : f32
    %42 = vector.broadcast %cst_26 : f32 to vector<64x16xf32>
    %43 = arith.addf %41, %42 : vector<64x16xf32>
    %44 = arith.addf %29, %30 : vector<64x16xf32>
    %cst_27 = arith.constant 8.99999984E-4 : f32
    %45 = vector.broadcast %cst_27 : f32 to vector<64x16xf32>
    %46 = arith.addf %44, %45 : vector<64x16xf32>
    %47 = arith.mulf %43, %46 : vector<64x16xf32>
    %48 = arith.divf %40, %47 : vector<64x16xf32>
    %cst_28 = arith.constant dense<0.000000e+00> : vector<64xf32>
    %49 = vector.multi_reduction <add>, %48, %cst_28 [1] : vector<64x16xf32> to vector<64xf32>
    %50 = vector.shape_cast %49 : vector<64xf32> to vector<64x1xf32>
    %cst_29 = arith.constant dense<0.000000e+00> : vector<1xf32>
    %51 = vector.multi_reduction <add>, %50, %cst_29 [0] : vector<64x1xf32> to vector<1xf32>
    %52 = vector.shape_cast %51 : vector<1xf32> to vector<1x1xf32>
    %c0_30 = arith.constant 0 : index
    %c0_31 = arith.constant 0 : index
    %c0_32 = arith.constant 0 : index
    %53 = vector.load %arg5[%c0_30, %c0_31, %c0_32] : memref<1x1x1xf32, #tpu.memory_space<vmem>>, vector<1x1x1xf32>
    %54 = vector.shape_cast %53 : vector<1x1x1xf32> to vector<1x1xf32>
    %55 = vector.shape_cast %52 : vector<1x1xf32> to vector<1x1x1xf32>
    tpu.vector_store %arg5[%c0_30, %c0_31, %c0_32], %55 {strides = array<i32>} : memref<1x1x1xf32, #tpu.memory_space<vmem>>, vector<1x1x1xf32>,
    return
  }
  func.func @transform_0(%arg0: i32) -> (i32, i32) {
    %c0_i32 = arith.constant 0 : i32
    %c0_i32_0 = arith.constant 0 : i32
    %c0_i32_1 = arith.constant 0 : i32
    return %c0_i32, %c0_i32_0 : i32, i32
  }
  func.func @transform_1(%arg0: i32) -> (i32, i32) {
    %c0_i32 = arith.constant 0 : i32
    %c0_i32_0 = arith.constant 0 : i32
    %c0_i32_1 = arith.constant 0 : i32
    return %c0_i32, %c0_i32_0 : i32, i32
  }
  func.func @transform_2(%arg0: i32) -> (i32, i32, i32) {
    %c0_i32 = arith.constant 0 : i32
    %c0_i32_0 = arith.constant 0 : i32
    %c0_i32_1 = arith.constant 0 : i32
    return %arg0, %c0_i32, %c0_i32_0 : i32, i32, i32
  }
  func.func @transform_3(%arg0: i32) -> (i32, i32, i32) {
    %c0_i32 = arith.constant 0 : i32
    %c0_i32_0 = arith.constant 0 : i32
    %c0_i32_1 = arith.constant 0 : i32
    return %arg0, %c0_i32, %c0_i32_0 : i32, i32, i32
  }
  func.func @transform_4(%arg0: i32) -> (i32, i32, i32) {
    %c0_i32 = arith.constant 0 : i32
    %c0_i32_0 = arith.constant 0 : i32
    %c0_i32_1 = arith.constant 0 : i32
    return %arg0, %c0_i32, %c0_i32_0 : i32, i32, i32
  }
}

</mosaic_0001>

<bundles_post_ra>
// kernel: tpu_custom_call.1
= control target key start
LH: loop header
LB: loop body
LE: loop exit
PB: predicated region body
PF: predicated region fallthrough
CT: control target
= control target key end

     0   :  { %s9996_s15 = smov 0   ;;  %s11694_s0 = inlined_call_operand.vmem [shape: f32[64,64], index: 0, kind: input, shape index: {}]   ;;  %s11695_s1 = inlined_call_operand.vmem [shape: f32[16,16], index: 1, kind: input, shape index: {}]   ;;  %s11696_s2 = inlined_call_operand.vmem [shape: f32[2,64,16], index: 2, kind: input, shape index: {}]   ;;  %s11697_s3 = inlined_call_operand.vmem [shape: f32[2,64,16], index: 3, kind: input, shape index: {}]   ;;  %s11698_s4 = inlined_call_operand.vmem [shape: f32[2,1,1], index: 4, kind: output, shape index: {}]  }
   0x1 LB: > { %s7058_s16 = sadd.s32 4294967295, %s9969_s15   ;;  %p7062_p0 = scmp.ge.s32.totalorder %s9969_s15, 1  ;;  %s9969_s15 = sphi %s9996_s15, %s14_s15  }
   0x2   : > { %p172_p1 = scmp.lt.s32.totalorder %s9969_s15, 3 }
   0x4   : > { %p173_p2 = pnand %p7062_p0, %p172_p1 }
   0x6   : > { %176 = sbr.rel (%p173_p2) target bundleno = 1530 (0x5fa), region = 36 }
   0xd   : > { %v222_v0 = vld [vmem:[%s11695_s1] sm:$0xff]  ;;  %v223_v1 = vld [vmem:[%s11695_s1 + $0x8] sm:$0xff]  ;;  %p201_p3 = scmp.lt.s32.totalorder %s7058_s16, 1  ;;  %vm240_vm0 = vcmask 130048   ;;  %vm2601_vm1 = vcmask 523264   ;;  %vm6997_vm2 = vcmask 0  }
   0xe   : > { %v466_v2 = vand.u32 4294901760, %v222_v0  ;;  %v469_v3 = vand.u32 4294901760, %v223_v1 }
   0xf   : > { %s12200_s16 = smov (!%p201_p3, %s7058_s16), 1 }
  0x10   : > { %v10012_v4 = vpack.c.bf16 %v469_v3, %v466_v2  ;;  %v10014_v5 = vsub.f32 %v222_v0, %v466_v2  ;;  %v10016_v6 = vsub.f32 %v223_v1, %v469_v3  ;;  %s7069_s21 = sshll.u32 %s12200_s16, 6  ;;  %s213_s22 = scalar_lea.vmem %s11698_s4, %s12200_s16 }
  0x11   : > { %s205_s24 = scalar_lea.vmem %s11696_s2, %s7069_s21  ;;  %s10026_s27 = scalar_lea.vmem %s11697_s3, %s7069_s21 }
  0x12   : > { %11909 = vst [vmem:[#allocation3_spill] sm:$0xff] %v10016_v6  ;;  %9028 = vmatprep.subr.bf16.mxu0 %v10012_v4  ;;  %v11714_v7 = vand.u32 4294901760, %v10014_v5  ;;  %v11713_v8 = vand.u32 4294901760, %v10016_v6  ;;  %v224_v9 = vld [vmem:[%s205_s24] sm:$0xff]  ;;  %v10032_v11 = vld [vmem:[%s205_s24 + $0x8] sm:$0xff]  ;;  %v226_v16 = vld [vmem:[%s205_s24 + $0x10] sm:$0xff] }
  0x13   : > { %9030 = vmatpush3.bf16.msra.mxu0 %v10012_v4  ;;  %v232_v10 = vld [vmem:[%s10026_s27] sm:$0xff]  ;;  %241 = vst.msk [vmem:[#allocation2] sm:$0xff] %vm240_vm0, %v224_v9  ;;  %v257_v12 = vmul.f32 %v224_v9, %v224_v9  ;;  %242 = vst.msk [vmem:[#allocation2 + $0x8] sm:$0xff] %vm240_vm0, %v10032_v11  ;;  %v227_v17 = vld [vmem:[%s205_s24 + $0x18] sm:$0xff]  ;;  %v258_v22 = vmul.f32 %v10032_v11, %v10032_v11  ;;  %v259_v23 = vmul.f32 %v226_v16, %v226_v16 }
  0x14   : > { %v289_v13 = vmul.f32 %v232_v10, %v224_v9  ;;  %249 = vst.msk [vmem:[#allocation2 + $0x40] sm:$0xff] %vm240_vm0, %v232_v10  ;;  %v936_v14 = vsub.f32 %v10014_v5, %v11714_v7  ;;  %v943_v15 = vsub.f32 %v10016_v6, %v11713_v8  ;;  %v228_v18 = vld [vmem:[%s205_s24 + $0x20] sm:$0xff]  ;;  %243 = vst.msk [vmem:[#allocation2 + $0x10] sm:$0xff] %vm240_vm0, %v226_v16  ;;  %v229_v19 = vld [vmem:[%s205_s24 + $0x28] sm:$0xff] }
  0x15   : > { %244 = vst.msk [vmem:[#allocation2 + $0x18] sm:$0xff] %vm240_vm0, %v227_v17  ;;  %245 = vst.msk [vmem:[#allocation2 + $0x20] sm:$0xff] %vm240_vm0, %v228_v18  ;;  %v230_v20 = vld [vmem:[%s205_s24 + $0x30] sm:$0xff]  ;;  %v10047_v21 = vld [vmem:[%s205_s24 + $0x38] sm:$0xff]  ;;  %v260_v24 = vmul.f32 %v227_v17, %v227_v17  ;;  %v261_v25 = vmul.f32 %v228_v18, %v228_v18  ;;  %v262_v31 = vmul.f32 %v229_v19, %v229_v19 }
  0x16   : > { %265 = vst.msk [vmem:[#allocation2 + $0x80] sm:$0xff] %vm240_vm0, %v257_v12  ;;  %297 = vst.msk [vmem:[#allocation2 + $0x100] sm:$0xff] %vm240_vm0, %v289_v13  ;;  %v937_v26 = vand.u32 4294901760, %v936_v14  ;;  %v944_v27 = vand.u32 4294901760, %v943_v15  ;;  %v233_v28 = vld [vmem:[%s10026_s27 + $0x8] sm:$0xff]  ;;  %v234_v29 = vld [vmem:[%s10026_s27 + $0x10] sm:$0xff]  ;;  %v263_v32 = vmul.f32 %v230_v20, %v230_v20  ;;  %v264_v36 = vmul.f32 %v10047_v21, %v10047_v21 }
  0x17   : > { %246 = vst.msk [vmem:[#allocation2 + $0x28] sm:$0xff] %vm240_vm0, %v229_v19  ;;  %247 = vst.msk [vmem:[#allocation2 + $0x30] sm:$0xff] %vm240_vm0, %v230_v20  ;;  %v235_v30 = vld [vmem:[%s10026_s27 + $0x18] sm:$0xff]  ;;  %v236_v33 = vld [vmem:[%s10026_s27 + $0x20] sm:$0xff]  ;;  %v273_v37 = vmul.f32 %v232_v10, %v232_v10  ;;  %v274_v38 = vmul.f32 %v233_v28, %v233_v28  ;;  %v275_v39 = vmul.f32 %v234_v29, %v234_v29 }
  0x18   : > { %248 = vst.msk [vmem:[#allocation2 + $0x38] sm:$0xff] %vm240_vm0, %v10047_v21  ;;  %250 = vst.msk [vmem:[#allocation2 + $0x48] sm:$0xff] %vm240_vm0, %v233_v28  ;;  %v237_v34 = vld [vmem:[%s10026_s27 + $0x28] sm:$0xff]  ;;  %v238_v35 = vld [vmem:[%s10026_s27 + $0x30] sm:$0xff]  ;;  %v10072_v40 = vpack.c.bf16 %v944_v27, %v937_v26  ;;  %v276_v42 = vmul.f32 %v235_v30, %v235_v30  ;;  %v277_v43 = vmul.f32 %v236_v33, %v236_v33 }
  0x19   : > { %251 = vst.msk [vmem:[#allocation2 + $0x50] sm:$0xff] %vm240_vm0, %v234_v29  ;;  %252 = vst.msk [vmem:[#allocation2 + $0x58] sm:$0xff] %vm240_vm0, %v235_v30  ;;  %v239_v41 = vld [vmem:[%s10026_s27 + $0x38] sm:$0xff]  ;;  %v278_v44 = vmul.f32 %v237_v34, %v237_v34  ;;  %v279_v45 = vmul.f32 %v238_v35, %v238_v35  ;;  %v290_v47 = vmul.f32 %v233_v28, %v10032_v11 }
  0x1a   : > { %266 = vst.msk [vmem:[#allocation2 + $0x88] sm:$0xff] %vm240_vm0, %v258_v22  ;;  %267 = vst.msk [vmem:[#allocation2 + $0x90] sm:$0xff] %vm240_vm0, %v259_v23  ;;  %v280_v46 = vmul.f32 %v239_v41, %v239_v41  ;;  %v291_v48 = vmul.f32 %v234_v29, %v226_v16  ;;  %9032 = vmatprep.subr.bf16.mxu0 %v10072_v40  ;;  %v292_v49 = vmul.f32 %v235_v30, %v227_v17  ;;  %v305_v53 = vld [vmem:[#allocation2] sm:$0xff]  ;;  %v306_v54 = vld [vmem:[#allocation2 + $0x8] sm:$0xff] }
  0x1b   : > { %268 = vst.msk [vmem:[#allocation2 + $0x98] sm:$0xff] %vm240_vm0, %v260_v24  ;;  %269 = vst.msk [vmem:[#allocation2 + $0xa0] sm:$0xff] %vm240_vm0, %v261_v25  ;;  %v293_v50 = vmul.f32 %v236_v33, %v228_v18  ;;  %v294_v51 = vmul.f32 %v237_v34, %v229_v19  ;;  %v295_v52 = vmul.f32 %v238_v35, %v230_v20  ;;  %v313_v55 = vld [vmem:[#allocation2 + $0x40] sm:$0xff]  ;;  %v346_v57 = vsel %vm240_vm0, %v305_v53, 0  ;;  %v307_v59 = vld [vmem:[#allocation2 + $0x10] sm:$0xff] }
  0x1c   : > { %253 = vst.msk [vmem:[#allocation2 + $0x60] sm:$0xff] %vm240_vm0, %v236_v33  ;;  %254 = vst.msk [vmem:[#allocation2 + $0x68] sm:$0xff] %vm240_vm0, %v237_v34  ;;  %v296_v56 = vmul.f32 %v239_v41, %v10047_v21  ;;  %v349_v58 = vsel %vm240_vm0, %v306_v54, 0  ;;  %v308_v60 = vld [vmem:[#allocation2 + $0x18] sm:$0xff]  ;;  %v309_v61 = vld [vmem:[#allocation2 + $0x20] sm:$0xff]  ;;  %v10098_v62 = vsel %vm240_vm0, %v313_v55, 0 }
  0x1d   : > { %255 = vst.msk [vmem:[#allocation2 + $0x70] sm:$0xff] %vm240_vm0, %v238_v35  ;;  %270 = vst.msk [vmem:[#allocation2 + $0xa8] sm:$0xff] %vm240_vm0, %v262_v31  ;;  %v10104_v63 = vand.u32 4294901760, %v346_v57  ;;  %v10106_v0 = vand.u32 4294901760, %v349_v58  ;;  %v352_v1 = vsel %vm240_vm0, %v307_v59, 0  ;;  %v355_v2 = vsel %vm240_vm0, %v308_v60, 0 }
  0x1e   : > { %271 = vst.msk [vmem:[#allocation2 + $0xb0] sm:$0xff] %vm240_vm0, %v263_v32  ;;  %256 = vst.msk [vmem:[#allocation2 + $0x78] sm:$0xff] %vm240_vm0, %v239_v41  ;;  %v310_v3 = vld [vmem:[#allocation2 + $0x28] sm:$0xff]  ;;  %v311_v9 = vld [vmem:[#allocation2 + $0x30] sm:$0xff]  ;;  %v10111_v10 = vand.u32 4294901760, %v352_v1  ;;  %v10113_v11 = vand.u32 4294901760, %v355_v2 }
  0x1f   : > { %272 = vst.msk [vmem:[#allocation2 + $0xb8] sm:$0xff] %vm240_vm0, %v264_v36  ;;  %281 = vst.msk [vmem:[#allocation2 + $0xc0] sm:$0xff] %vm240_vm0, %v273_v37  ;;  %v358_v12 = vsel %vm240_vm0, %v309_v61, 0  ;;  %v361_v13 = vsel %vm240_vm0, %v310_v3, 0  ;;  %v312_v14 = vld [vmem:[#allocation2 + $0x38] sm:$0xff]  ;;  %v10118_v15 = vsub.f32 %v346_v57, %v10104_v63  ;;  %v10121_v16 = vsub.f32 %v349_v58, %v10106_v0 }
  0x20   : > { %282 = vst.msk [vmem:[#allocation2 + $0xc8] sm:$0xff] %vm240_vm0, %v274_v38  ;;  %283 = vst.msk [vmem:[#allocation2 + $0xd0] sm:$0xff] %vm240_vm0, %v275_v39  ;;  %v10123_v17 = vand.u32 4294901760, %v358_v12  ;;  %v10125_v18 = vand.u32 4294901760, %v361_v13  ;;  %v10128_v19 = vsub.f32 %v352_v1, %v10111_v10  ;;  %v10131_v20 = vsub.f32 %v355_v2, %v10113_v11  ;;  %v314_v39 = vld [vmem:[#allocation2 + $0x48] sm:$0xff] }
  0x21   : > { %284 = vst.msk [vmem:[#allocation2 + $0xd8] sm:$0xff] %vm240_vm0, %v276_v42  ;;  %285 = vst.msk [vmem:[#allocation2 + $0xe0] sm:$0xff] %vm240_vm0, %v277_v43  ;;  %v364_v21 = vsel %vm240_vm0, %v311_v9, 0  ;;  %v367_v22 = vsel %vm240_vm0, %v312_v14, 0  ;;  %v11712_v23 = vand.u32 4294901760, %v10118_v15  ;;  %v11710_v24 = vand.u32 4294901760, %v10121_v16 }
  0x22   : > { %286 = vst.msk [vmem:[#allocation2 + $0xe8] sm:$0xff] %vm240_vm0, %v278_v44  ;;  %287 = vst.msk [vmem:[#allocation2 + $0xf0] sm:$0xff] %vm240_vm0, %v279_v45  ;;  %v10138_v25 = vsub.f32 %v358_v12, %v10123_v17  ;;  %v10141_v26 = vsub.f32 %v361_v13, %v10125_v18  ;;  %v11709_v27 = vand.u32 4294901760, %v10128_v19  ;;  %v11707_v28 = vand.u32 4294901760, %v10131_v20  ;;  %v315_v45 = vld [vmem:[#allocation2 + $0x50] sm:$0xff] }
  0x23   : > { %288 = vst.msk [vmem:[#allocation2 + $0xf8] sm:$0xff] %vm240_vm0, %v280_v46  ;;  %298 = vst.msk [vmem:[#allocation2 + $0x108] sm:$0xff] %vm240_vm0, %v290_v47  ;;  %v10145_v29 = vand.u32 4294901760, %v364_v21  ;;  %v10147_v30 = vand.u32 4294901760, %v367_v22  ;;  %v535_v31 = vsub.f32 %v10118_v15, %v11712_v23  ;;  %v545_v32 = vsub.f32 %v10121_v16, %v11710_v24  ;;  %v318_v60 = vld [vmem:[#allocation2 + $0x68] sm:$0xff] }
  0x24   : > { %299 = vst.msk [vmem:[#allocation2 + $0x110] sm:$0xff] %vm240_vm0, %v291_v48  ;;  %300 = vst.msk [vmem:[#allocation2 + $0x118] sm:$0xff] %vm240_vm0, %v292_v49  ;;  %v11706_v33 = vand.u32 4294901760, %v10138_v25  ;;  %v11704_v34 = vand.u32 4294901760, %v10141_v26  ;;  %v555_v35 = vsub.f32 %v10128_v19, %v11709_v27  ;;  %v565_v36 = vsub.f32 %v10131_v20, %v11707_v28  ;;  %v316_v49 = vld [vmem:[#allocation2 + $0x58] sm:$0xff]  ;;  %v319_v9 = vld [vmem:[#allocation2 + $0x70] sm:$0xff] }
  0x25   : > { %301 = vst.msk [vmem:[#allocation2 + $0x120] sm:$0xff] %vm240_vm0, %v293_v50  ;;  %302 = vst.msk [vmem:[#allocation2 + $0x128] sm:$0xff] %vm240_vm0, %v294_v51  ;;  %v10164_v37 = vsub.f32 %v364_v21, %v10145_v29  ;;  %v10167_v38 = vsub.f32 %v367_v22, %v10147_v30  ;;  %v536_v41 = vand.u32 4294901760, %v535_v31  ;;  %v546_v42 = vand.u32 4294901760, %v545_v32  ;;  %v317_v50 = vld [vmem:[#allocation2 + $0x60] sm:$0xff]  ;;  %v320_v32 = vld [vmem:[#allocation2 + $0x78] sm:$0xff] }
  0x26   : > { %303 = vst.msk [vmem:[#allocation2 + $0x130] sm:$0xff] %vm240_vm0, %v295_v52  ;;  %304 = vst.msk [vmem:[#allocation2 + $0x138] sm:$0xff] %vm240_vm0, %v296_v56  ;;  %v575_v43 = vsub.f32 %v10138_v25, %v11706_v33  ;;  %v585_v44 = vsub.f32 %v10141_v26, %v11704_v34  ;;  %v556_v46 = vand.u32 4294901760, %v555_v35  ;;  %v10179_v51 = vpack.c.bf16 %v10016_v6, %v10014_v5  ;;  %v326_v34 = vld [vmem:[#allocation2 + $0xa8] sm:$0xff]  ;;  %v327_v28 = vld [vmem:[#allocation2 + $0xb0] sm:$0xff] }
  0x27   : > { %11910 = vst [vmem:[#allocation4_spill] sm:$0xff] %v10121_v16  ;;  %11911 = vst [vmem:[#allocation5_spill] sm:$0xff] %v10128_v19  ;;  %v11703_v47 = vand.u32 4294901760, %v10164_v37  ;;  %v11702_v48 = vand.u32 4294901760, %v10167_v38  ;;  %7807 = vmatprep.mubr.f32.mxu0 %v536_v41  ;;  %v566_v52 = vand.u32 4294901760, %v565_v36  ;;  %v10182_v54 = vand.u32 4294901760, %v10098_v62 }
  0x28   : > { %11912 = vst [vmem:[#allocation6_spill] sm:$0xff] %v10131_v20  ;;  %11913 = vst [vmem:[#allocation7_spill] sm:$0xff] %v10138_v25  ;;  %v576_v53 = vand.u32 4294901760, %v575_v43  ;;  %v373_v55 = vsel %vm240_vm0, %v314_v39, 0  ;;  %7808 = vmatmul.mubr.f32.vlgmr.msra.gmra.mrb[0].mxu0 %v546_v42  ;;  %v586_v56 = vand.u32 4294901760, %v585_v44  ;;  %v376_v59 = vsel %vm240_vm0, %v315_v45, 0 }
  0x29   : > { %11914 = vst [vmem:[#allocation8_spill] sm:$0xff] %v10141_v26  ;;  %11915 = vst [vmem:[#allocation9_spill] sm:$0xff] %v10164_v37  ;;  %v595_v57 = vsub.f32 %v10164_v37, %v11703_v47  ;;  %v10188_v58 = vand.u32 4294901760, %v373_v55  ;;  %9034 = vmatpush3.bf16.msra.mxu0 %v10072_v40  ;;  %7810 = vmatprep.mubr.f32.mxu0 %v556_v46  ;;  %v10194_v61 = vsub.f32 %v10098_v62, %v10182_v54  ;;  %v329_v8 = vld [vmem:[#allocation2 + $0xc0] sm:$0xff] }
  0x2a   : > { %11916 = vst [vmem:[#allocation10_spill] sm:$0xff] %v10167_v38  ;;  %v10196_v1 = vand.u32 4294901760, %v376_v59  ;;  %v379_v2 = vsel %vm240_vm0, %v316_v49, 0  ;;  %v382_v3 = vsel %vm240_vm0, %v317_v50, 0  ;;  %v605_v13 = vsub.f32 %v10167_v38, %v11702_v48  ;;  %9036 = vmatprep.subr.bf16.mxu0 %v10179_v51  ;;  %v321_v50 = vld [vmem:[#allocation2 + $0x80] sm:$0xff]  ;;  %v338_v37 = vld [vmem:[#allocation2 + $0x108] sm:$0xff] }
  0x2b   : > { %11917 = vst [vmem:[#allocation11_spill] sm:$0xff] %v10194_v61  ;;  %v596_v12 = vand.u32 4294901760, %v595_v57  ;;  %v10204_v14 = vsub.f32 %v373_v55, %v10188_v58  ;;  %v10206_v40 = vand.u32 4294901760, %v379_v2  ;;  %v11701_v62 = vand.u32 4294901760, %v10194_v61 }
  0x2c   : > { %v10211_v21 = vsub.f32 %v376_v59, %v10196_v1  ;;  %v10213_v22 = vand.u32 4294901760, %v382_v3  ;;  %v385_v31 = vsel %vm240_vm0, %v318_v60, 0  ;;  %7811 = vmatmul.mubr.f32.gmra.mrb[2].mxu0 %v566_v52  ;;  %v388_v41 = vsel %vm240_vm0, %v319_v9, 0  ;;  %v322_v60 = vld [vmem:[#allocation2 + $0x88] sm:$0xff] }
  0x2d   : > { %11918 = vst [vmem:[#allocation12_spill] sm:$0xff] %v10204_v14  ;;  %v11699_v35 = vand.u32 4294901760, %v10204_v14  ;;  %v10218_v36 = vsub.f32 %v379_v2, %v10206_v40  ;;  %v10220_v39 = vand.u32 4294901760, %v385_v31  ;;  %7813 = vmatprep.mubr.f32.mxu0 %v576_v53  ;;  %v615_v42 = vsub.f32 %v10194_v61, %v11701_v62  ;;  %v323_v2 = vld [vmem:[#allocation2 + $0x90] sm:$0xff]  ;;  %v342_v20 = vld [vmem:[#allocation2 + $0x128] sm:$0xff] }
  0x2e   : > { %11919 = vst [vmem:[#allocation13_spill] sm:$0xff] %v10211_v21  ;;  %v11700_v43 = vand.u32 4294901760, %v10211_v21  ;;  %v10228_v44 = vsub.f32 %v382_v3, %v10213_v22  ;;  %v10230_v45 = vand.u32 4294901760, %v388_v41  ;;  %v391_v49 = vsel %vm240_vm0, %v320_v32, 0  ;;  %v343_v16 = vld [vmem:[#allocation2 + $0x130] sm:$0xff] }
  0x2f   : > { %11920 = vst [vmem:[#allocation14_spill] sm:$0xff] %v10218_v36  ;;  %v625_v46 = vsub.f32 %v10204_v14, %v11699_v35  ;;  %v10237_v52 = vsub.f32 %v385_v31, %v10220_v39  ;;  %v606_v53 = vand.u32 4294901760, %v605_v13  ;;  %v11705_v57 = vand.u32 4294901760, %v10218_v36  ;;  %v324_v35 = vld [vmem:[#allocation2 + $0x98] sm:$0xff] }
  0x30   : > { %11921 = vst [vmem:[#allocation15_spill] sm:$0xff] %v10228_v44  ;;  %7814 = vmatmul.mubr.f32.gmra.mrb[4].mxu0 %v586_v56  ;;  %v635_v55 = vsub.f32 %v10211_v21, %v11700_v43  ;;  %v10243_v59 = vand.u32 4294901760, %v391_v49  ;;  %v616_v3 = vand.u32 4294901760, %v615_v42  ;;  %v11708_v9 = vand.u32 4294901760, %v10228_v44  ;;  %v325_v42 = vld [vmem:[#allocation2 + $0xa0] sm:$0xff] }
  0x31   : > { %11922 = vst [vmem:[#allocation16_spill] sm:$0xff] %v10237_v52  ;;  %7816 = vmatprep.mubr.f32.mxu0 %v596_v12  ;;  %v10247_v32 = vsub.f32 %v388_v41, %v10230_v45  ;;  %v394_v56 = vsel %vm240_vm0, %v321_v50, 0  ;;  %v626_v13 = vand.u32 4294901760, %v625_v46  ;;  %v11711_v43 = vand.u32 4294901760, %v10237_v52 }
  0x32   : > { %v10250_v31 = vand.u32 4294901760, %v394_v56  ;;  %v10254_v62 = vsub.f32 %v391_v49, %v10243_v59  ;;  %v397_v48 = vsel %vm240_vm0, %v322_v60, 0  ;;  %v400_v12 = vsel %vm240_vm0, %v323_v2, 0 }
  0x33   : > { %11923 = vst [vmem:[#allocation17_spill] sm:$0xff] %v10247_v32  ;;  %v636_v47 = vand.u32 4294901760, %v635_v55  ;;  %v645_v41 = vsub.f32 %v10218_v36, %v11705_v57  ;;  %v10264_v50 = vand.u32 4294901760, %v397_v48  ;;  %v655_v49 = vsub.f32 %v10228_v44, %v11708_v9 }
  0x34   : > { %11924 = vst [vmem:[#allocation18_spill] sm:$0xff] %v10250_v31  ;;  %11925 = vst [vmem:[#allocation19_spill] sm:$0xff] %v10254_v62  ;;  %7817 = vmatmul.mubr.f32.gmra.mrb[6].mxu0 %v606_v53  ;;  %v10262_v46 = vsub.f32 %v394_v56, %v10250_v31  ;;  %v11715_v60 = vand.u32 4294901760, %v10247_v32  ;;  %v10270_v2 = vand.u32 4294901760, %v400_v12  ;;  %v403_v53 = vsel %vm240_vm0, %v324_v35, 0 }
  0x35   : > { %11927 = vst [vmem:[#allocation21_spill] sm:$0xff] %v10264_v50  ;;  %7819 = vmatprep.mubr.f32.mxu0 %v616_v3  ;;  %v406_v55 = vsel %vm240_vm0, %v325_v42, 0  ;;  %v665_v56 = vsub.f32 %v10237_v52, %v11711_v43  ;;  %v11718_v57 = vand.u32 4294901760, %v10254_v62  ;;  %v10278_v33 = vand.u32 4294901760, %v403_v53 }
  0x36   : > { %11926 = vst [vmem:[#allocation20_spill] sm:$0xff] %v10262_v46  ;;  %11928 = vst [vmem:[#allocation22_spill] sm:$0xff] %v10270_v2  ;;  %v409_v3 = vsel %vm240_vm0, %v326_v34, 0  ;;  %v646_v9 = vand.u32 4294901760, %v645_v41  ;;  %v11721_v27 = vand.u32 4294901760, %v10262_v46  ;;  %v10283_v24 = vsub.f32 %v397_v48, %v10264_v50  ;;  %v328_v34 = vld [vmem:[#allocation2 + $0xb8] sm:$0xff] }
  0x37   : > { %11929 = vst [vmem:[#allocation23_spill] sm:$0xff] %v10278_v33  ;;  %v656_v35 = vand.u32 4294901760, %v655_v49  ;;  %v675_v42 = vsub.f32 %v10247_v32, %v11715_v60  ;;  %v10289_v43 = vsub.f32 %v400_v12, %v10270_v2  ;;  %v10291_v23 = vand.u32 4294901760, %v406_v55  ;;  %v333_v49 = vld [vmem:[#allocation2 + $0xe0] sm:$0xff] }
  0x38   : > { %7820 = vmatmul.mubr.f32.gmra.mrb[8].mxu0 %v626_v13  ;;  %11930 = vst [vmem:[#allocation24_spill] sm:$0xff] %v10283_v24  ;;  %v10293_v13 = vand.u32 4294901760, %v409_v3  ;;  %v412_v41 = vsel %vm240_vm0, %v327_v28, 0  ;;  %v666_v7 = vand.u32 4294901760, %v665_v56  ;;  %v10300_v48 = vsub.f32 %v403_v53, %v10278_v33 }
  0x39   : > { %7822 = vmatprep.mubr.f32.mxu0 %v636_v47  ;;  %11931 = vst [vmem:[#allocation25_spill] sm:$0xff] %v10289_v43  ;;  %11932 = vst [vmem:[#allocation26_spill] sm:$0xff] %v10291_v23  ;;  %v685_v47 = vsub.f32 %v10254_v62, %v11718_v57  ;;  %v695_v12 = vsub.f32 %v10262_v46, %v11721_v27  ;;  %v415_v60 = vsel %vm240_vm0, %v328_v34, 0  ;;  %v418_v32 = vsel %vm240_vm0, %v329_v8, 0  ;;  %v331_v27 = vld [vmem:[#allocation2 + $0xd0] sm:$0xff] }
  0x3a   : > { %11933 = vst [vmem:[#allocation27_spill] sm:$0xff] %v10293_v13  ;;  %11934 = vst [vmem:[#allocation28_spill] sm:$0xff] %v10300_v48  ;;  %v676_v28 = vand.u32 4294901760, %v675_v42  ;;  %v10310_v57 = vsub.f32 %v406_v55, %v10291_v23  ;;  %v10312_v53 = vand.u32 4294901760, %v412_v41  ;;  %v10315_v62 = vsub.f32 %v409_v3, %v10293_v13 }
  0x3b   : > { %v10318_v46 = vand.u32 4294901760, %v415_v60  ;;  %v10320_v34 = vand.u32 4294901760, %v418_v32  ;;  %v686_v8 = vand.u32 4294901760, %v685_v47  ;;  %v11940_v42 = vand.u32 4294901760, %v10283_v24 }
  0x3c   : > { %7823 = vmatmul.mubr.f32.gmra.mrb[10].mxu0 %v646_v9  ;;  %11935 = vst [vmem:[#allocation29_spill] sm:$0xff] %v10310_v57  ;;  %11936 = vst [vmem:[#allocation30_spill] sm:$0xff] %v10312_v53  ;;  %v330_v9 = vld [vmem:[#allocation2 + $0xc8] sm:$0xff]  ;;  %v11941_v3 = vand.u32 4294901760, %v10289_v43  ;;  %v10331_v44 = vsub.f32 %v412_v41, %v10312_v53  ;;  %v11943_v36 = vand.u32 4294901760, %v10300_v48  ;;  %v11948_v47 = vand.u32 4294901760, %v10310_v57 }
  0x3d   : > { %7825 = vmatprep.mubr.f32.mxu0 %v656_v35  ;;  %11937 = vst [vmem:[#allocation31_spill] sm:$0xff] %v10315_v62  ;;  %11938 = vst [vmem:[#allocation32_spill] sm:$0xff] %v10318_v46  ;;  %v696_v35 = vand.u32 4294901760, %v695_v12  ;;  %v705_v55 = vsub.f32 %v10283_v24, %v11940_v42  ;;  %v421_v56 = vsel %vm240_vm0, %v330_v9, 0  ;;  %v332_v12 = vld [vmem:[#allocation2 + $0xd8] sm:$0xff]  ;;  %v10342_v9 = vsub.f32 %v418_v32, %v10320_v34  ;;  %v335_v32 = vld [vmem:[#allocation2 + $0xf0] sm:$0xff] }
  0x3e   : > { %11939 = vst [vmem:[#allocation33_spill] sm:$0xff] %v10320_v34  ;;  %v715_v52 = vsub.f32 %v10289_v43, %v11941_v3  ;;  %11942 = vst [vmem:[#allocation34_spill] sm:$0xff] %v10331_v44  ;;  %v725_v42 = vsub.f32 %v10300_v48, %v11943_v36  ;;  %v10344_v3 = vand.u32 4294901760, %v421_v56  ;;  %v735_v24 = vsub.f32 %v10310_v57, %v11948_v47  ;;  %v334_v48 = vld [vmem:[#allocation2 + $0xe8] sm:$0xff] }
  0x3f   : > { %11945 = vst [vmem:[#allocation36_spill] sm:$0xff] %v10342_v9  ;;  %v706_v41 = vand.u32 4294901760, %v705_v55  ;;  %v11949_v21 = vand.u32 4294901760, %v10315_v62  ;;  %v433_v36 = vsel %vm240_vm0, %v334_v48, 0 }
  0x40   : > { %7826 = vmatmul.mubr.f32.gmra.mrb[12].mxu0 %v666_v7  ;;  %v424_v7 = vsel %vm240_vm0, %v331_v27, 0  ;;  %11946 = vst [vmem:[#allocation37_spill] sm:$0xff] %v10344_v3  ;;  %v716_v27 = vand.u32 4294901760, %v715_v52  ;;  %v726_v55 = vand.u32 4294901760, %v725_v42  ;;  %v10360_v61 = vsub.f32 %v421_v56, %v10344_v3  ;;  %v336_v56 = vld [vmem:[#allocation2 + $0xf8] sm:$0xff] }
  0x41   : > { %7828 = vmatprep.mubr.f32.mxu0 %v676_v28  ;;  %v10339_v28 = vsub.f32 %v415_v60, %v10318_v46  ;;  %v10346_v43 = vand.u32 4294901760, %v424_v7  ;;  %v427_v60 = vsel %vm240_vm0, %v332_v12, 0  ;;  %v745_v14 = vsub.f32 %v10315_v62, %v11949_v21 }
  0x42   : > { %11950 = vst [vmem:[#allocation39_spill] sm:$0xff] %v10360_v61  ;;  %v10365_v12 = vand.u32 4294901760, %v427_v60  ;;  %v436_v21 = vsel %vm240_vm0, %v335_v32, 0  ;;  %v11953_v42 = vand.u32 4294901760, %v10331_v44  ;;  %v10378_v38 = vand.u32 4294901760, %v433_v36 }
  0x43   : > { %11944 = vst [vmem:[#allocation35_spill] sm:$0xff] %v10339_v28  ;;  %11947 = vst [vmem:[#allocation38_spill] sm:$0xff] %v10346_v43  ;;  %v10363_v47 = vsub.f32 %v424_v7, %v10346_v43  ;;  %v746_v62 = vand.u32 4294901760, %v745_v14  ;;  %v10380_v48 = vand.u32 4294901760, %v436_v21 }
  0x44   : > { %7829 = vmatmul.mubr.f32.gmra.mrb[14].mxu0 %v686_v8  ;;  %v430_v8 = vsel %vm240_vm0, %v333_v49, 0  ;;  %11952 = vst [vmem:[#allocation41_spill] sm:$0xff] %v10365_v12  ;;  %v736_v49 = vand.u32 4294901760, %v735_v24  ;;  %11956 = vst [vmem:[#allocation43_spill] sm:$0xff] %v10378_v38  ;;  %v11958_v24 = vand.u32 4294901760, %v10342_v9  ;;  %v10387_v14 = vsub.f32 %v427_v60, %v10365_v12 }
  0x45   : > { %7831 = vmatprep.mubr.f32.mxu0 %v696_v35  ;;  %11951 = vst [vmem:[#allocation40_spill] sm:$0xff] %v10363_v47  ;;  %v755_v35 = vsub.f32 %v10331_v44, %v11953_v42  ;;  %v10372_v52 = vand.u32 4294901760, %v430_v8  ;;  %11957 = vst [vmem:[#allocation44_spill] sm:$0xff] %v10380_v48  ;;  %v11762_v42 = vand.u32 4294901760, %v10363_v47  ;;  %v439_v44 = vsel %vm240_vm0, %v336_v56, 0 }
  0x46   : > { %v775_v32 = vsub.f32 %v10342_v9, %v11958_v24  ;;  %11959 = vst [vmem:[#allocation45_spill] sm:$0xff] %v10387_v14  ;;  %v10395_v25 = vsub.f32 %v433_v36, %v10378_v38  ;;  %v10398_v24 = vsub.f32 %v436_v21, %v10380_v48  ;;  %v10400_v60 = vand.u32 4294901760, %v439_v44 }
  0x47   : > { %11954 = vst [vmem:[#allocation42_spill] sm:$0xff] %v10372_v52  ;;  %v10391_v57 = vsub.f32 %v430_v8, %v10372_v52  ;;  %v445_v21 = vsel %vm240_vm0, %v338_v37, 0 }
  0x48   : > { %7832 = vmatmul.mubr.f32.gmra.mrb[16].mxu0 %v706_v41  ;;  %v11955_v41 = vand.u32 4294901760, %v10339_v28  ;;  %11961 = vst [vmem:[#allocation47_spill] sm:$0xff] %v10395_v25  ;;  %11962 = vst [vmem:[#allocation48_spill] sm:$0xff] %v10398_v24  ;;  %v776_v56 = vand.u32 4294901760, %v775_v32  ;;  %v340_v32 = vld [vmem:[#allocation2 + $0x118] sm:$0xff]  ;;  %v11973_v19 = vand.u32 4294901760, %v10398_v24 }
  0x49   : > { %7834 = vmatprep.mubr.f32.mxu0 %v716_v27  ;;  %v337_v27 = vld [vmem:[#allocation2 + $0x100] sm:$0xff]  ;;  %11960 = vst [vmem:[#allocation46_spill] sm:$0xff] %v10391_v57  ;;  %11963 = vst [vmem:[#allocation49_spill] sm:$0xff] %v10400_v60  ;;  %v11970_v9 = vand.u32 4294901760, %v10391_v57 }
  0x4a   : > { %v765_v7 = vsub.f32 %v10339_v28, %v11955_v41  ;;  %v756_v41 = vand.u32 4294901760, %v755_v35  ;;  %v442_v28 = vsel %vm240_vm0, %v337_v27, 0  ;;  %v11964_v35 = vand.u32 4294901760, %v10360_v61 }
  0x4b   : > { %v10410_v27 = vand.u32 4294901760, %v442_v28 }
  0x4c   : > { %7835 = vmatmul.mubr.f32.gmra.mrb[18].mxu0 %v726_v55  ;;  %v339_v55 = vld [vmem:[#allocation2 + $0x110] sm:$0xff]  ;;  %v766_v26 = vand.u32 4294901760, %v765_v7  ;;  %v785_v8 = vsub.f32 %v10360_v61, %v11964_v35  ;;  %v10417_v61 = vsub.f32 %v439_v44, %v10400_v60  ;;  %v815_v35 = vsub.f32 %v10391_v57, %v11970_v9 }
  0x4d   : > { %7837 = vmatprep.mubr.f32.mxu0 %v736_v49  ;;  %v795_v49 = vsub.f32 %v10363_v47, %v11762_v42  ;;  %11965 = vst [vmem:[#allocation50_spill] sm:$0xff] %v10410_v27  ;;  %v341_v42 = vld [vmem:[#allocation2 + $0x120] sm:$0xff]  ;;  %v10422_v47 = vand.u32 4294901760, %v445_v21  ;;  %v10430_v44 = vsub.f32 %v442_v28, %v10410_v27 }
  0x4e   : > { %11966 = vst [vmem:[#allocation51_spill] sm:$0xff] %v10417_v61  ;;  %v786_v7 = vand.u32 4294901760, %v785_v8  ;;  %v454_v8 = vsel %vm240_vm0, %v341_v42, 0  ;;  %v816_v57 = vand.u32 4294901760, %v815_v35 }
  0x4f   : > { %11968 = vst [vmem:[#allocation52_spill] sm:$0xff] %v10422_v47  ;;  %11971 = vst [vmem:[#allocation54_spill] sm:$0xff] %v10430_v44  ;;  %v10442_v28 = vsub.f32 %v445_v21, %v10422_v47  ;;  %v11976_v21 = vand.u32 4294901760, %v10417_v61 }
  0x50   : > { %7838 = vmatmul.mubr.f32.gmra.mrb[20].mxu0 %v746_v62  ;;  %v448_v62 = vsel %vm240_vm0, %v339_v55, 0  ;;  %v796_v55 = vand.u32 4294901760, %v795_v49  ;;  %v460_v49 = vsel %vm240_vm0, %v343_v16, 0  ;;  %v11979_v16 = vand.u32 4294901760, %v10430_v44 }
  0x51   : > { %7840 = vmatprep.mubr.f32.mxu0 %v756_v41  ;;  %v11967_v41 = vand.u32 4294901760, %v10387_v14  ;;  %v10424_v37 = vand.u32 4294901760, %v448_v62  ;;  %v11784_v6 = vand.u32 4294901760, %v10442_v28 }
  0x53   : > { %v805_v36 = vsub.f32 %v10387_v14, %v11967_v41  ;;  %11969 = vst [vmem:[#allocation53_spill] sm:$0xff] %v10424_v37  ;;  %v11972_v41 = vand.u32 4294901760, %v10395_v25 }
  0x54   : > { %7841 = vmatmul.mubr.f32.gmra.mrb[22].mxu0 %v766_v26  ;;  %v451_v26 = vsel %vm240_vm0, %v340_v32, 0  ;;  %v10445_v32 = vsub.f32 %v448_v62, %v10424_v37  ;;  %v845_v62 = vsub.f32 %v10417_v61, %v11976_v21 }
  0x55   : > { %7843 = vmatprep.mubr.f32.mxu0 %v776_v56  ;;  %v825_v14 = vsub.f32 %v10395_v25, %v11972_v41  ;;  %v835_v56 = vsub.f32 %v10398_v24, %v11973_v19  ;;  %v806_v9 = vand.u32 4294901760, %v805_v36  ;;  %v10447_v42 = vand.u32 4294901760, %v451_v26 }
  0x56   : > { %v10450_v25 = vand.u32 4294901760, %v454_v8  ;;  %v457_v19 = vsel %vm240_vm0, %v342_v20, 0  ;;  %v855_v20 = vsub.f32 %v10430_v44, %v11979_v16  ;;  %v846_v21 = vand.u32 4294901760, %v845_v62 }
  0x57   : > { %11974 = vst [vmem:[#allocation55_spill] sm:$0xff] %v10447_v42  ;;  %v826_v36 = vand.u32 4294901760, %v825_v14  ;;  %v836_v24 = vand.u32 4294901760, %v835_v56  ;;  %v10462_v41 = vand.u32 4294901760, %v457_v19  ;;  %v10470_v56 = vand.u32 4294901760, %v460_v49 }
  0x58   : > { %7844 = vmatmul.mubr.f32.gmra.mrb[24].mxu0 %v786_v7  ;;  %11975 = vst [vmem:[#allocation56_spill] sm:$0xff] %v10450_v25  ;;  %v344_v7 = vld [vmem:[#allocation2 + $0x138] sm:$0xff]  ;;  %v10468_v14 = vsub.f32 %v454_v8, %v10450_v25  ;;  %v856_v8 = vand.u32 4294901760, %v855_v20  ;;  %v11982_v16 = vand.u32 4294901760, %v10445_v32 }
  0x59   : > { %7846 = vmatprep.mubr.f32.mxu0 %v796_v55  ;;  %v10460_v55 = vsub.f32 %v451_v26, %v10447_v42  ;;  %11978 = vst [vmem:[#allocation58_spill] sm:$0xff] %v10462_v41  ;;  %11980 = vst [vmem:[#allocation59_spill] sm:$0xff] %v10470_v56  ;;  %v865_v26 = vsub.f32 %v10442_v28, %v11784_v6 }
  0x5a   : > { %v875_v44 = vsub.f32 %v10445_v32, %v11982_v16 }
  0x5b   : > { %11977 = vst [vmem:[#allocation57_spill] sm:$0xff] %v10460_v55  ;;  %v11785_v35 = vand.u32 4294901760, %v10460_v55  ;;  %v866_v62 = vand.u32 4294901760, %v865_v26 }
  0x5c   : > { %7847 = vmatmul.mubr.f32.gmra.mrb[26].mxu0 %v806_v9  ;;  %v463_v9 = vsel %vm240_vm0, %v344_v7, 0  ;;  %v11791_v7 = vand.u32 4294901760, %v10468_v14  ;;  %v876_v20 = vand.u32 4294901760, %v875_v44 }
  0x5d   : > { %7849 = vmatprep.mubr.f32.mxu0 %v816_v57  ;;  %v10478_v57 = vsub.f32 %v457_v19, %v10462_v41  ;;  %v10480_v61 = vand.u32 4294901760, %v463_v9  ;;  %v885_v19 = vsub.f32 %v10460_v55, %v11785_v35 }
  0x5e   : > { %v895_v16 = vsub.f32 %v10468_v14, %v11791_v7  ;;  %v12000_v7 = vld [vmem:[#allocation19_spill] sm:$0xff] }
  0x5f   : > { %11981 = vst [vmem:[#allocation60_spill] sm:$0xff] %v10480_v61  ;;  %v11790_v6 = vand.u32 4294901760, %v10478_v57 }
  0x60   : > { %7850 = vmatmul.mubr.f32.gmra.mrb[28].mxu0 %v826_v36  ;;  %v10487_v36 = vsub.f32 %v460_v49, %v10470_v56  ;;  %v896_v55 = vand.u32 4294901760, %v895_v16 }
  0x61   : > { %7852 = vmatprep.mubr.f32.mxu0 %v836_v24  ;;  %v10494_v24 = vsub.f32 %v463_v9, %v10480_v61  ;;  %v905_v26 = vsub.f32 %v10478_v57, %v11790_v6  ;;  %v11999_v6 = vld [vmem:[#allocation17_spill] sm:$0xff] }
  0x62   : > { %v11789_v49 = vand.u32 4294901760, %v10487_v36 }
  0x63   : > { %v11788_v35 = vand.u32 4294901760, %v10494_v24  ;;  %v906_v9 = vand.u32 4294901760, %v905_v26  ;;  %v11987_v26 = vld [vmem:[#allocation5_spill] sm:$0xff] }
  0x64   : > { %7853 = vmatmul.mubr.f32.gmra.mrb[30].mxu0 %v846_v21  ;;  %v886_v21 = vand.u32 4294901760, %v885_v19  ;;  %v915_v44 = vsub.f32 %v10487_v36, %v11789_v49  ;;  %v11998_v49 = vld [vmem:[#allocation16_spill] sm:$0xff] }
  0x65   : > { %7855 = vmatprep.mubr.f32.mxu0 %v856_v8  ;;  %v925_v8 = vsub.f32 %v10494_v24, %v11788_v35  ;;  %v11997_v35 = vld [vmem:[#allocation15_spill] sm:$0xff] }
  0x67   : > { %v926_v19 = vand.u32 4294901760, %v925_v8  ;;  %v11990_v8 = vld [vmem:[#allocation8_spill] sm:$0xff] }
  0x68   : > { %7856 = vmatmul.mubr.f32.gmra.mrb[32].mxu0 %v866_v62  ;;  %v916_v62 = vand.u32 4294901760, %v915_v44  ;;  %v11988_v44 = vld [vmem:[#allocation6_spill] sm:$0xff] }
  0x69   : > { %7858 = vmatprep.mubr.f32.mxu0 %v876_v20 }
  0x6c   : > { %7859 = vmatmul.mubr.f32.gmra.mrb[34].mxu0 %v886_v21  ;;  %v11986_v21 = vld [vmem:[#allocation4_spill] sm:$0xff] }
  0x6d   : > { %7861 = vmatprep.mubr.f32.mxu0 %v896_v55  ;;  %v11984_v55 = vld [vmem:[#allocation3_spill] sm:$0xff] }
  0x6e   : > { %v11985_v20 = vand.u32 4294901760, %v11984_v55  ;;  %v11995_v55 = vld [vmem:[#allocation13_spill] sm:$0xff] }
  0x70   : > { %7862 = vmatmul.mubr.f32.gmra.mrb[36].mxu0 %v906_v9  ;;  %v11989_v9 = vld [vmem:[#allocation7_spill] sm:$0xff] }
  0x71   : > { %7864 = vmatprep.mubr.f32.mxu0 %v916_v62  ;;  %v11991_v62 = vld [vmem:[#allocation9_spill] sm:$0xff] }
  0x74   : > { %7865 = vmatmul.mubr.f32.gmra.mrb[38].mxu0 %v926_v19  ;;  %v11992_v19 = vld [vmem:[#allocation10_spill] sm:$0xff] }
  0x75   : > { %7871 = vmatprep.mubr.f32.mxu0 %v10104_v63 }
  0x78   : > { %7872 = vmatmul.mubr.f32.vlgmr.msra.gmra.mrb[0].mxu0 %v10106_v0 }
  0x79   : > { %9038 = vmatpush3.bf16.msra.mxu0 %v10179_v51  ;;  %7874 = vmatprep.mubr.f32.mxu0 %v10111_v10  ;;  %v11983_v51 = vand.u32 4294901760, %v10014_v5  ;;  %v11993_v5 = vld [vmem:[#allocation11_spill] sm:$0xff] }
  0x7a   : > { %9040 = vmatprep.subr.bf16.mxu0 %v10012_v4 }
  0x7b   : > { %v9043_v16 = vpack.c.bf16 %v11985_v20, %v11983_v51  ;;  %v11994_v51 = vld [vmem:[#allocation12_spill] sm:$0xff]  ;;  %v11996_v20 = vld [vmem:[#allocation14_spill] sm:$0xff] }
  0x7c   : > { %7875 = vmatmul.mubr.f32.gmra.mrb[2].mxu0 %v10113_v11 }
  0x7d   : > { %7877 = vmatprep.mubr.f32.mxu0 %v10123_v17 }
  0x80   : > { %7878 = vmatmul.mubr.f32.gmra.mrb[4].mxu0 %v10125_v18 }
  0x81   : > { %7880 = vmatprep.mubr.f32.mxu0 %v10145_v29 }
  0x84   : > { %7881 = vmatmul.mubr.f32.gmra.mrb[6].mxu0 %v10147_v30 }
  0x85   : > { %7883 = vmatprep.mubr.f32.mxu0 %v10182_v54 }
  0x88   : > { %7884 = vmatmul.mubr.f32.gmra.mrb[8].mxu0 %v10188_v58 }
  0x89   : > { %7886 = vmatprep.mubr.f32.mxu0 %v10196_v1 }
  0x8c   : > { %7887 = vmatmul.mubr.f32.gmra.mrb[10].mxu0 %v10206_v40 }
  0x8d   : > { %7889 = vmatprep.mubr.f32.mxu0 %v10213_v22 }
  0x90   : > { %7890 = vmatmul.mubr.f32.gmra.mrb[12].mxu0 %v10220_v39 }
  0x91   : > { %7892 = vmatprep.mubr.f32.mxu0 %v10230_v45 }
  0x94   : > { %7893 = vmatmul.mubr.f32.gmra.mrb[14].mxu0 %v10243_v59 }
  0x95   : > { %7895 = vmatprep.mubr.f32.mxu0 %v10250_v31  ;;  %v12024_v31 = vand.u32 4294901760, %v11990_v8 }
  0x98   : > { %7896 = vmatmul.mubr.f32.gmra.mrb[16].mxu0 %v10264_v50  ;;  %v12023_v50 = vand.u32 4294901760, %v11989_v9 }
  0x99   : > { %7898 = vmatprep.mubr.f32.mxu0 %v10270_v2  ;;  %v12022_v2 = vand.u32 4294901760, %v11988_v44 }
  0x9c   : > { %7899 = vmatmul.mubr.f32.gmra.mrb[18].mxu0 %v10278_v33  ;;  %v12021_v33 = vand.u32 4294901760, %v11987_v26 }
  0x9d   : > { %7901 = vmatprep.mubr.f32.mxu0 %v10291_v23  ;;  %v12020_v23 = vand.u32 4294901760, %v11986_v21 }
  0xa0   : > { %7902 = vmatmul.mubr.f32.gmra.mrb[20].mxu0 %v10293_v13  ;;  %v12019_v13 = vand.u32 4294901760, %v10118_v15 }
  0xa1   : > { %7904 = vmatprep.mubr.f32.mxu0 %v10312_v53  ;;  %v12018_v53 = vld [vmem:[#allocation57_spill] sm:$0xff] }
  0xa4   : > { %7905 = vmatmul.mubr.f32.gmra.mrb[22].mxu0 %v10318_v46  ;;  %v12017_v46 = vld [vmem:[#allocation54_spill] sm:$0xff] }
  0xa5   : > { %7907 = vmatprep.mubr.f32.mxu0 %v10320_v34  ;;  %v12016_v34 = vld [vmem:[#allocation51_spill] sm:$0xff] }
  0xa8   : > { %7908 = vmatmul.mubr.f32.gmra.mrb[24].mxu0 %v10344_v3  ;;  %v12015_v3 = vld [vmem:[#allocation48_spill] sm:$0xff] }
  0xa9   : > { %7910 = vmatprep.mubr.f32.mxu0 %v10346_v43  ;;  %v12014_v43 = vld [vmem:[#allocation47_spill] sm:$0xff] }
  0xac   : > { %7911 = vmatmul.mubr.f32.gmra.mrb[26].mxu0 %v10365_v12  ;;  %v12013_v12 = vld [vmem:[#allocation46_spill] sm:$0xff] }
  0xad   : > { %7913 = vmatprep.mubr.f32.mxu0 %v10372_v52  ;;  %v12012_v52 = vld [vmem:[#allocation45_spill] sm:$0xff] }
  0xb0   : > { %7914 = vmatmul.mubr.f32.gmra.mrb[28].mxu0 %v10378_v38  ;;  %v12011_v38 = vld [vmem:[#allocation40_spill] sm:$0xff] }
  0xb1   : > { %7916 = vmatprep.mubr.f32.mxu0 %v10380_v48  ;;  %v12010_v48 = vld [vmem:[#allocation39_spill] sm:$0xff] }
  0xb4   : > { %7917 = vmatmul.mubr.f32.gmra.mrb[30].mxu0 %v10400_v60  ;;  %v12009_v60 = vld [vmem:[#allocation36_spill] sm:$0xff] }
  0xb5   : > { %7919 = vmatprep.mubr.f32.mxu0 %v10410_v27  ;;  %v12008_v27 = vld [vmem:[#allocation35_spill] sm:$0xff] }
  0xb8   : > { %7920 = vmatmul.mubr.f32.gmra.mrb[32].mxu0 %v10422_v47  ;;  %v12007_v47 = vld [vmem:[#allocation34_spill] sm:$0xff] }
  0xb9   : > { %7922 = vmatprep.mubr.f32.mxu0 %v10424_v37  ;;  %v12006_v37 = vld [vmem:[#allocation31_spill] sm:$0xff] }
  0xbc   : > { %7923 = vmatmul.mubr.f32.gmra.mrb[34].mxu0 %v10447_v42  ;;  %v12005_v42 = vld [vmem:[#allocation29_spill] sm:$0xff] }
  0xbd   : > { %7925 = vmatprep.mubr.f32.mxu0 %v10450_v25  ;;  %v12004_v25 = vld [vmem:[#allocation28_spill] sm:$0xff] }
  0xc0   : > { %7926 = vmatmul.mubr.f32.gmra.mrb[36].mxu0 %v10462_v41  ;;  %v12003_v41 = vld [vmem:[#allocation25_spill] sm:$0xff] }
  0xc1   : > { %7928 = vmatprep.mubr.f32.mxu0 %v10470_v56  ;;  %v12002_v56 = vld [vmem:[#allocation24_spill] sm:$0xff] }
  0xc4   : > { %7929 = vmatmul.mubr.f32.gmra.mrb[38].mxu0 %v10480_v61  ;;  %v12001_v61 = vld [vmem:[#allocation20_spill] sm:$0xff] }
  0xc5   : > { %7935 = vmatprep.mubr.f32.mxu0 %v10118_v15  ;;  %v12025_v15 = vand.u32 4294901760, %v11991_v62 }
  0xc8   : > { %7936 = vmatmul.mubr.f32.vlgmr.msra.gmra.mrb[0].mxu0 %v11986_v21  ;;  %v12033_v21 = vand.u32 4294901760, %v11999_v6 }
  0xc9   : > { %9042 = vmatpush3.bf16.msra.mxu0 %v10012_v4  ;;  %7938 = vmatprep.mubr.f32.mxu0 %v11987_v26  ;;  %v12034_v26 = vand.u32 4294901760, %v12000_v7 }
  0xca   : > { %9044 = vmatprep.subr.bf16.mxu0 %v9043_v16 }
  0xcc   : > { %7939 = vmatmul.mubr.f32.gmra.mrb[2].mxu0 %v11988_v44  ;;  %v12035_v44 = vand.u32 4294901760, %v12001_v61 }
  0xcd   : > { %7941 = vmatprep.mubr.f32.mxu0 %v11989_v9  ;;  %v12036_v9 = vand.u32 4294901760, %v12002_v56 }
  0xd0   : > { %7942 = vmatmul.mubr.f32.gmra.mrb[4].mxu0 %v11990_v8  ;;  %v12037_v8 = vand.u32 4294901760, %v12003_v41 }
  0xd1   : > { %7944 = vmatprep.mubr.f32.mxu0 %v11991_v62  ;;  %v12067_v62 = vld [vmem:[#allocation33_spill] sm:$0xff] }
  0xd4   : > { %7945 = vmatmul.mubr.f32.gmra.mrb[6].mxu0 %v11992_v19 }
  0xd5   : > { %7947 = vmatprep.mubr.f32.mxu0 %v11993_v5 }
  0xd8   : > { %7948 = vmatmul.mubr.f32.gmra.mrb[8].mxu0 %v11994_v51 }
  0xd9   : > { %7950 = vmatprep.mubr.f32.mxu0 %v11995_v55 }
  0xdc   : > { %7951 = vmatmul.mubr.f32.gmra.mrb[10].mxu0 %v11996_v20 }
  0xdd   : > { %7953 = vmatprep.mubr.f32.mxu0 %v11997_v35 }
  0xe0   : > { %7954 = vmatmul.mubr.f32.gmra.mrb[12].mxu0 %v11998_v49 }
  0xe1   : > { %7956 = vmatprep.mubr.f32.mxu0 %v11999_v6  ;;  %v12040_v6 = vand.u32 4294901760, %v12006_v37 }
  0xe4   : > { %7957 = vmatmul.mubr.f32.gmra.mrb[14].mxu0 %v12000_v7  ;;  %v12041_v7 = vand.u32 4294901760, %v12007_v47 }
  0xe5   : > { %7959 = vmatprep.mubr.f32.mxu0 %v12001_v61  ;;  %v12042_v61 = vand.u32 4294901760, %v12008_v27 }
  0xe8   : > { %7960 = vmatmul.mubr.f32.gmra.mrb[16].mxu0 %v12002_v56  ;;  %v12043_v56 = vand.u32 4294901760, %v12009_v60 }
  0xe9   : > { %7962 = vmatprep.mubr.f32.mxu0 %v12003_v41  ;;  %v12044_v41 = vand.u32 4294901760, %v12010_v48 }
  0xec   : > { %7963 = vmatmul.mubr.f32.gmra.mrb[18].mxu0 %v12004_v25 }
  0xed   : > { %7965 = vmatprep.mubr.f32.mxu0 %v12005_v42 }
  0xf0   : > { %7966 = vmatmul.mubr.f32.gmra.mrb[20].mxu0 %v12006_v37  ;;  %v12047_v37 = vand.u32 4294901760, %v12013_v12 }
  0xf1   : > { %7968 = vmatprep.mubr.f32.mxu0 %v12007_v47  ;;  %v12048_v47 = vand.u32 4294901760, %v12014_v43 }
  0xf4   : > { %7969 = vmatmul.mubr.f32.gmra.mrb[22].mxu0 %v12008_v27  ;;  %v12049_v27 = vand.u32 4294901760, %v12015_v3 }
  0xf5   : > { %7971 = vmatprep.mubr.f32.mxu0 %v12009_v60  ;;  %v12050_v60 = vand.u32 4294901760, %v12016_v34 }
  0xf8   : > { %7972 = vmatmul.mubr.f32.gmra.mrb[24].mxu0 %v12010_v48  ;;  %v12051_v48 = vand.u32 4294901760, %v12017_v46 }
  0xf9   : > { %7974 = vmatprep.mubr.f32.mxu0 %v12011_v38 }
  0xfc   : > { %7975 = vmatmul.mubr.f32.gmra.mrb[26].mxu0 %v12012_v52 }
  0xfd   : > { %7977 = vmatprep.mubr.f32.mxu0 %v12013_v12  ;;  %v12054_v12 = vand.u32 4294901760, %v12018_v53 }
 0x100   : > { %7978 = vmatmul.mubr.f32.gmra.mrb[28].mxu0 %v12014_v43  ;;  %v12055_v43 = vand.u32 4294901760, %v10468_v14 }
 0x101   : > { %7980 = vmatprep.mubr.f32.mxu0 %v12015_v3  ;;  %v12056_v3 = vand.u32 4294901760, %v10478_v57 }
 0x104   : > { %7981 = vmatmul.mubr.f32.gmra.mrb[30].mxu0 %v12016_v34  ;;  %v12057_v34 = vand.u32 4294901760, %v10487_v36 }
 0x105   : > { %7983 = vmatprep.mubr.f32.mxu0 %v12017_v46  ;;  %v12058_v46 = vand.u32 4294901760, %v10494_v24 }
 0x108   : > { %7984 = vmatmul.mubr.f32.gmra.mrb[32].mxu0 %v10442_v28 }
 0x109   : > { %7986 = vmatprep.mubr.f32.mxu0 %v10445_v32 }
 0x10c   : > { %7987 = vmatmul.mubr.f32.gmra.mrb[34].mxu0 %v12018_v53  ;;  %v12060_v53 = vld [vmem:[#allocation21_spill] sm:$0xff] }
 0x10d   : > { %7989 = vmatprep.mubr.f32.mxu0 %v10468_v14  ;;  %v12063_v14 = vld [vmem:[#allocation26_spill] sm:$0xff] }
 0x110   : > { %7990 = vmatmul.mubr.f32.gmra.mrb[36].mxu0 %v10478_v57  ;;  %v12064_v57 = vld [vmem:[#allocation27_spill] sm:$0xff] }
 0x111   : > { %7992 = vmatprep.mubr.f32.mxu0 %v10487_v36  ;;  %v12065_v36 = vld [vmem:[#allocation30_spill] sm:$0xff] }
 0x114   : > { %7993 = vmatmul.mubr.f32.gmra.mrb[38].mxu0 %v10494_v24  ;;  %v12066_v24 = vld [vmem:[#allocation32_spill] sm:$0xff] }
 0x115   : > { %7999 = vmatprep.mubr.f32.mxu0 %v12019_v13  ;;  %v12027_v13 = vand.u32 4294901760, %v11993_v5  ;;  %v12069_v5 = vld [vmem:[#allocation38_spill] sm:$0xff] }
 0x118   : > { %8000 = vmatmul.mubr.f32.vlgmr.msra.gmra.mrb[0].mxu0 %v12020_v23  ;;  %v12026_v23 = vand.u32 4294901760, %v11992_v19  ;;  %v12068_v19 = vld [vmem:[#allocation37_spill] sm:$0xff] }
 0x119   : > { %9046 = vmatpush3.bf16.msra.mxu0 %v9043_v16  ;;  %8002 = vmatprep.mubr.f32.mxu0 %v12021_v33  ;;  %v12028_v33 = vand.u32 4294901760, %v11994_v51  ;;  %v12032_v16 = vand.u32 4294901760, %v11998_v49  ;;  %v12039_v49 = vand.u32 4294901760, %v12005_v42  ;;  %v12046_v42 = vand.u32 4294901760, %v12012_v52  ;;  %v12070_v51 = vld [vmem:[#allocation41_spill] sm:$0xff] }
 0x11a   : > { %9048 = vmatprep.subr.bf16.mxu0 %v10012_v4  ;;  %v12053_v52 = vand.u32 4294901760, %v10445_v32  ;;  %v12062_v32 = vld [vmem:[#allocation23_spill] sm:$0xff] }
 0x11c   : > { %8003 = vmatmul.mubr.f32.gmra.mrb[2].mxu0 %v12022_v2  ;;  %v12029_v2 = vand.u32 4294901760, %v11995_v55  ;;  %v12071_v55 = vld [vmem:[#allocation42_spill] sm:$0xff] }
 0x11d   : > { %8005 = vmatprep.mubr.f32.mxu0 %v12023_v50  ;;  %v12030_v50 = vand.u32 4294901760, %v11996_v20  ;;  %v12072_v20 = vld [vmem:[#allocation43_spill] sm:$0xff] }
 0x120   : > { %8006 = vmatmul.mubr.f32.gmra.mrb[4].mxu0 %v12024_v31  ;;  %v12031_v31 = vand.u32 4294901760, %v11997_v35  ;;  %v12038_v35 = vand.u32 4294901760, %v12004_v25  ;;  %v12045_v25 = vand.u32 4294901760, %v12011_v38  ;;  %v12052_v38 = vand.u32 4294901760, %v10442_v28  ;;  %v12061_v28 = vld [vmem:[#allocation22_spill] sm:$0xff] }
 0x121   : > { %8008 = vmatprep.mubr.f32.mxu0 %v12025_v15  ;;  %v12073_v15 = vld [vmem:[#allocation44_spill] sm:$0xff] }
 0x124   : > { %8009 = vmatmul.mubr.f32.gmra.mrb[6].mxu0 %v12026_v23  ;;  %v12074_v23 = vld [vmem:[#allocation49_spill] sm:$0xff] }
 0x125   : > { %8011 = vmatprep.mubr.f32.mxu0 %v12027_v13  ;;  %v12075_v13 = vld [vmem:[#allocation50_spill] sm:$0xff] }
 0x128   : > { %8012 = vmatmul.mubr.f32.gmra.mrb[8].mxu0 %v12028_v33  ;;  %v12076_v33 = vld [vmem:[#allocation52_spill] sm:$0xff] }
 0x129   : > { %8014 = vmatprep.mubr.f32.mxu0 %v12029_v2  ;;  %v12077_v2 = vld [vmem:[#allocation53_spill] sm:$0xff] }
 0x12c   : > { %8015 = vmatmul.mubr.f32.gmra.mrb[10].mxu0 %v12030_v50  ;;  %v12078_v50 = vld [vmem:[#allocation55_spill] sm:$0xff] }
 0x12d   : > { %8017 = vmatprep.mubr.f32.mxu0 %v12031_v31  ;;  %v12079_v31 = vld [vmem:[#allocation56_spill] sm:$0xff] }
 0x130   : > { %8018 = vmatmul.mubr.f32.gmra.mrb[12].mxu0 %v12032_v16  ;;  %v12080_v16 = vld [vmem:[#allocation58_spill] sm:$0xff] }
 0x131   : > { %8020 = vmatprep.mubr.f32.mxu0 %v12033_v21  ;;  %v12081_v21 = vld [vmem:[#allocation59_spill] sm:$0xff] }
 0x134   : > { %8021 = vmatmul.mubr.f32.gmra.mrb[14].mxu0 %v12034_v26  ;;  %v12082_v26 = vld [vmem:[#allocation60_spill] sm:$0xff] }
 0x135   : > { %8023 = vmatprep.mubr.f32.mxu0 %v12035_v44  ;;  %v218_v44 = vld [vmem:[%s11694_s0 + $0x20] sm:$0xff] }
 0x138   : > { %8024 = vmatmul.mubr.f32.gmra.mrb[16].mxu0 %v12036_v9 }
 0x139   : > { %8026 = vmatprep.mubr.f32.mxu0 %v12037_v8 }
 0x13c   : > { %8027 = vmatmul.mubr.f32.gmra.mrb[18].mxu0 %v12038_v35  ;;  %v2615_v35 = vsel %vm2601_vm1, %v218_v44, 0 }
 0x13d   : > { %8029 = vmatprep.mubr.f32.mxu0 %v12039_v49  ;;  %v219_v49 = vld [vmem:[%s11694_s0 + $0x28] sm:$0xff] }
 0x140   : > { %8030 = vmatmul.mubr.f32.gmra.mrb[20].mxu0 %v12040_v6 }
 0x141   : > { %8032 = vmatprep.mubr.f32.mxu0 %v12041_v7 }
 0x144   : > { %8033 = vmatmul.mubr.f32.gmra.mrb[22].mxu0 %v12042_v61  ;;  %v10814_v61 = vand.u32 4294901760, %v2615_v35 }
 0x145   : > { %8035 = vmatprep.mubr.f32.mxu0 %v12043_v56  ;;  %v2618_v56 = vsel %vm2601_vm1, %v219_v49, 0 }
 0x148   : > { %8036 = vmatmul.mubr.f32.gmra.mrb[24].mxu0 %v12044_v41 }
 0x149   : > { %8038 = vmatprep.mubr.f32.mxu0 %v12045_v25 }
 0x14c   : > { %8039 = vmatmul.mubr.f32.gmra.mrb[26].mxu0 %v12046_v42  ;;  %v10823_v42 = vand.u32 4294901760, %v2618_v56 }
 0x14d   : > { %8041 = vmatprep.mubr.f32.mxu0 %v12047_v37 }
 0x150   : > { %8042 = vmatmul.mubr.f32.gmra.mrb[28].mxu0 %v12048_v47  ;;  %v10828_v47 = vsub.f32 %v2615_v35, %v10814_v61 }
 0x151   : > { %8044 = vmatprep.mubr.f32.mxu0 %v12049_v27  ;;  %v220_v27 = vld [vmem:[%s11694_s0 + $0x30] sm:$0xff] }
 0x154   : > { %8045 = vmatmul.mubr.f32.gmra.mrb[30].mxu0 %v12050_v60 }
 0x155   : > { %8047 = vmatprep.mubr.f32.mxu0 %v12051_v48 }
 0x158   : > { %8048 = vmatmul.mubr.f32.gmra.mrb[32].mxu0 %v12052_v38 }
 0x159   : > { %8050 = vmatprep.mubr.f32.mxu0 %v12053_v52 }
 0x15c   : > { %8051 = vmatmul.mubr.f32.gmra.mrb[34].mxu0 %v12054_v12 }
 0x15d   : > { %8053 = vmatprep.mubr.f32.mxu0 %v12055_v43  ;;  %v221_v43 = vld [vmem:[%s11694_s0 + $0x38] sm:$0xff] }
 0x160   : > { %8054 = vmatmul.mubr.f32.gmra.mrb[36].mxu0 %v12056_v3 }
 0x161   : > { %8056 = vmatprep.mubr.f32.mxu0 %v12057_v34  ;;  %v10841_v34 = vsub.f32 %v2618_v56, %v10823_v42 }
 0x164   : > { %8057 = vmatmul.mubr.f32.gmra.mrb[38].mxu0 %v12058_v46  ;;  %v2621_v46 = vsel %vm2601_vm1, %v220_v27, 0 }
 0x165   : > { %8063 = vmatprep.mubr.f32.mxu0 %v10104_v63 }
 0x168   : > { %8064 = vmatmul.mubr.f32.vlgmr.msra.gmra.mrb[0].mxu0 %v10106_v0 }
 0x169   : > { %9050 = vmatpush3.bf16.msra.mxu0 %v10012_v4  ;;  %8066 = vmatprep.mubr.f32.mxu0 %v10111_v10  ;;  %v12059_v4 = vld [vmem:[#allocation18_spill] sm:$0xff] }
 0x16c   : > { %8067 = vmatmul.mubr.f32.gmra.mrb[2].mxu0 %v10113_v11 }
 0x16d   : > { %8069 = vmatprep.mubr.f32.mxu0 %v10123_v17 }
 0x170   : > { %8070 = vmatmul.mubr.f32.gmra.mrb[4].mxu0 %v10125_v18 }
 0x171   : > { %8072 = vmatprep.mubr.f32.mxu0 %v10145_v29 }
 0x174   : > { %8073 = vmatmul.mubr.f32.gmra.mrb[6].mxu0 %v10147_v30 }
 0x175   : > { %8075 = vmatprep.mubr.f32.mxu0 %v10182_v54 }
 0x178   : > { %8076 = vmatmul.mubr.f32.gmra.mrb[8].mxu0 %v10188_v58 }
 0x179   : > { %8078 = vmatprep.mubr.f32.mxu0 %v10196_v1 }
 0x17c   : > { %8079 = vmatmul.mubr.f32.gmra.mrb[10].mxu0 %v10206_v40 }
 0x17d   : > { %8081 = vmatprep.mubr.f32.mxu0 %v10213_v22 }
 0x180   : > { %8082 = vmatmul.mubr.f32.gmra.mrb[12].mxu0 %v10220_v39 }
 0x181   : > { %8084 = vmatprep.mubr.f32.mxu0 %v10230_v45 }
 0x184   : > { %8085 = vmatmul.mubr.f32.gmra.mrb[14].mxu0 %v10243_v59 }
 0x185   : > { %8087 = vmatprep.mubr.f32.mxu0 %v12059_v4 }
 0x188   : > { %8088 = vmatmul.mubr.f32.gmra.mrb[16].mxu0 %v12060_v53 }
 0x189   : > { %8090 = vmatprep.mubr.f32.mxu0 %v12061_v28 }
 0x18c   : > { %8091 = vmatmul.mubr.f32.gmra.mrb[18].mxu0 %v12062_v32 }
 0x18d   : > { %8093 = vmatprep.mubr.f32.mxu0 %v12063_v14 }
 0x190   : > { %8094 = vmatmul.mubr.f32.gmra.mrb[20].mxu0 %v12064_v57 }
 0x191   : > { %8096 = vmatprep.mubr.f32.mxu0 %v12065_v36 }
 0x194   : > { %8097 = vmatmul.mubr.f32.gmra.mrb[22].mxu0 %v12066_v24 }
 0x195   : > { %8099 = vmatprep.mubr.f32.mxu0 %v12067_v62 }
 0x198   : > { %8100 = vmatmul.mubr.f32.gmra.mrb[24].mxu0 %v12068_v19 }
 0x199   : > { %8102 = vmatprep.mubr.f32.mxu0 %v12069_v5 }
 0x19c   : > { %8103 = vmatmul.mubr.f32.gmra.mrb[26].mxu0 %v12070_v51 }
 0x19d   : > { %8105 = vmatprep.mubr.f32.mxu0 %v12071_v55 }
 0x1a0   : > { %8106 = vmatmul.mubr.f32.gmra.mrb[28].mxu0 %v12072_v20 }
 0x1a1   : > { %8108 = vmatprep.mubr.f32.mxu0 %v12073_v15 }
 0x1a4   : > { %8109 = vmatmul.mubr.f32.gmra.mrb[30].mxu0 %v12074_v23 }
 0x1a5   : > { %8111 = vmatprep.mubr.f32.mxu0 %v12075_v13 }
 0x1a8   : > { %8112 = vmatmul.mubr.f32.gmra.mrb[32].mxu0 %v12076_v33 }
 0x1a9   : > { %8114 = vmatprep.mubr.f32.mxu0 %v12077_v2 }
 0x1ac   : > { %8115 = vmatmul.mubr.f32.gmra.mrb[34].mxu0 %v12078_v50 }
 0x1ad   : > { %8117 = vmatprep.mubr.f32.mxu0 %v12079_v31 }
 0x1b0   : > { %8118 = vmatmul.mubr.f32.gmra.mrb[36].mxu0 %v12080_v16 }
 0x1b1   : > { %8120 = vmatprep.mubr.f32.mxu0 %v12081_v21 }
 0x1b4   : > { %8121 = vmatmul.mubr.f32.gmra.mrb[38].mxu0 %v12082_v26 }
 0x1b5   : > { %8127 = vmatprep.mubr.f32.mxu0 %v10104_v63  ;;  %v214_v63 = vld [vmem:[%s11694_s0] sm:$0xff] }
 0x1b8   : > { %8128 = vmatmul.mubr.f32.vlgmr.msra.gmra.mrb[0].mxu0 %v10106_v0  ;;  %v2603_v0 = vsel %vm2601_vm1, %v214_v63, 0 }
 0x1b9   : > { %8130 = vmatprep.mubr.f32.mxu0 %v10111_v10  ;;  %v10763_v10 = vand.u32 4294901760, %v2603_v0 }
 0x1bc   : > { %8131 = vmatmul.mubr.f32.gmra.mrb[2].mxu0 %v10113_v11  ;;  %v10766_v11 = vsub.f32 %v2603_v0, %v10763_v10 }
 0x1bd   : > { %8133 = vmatprep.mubr.f32.mxu0 %v10123_v17 }
 0x1be   : > { %v10770_v17 = vand.u32 4294901760, %v10766_v11 }
 0x1c0   : > { %8134 = vmatmul.mubr.f32.gmra.mrb[4].mxu0 %v10125_v18  ;;  %v2702_v18 = vsub.f32 %v10766_v11, %v10770_v17 }
 0x1c1   : > { %8136 = vmatprep.mubr.f32.mxu0 %v10145_v29 }
 0x1c2   : > { %v10774_v29 = vand.u32 4294901760, %v2702_v18 }
 0x1c4   : > { %8137 = vmatmul.mubr.f32.gmra.mrb[6].mxu0 %v10147_v30  ;;  %12083 = vst [vmem:[#allocation3_spill] sm:$0xff] %v10774_v29  ;;  %8203 = vmatprep.mubr.f32.mxu1 %v10774_v29  ;;  %v215_v30 = vld [vmem:[%s11694_s0 + $0x8] sm:$0xff] }
 0x1c5   : > { %8139 = vmatprep.mubr.f32.mxu0 %v10182_v54  ;;  %v216_v54 = vld [vmem:[%s11694_s0 + $0x10] sm:$0xff] }
 0x1c8   : > { %8140 = vmatmul.mubr.f32.gmra.mrb[8].mxu0 %v10188_v58  ;;  %v217_v58 = vld [vmem:[%s11694_s0 + $0x18] sm:$0xff] }
 0x1c9   : > { %8142 = vmatprep.mubr.f32.mxu0 %v10196_v1  ;;  %v2606_v1 = vsel %vm2601_vm1, %v215_v30, 0 }
 0x1cc   : > { %8143 = vmatmul.mubr.f32.gmra.mrb[10].mxu0 %v10206_v40  ;;  %v2609_v40 = vsel %vm2601_vm1, %v216_v54, 0 }
 0x1cd   : > { %8145 = vmatprep.mubr.f32.mxu0 %v10213_v22  ;;  %v2612_v22 = vsel %vm2601_vm1, %v217_v58, 0 }
 0x1d0   : > { %8146 = vmatmul.mubr.f32.gmra.mrb[12].mxu0 %v10220_v39  ;;  %v10789_v39 = vand.u32 4294901760, %v2606_v1 }
 0x1d1   : > { %8148 = vmatprep.mubr.f32.mxu0 %v10230_v45  ;;  %v10791_v45 = vand.u32 4294901760, %v2609_v40 }
 0x1d2   : > { %v10799_v9 = vsub.f32 %v2606_v1, %v10789_v39 }
 0x1d3   : > { %v10802_v8 = vsub.f32 %v2609_v40, %v10791_v45 }
 0x1d4   : > { %8149 = vmatmul.mubr.f32.gmra.mrb[14].mxu0 %v10243_v59  ;;  %v10793_v59 = vand.u32 4294901760, %v2612_v22  ;;  %v10812_v7 = vand.u32 4294901760, %v10799_v9 }
 0x1d5   : > { %8151 = vmatprep.mubr.f32.mxu0 %v12059_v4  ;;  %v10818_v41 = vand.u32 4294901760, %v10802_v8 }
 0x1d6   : > { %v10809_v6 = vsub.f32 %v2612_v22, %v10793_v59  ;;  %v2712_v37 = vsub.f32 %v10799_v9, %v10812_v7 }
 0x1d7   : > { %v2722_v48 = vsub.f32 %v10802_v8, %v10818_v41 }
 0x1d8   : > { %8152 = vmatmul.mubr.f32.gmra.mrb[16].mxu0 %v12060_v53  ;;  %v10821_v25 = vand.u32 4294901760, %v10809_v6  ;;  %v10844_v53 = vand.u32 4294901760, %v2712_v37 }
 0x1d9   : > { %8154 = vmatprep.mubr.f32.mxu0 %v12061_v28  ;;  %v10847_v28 = vand.u32 4294901760, %v10828_v47 }
 0x1da   : > { %v2732_v12 = vsub.f32 %v10809_v6, %v10821_v25  ;;  %12084 = vst [vmem:[#allocation4_spill] sm:$0xff] %v10844_v53 }
 0x1db   : > { %12085 = vst [vmem:[#allocation5_spill] sm:$0xff] %v10847_v28 }
 0x1dc   : > { %8155 = vmatmul.mubr.f32.gmra.mrb[18].mxu0 %v12062_v32 }
 0x1dd   : > { %8157 = vmatprep.mubr.f32.mxu0 %v12063_v14 }
 0x1e0   : > { %8158 = vmatmul.mubr.f32.gmra.mrb[20].mxu0 %v12064_v57 }
 0x1e1   : > { %8160 = vmatprep.mubr.f32.mxu0 %v12065_v36  ;;  %v10851_v36 = vand.u32 4294901760, %v2722_v48 }
 0x1e3   : > { %12086 = vst [vmem:[#allocation6_spill] sm:$0xff] %v10851_v36 }
 0x1e4   : > { %8161 = vmatmul.mubr.f32.gmra.mrb[22].mxu0 %v12066_v24  ;;  %v2624_v24 = vsel %vm2601_vm1, %v221_v43, 0 }
 0x1e5   : > { %8163 = vmatprep.mubr.f32.mxu0 %v12067_v62 }
 0x1e8   : > { %8164 = vmatmul.mubr.f32.gmra.mrb[24].mxu0 %v12068_v19 }
 0x1e9   : > { %8166 = vmatprep.mubr.f32.mxu0 %v12069_v5 }
 0x1ec   : > { %8167 = vmatmul.mubr.f32.gmra.mrb[26].mxu0 %v12070_v51  ;;  %v10854_v51 = vand.u32 4294901760, %v2732_v12 }
 0x1ed   : > { %8169 = vmatprep.mubr.f32.mxu0 %v12071_v55  ;;  %v10856_v55 = vand.u32 4294901760, %v2621_v46 }
 0x1ef   : > { %v10874_v1 = vsub.f32 %v2621_v46, %v10856_v55 }
 0x1f0   : > { %8170 = vmatmul.mubr.f32.gmra.mrb[28].mxu0 %v12072_v20 }
 0x1f1   : > { %8172 = vmatprep.mubr.f32.mxu0 %v12073_v15 }
 0x1f4   : > { %8173 = vmatmul.mubr.f32.gmra.mrb[30].mxu0 %v12074_v23  ;;  %v10860_v23 = vand.u32 4294901760, %v10841_v34 }
 0x1f5   : > { %8175 = vmatprep.mubr.f32.mxu0 %v12075_v13 }
 0x1f6   : > { %12087 = vst [vmem:[#allocation7_spill] sm:$0xff] %v10860_v23  ;;  %v2752_v37 = vsub.f32 %v10841_v34, %v10860_v23 }
 0x1f8   : > { %8176 = vmatmul.mubr.f32.gmra.mrb[32].mxu0 %v12076_v33 }
 0x1f9   : > { %8178 = vmatprep.mubr.f32.mxu0 %v12077_v2 }
 0x1fc   : > { %8179 = vmatmul.mubr.f32.gmra.mrb[34].mxu0 %v12078_v50  ;;  %v2742_v50 = vsub.f32 %v10828_v47, %v10847_v28 }
 0x1fd   : > { %8181 = vmatprep.mubr.f32.mxu0 %v12079_v31  ;;  %v10867_v31 = vand.u32 4294901760, %v2624_v24 }
 0x1ff   : > { %v10883_v27 = vsub.f32 %v2624_v24, %v10867_v31 }
 0x200   : > { %8182 = vmatmul.mubr.f32.gmra.mrb[36].mxu0 %v12080_v16 }
 0x201   : > { %8184 = vmatprep.mubr.f32.mxu0 %v12081_v21 }
 0x204   : > { %8185 = vmatmul.mubr.f32.gmra.mrb[38].mxu0 %v12082_v26 }
 0x205   : > { %9015 = vmatprep.mubr.f32.mxu0 %v10763_v10 }
 0x28b   : > { %v8129_v60 = vpop.f32.mrb[0].mxu0 }
 0x28c   : > { %v2630_v38 = vand.u32 4294901760, %v8129_v60  ;;  %v2363_v52 = vpop.f32.mrb[1].mxu0 }
 0x28d   : > { %v2627_v3 = vand.u32 4294901760, %v2363_v52 }
 0x28e   : > { %v2788_v4 = vsub.f32 %v8129_v60, %v2630_v38 }
 0x28f   : > { %v10849_v32 = vpack.c.bf16 %v2630_v38, %v2627_v3  ;;  %v2781_v14 = vsub.f32 %v2363_v52, %v2627_v3  ;;  %v8132_v57 = vpop.f32.mrb[2].mxu0 }
 0x290   : > { %v2789_v62 = vand.u32 4294901760, %v2788_v4  ;;  %v2636_v19 = vand.u32 4294901760, %v8132_v57  ;;  %v2375_v5 = vpop.f32.mrb[3].mxu0 }
 0x291   : > { %v2782_v20 = vand.u32 4294901760, %v2781_v14  ;;  %v2633_v15 = vand.u32 4294901760, %v2375_v5  ;;  %9052 = vmatprep.subr.bf16.mxu1 %v10849_v32  ;;  %v10862_v13 = vpack.c.bf16 %v2788_v4, %v2781_v14 }
 0x292   : > { %v2790_v33 = vsub.f32 %v2788_v4, %v2789_v62  ;;  %v2802_v2 = vsub.f32 %v8132_v57, %v2636_v19  ;;  %9054 = vmatpush3.bf16.msra.mxu1 %v10849_v32 }
 0x293   : > { %v2783_v16 = vsub.f32 %v2781_v14, %v2782_v20  ;;  %v10869_v21 = vpack.c.bf16 %v2636_v19, %v2633_v15  ;;  %v2795_v26 = vsub.f32 %v2375_v5, %v2633_v15  ;;  %v8135_v63 = vpop.f32.mrb[4].mxu0  ;;  %v10871_v0 = vpack.c.bf16 %v2789_v62, %v2782_v20 }
 0x294   : > { %v2803_v18 = vand.u32 4294901760, %v2802_v2  ;;  %v2642_v30 = vand.u32 4294901760, %v8135_v63  ;;  %v2387_v54 = vpop.f32.mrb[5].mxu0  ;;  %v2791_v58 = vand.u32 4294901760, %v2790_v33  ;;  %v10893_v15 = vand.u32 4294901760, %v2742_v50 }
 0x295   : > { %v2796_v40 = vand.u32 4294901760, %v2795_v26  ;;  %v2639_v22 = vand.u32 4294901760, %v2387_v54  ;;  %9056 = vmatprep.subr.bf16.mxu1 %v10869_v21  ;;  %v2784_v44 = vand.u32 4294901760, %v2783_v16  ;;  %v10877_v35 = vpack.c.bf16 %v2802_v2, %v2795_v26 }
 0x296   : > { %v2804_v49 = vsub.f32 %v2802_v2, %v2803_v18  ;;  %v2816_v56 = vsub.f32 %v8135_v63, %v2642_v30  ;;  %9058 = vmatpush3.bf16.msra.mxu1 %v10869_v21  ;;  %12088 = vst [vmem:[#allocation8_spill] sm:$0xff] %v10893_v15  ;;  %v10896_v33 = vand.u32 4294901760, %v10874_v1 }
 0x297   : > { %v2797_v60 = vsub.f32 %v2795_v26, %v2796_v40  ;;  %v10885_v48 = vpack.c.bf16 %v2642_v30, %v2639_v22  ;;  %v2809_v38 = vsub.f32 %v2387_v54, %v2639_v22  ;;  %v8138_v52 = vpop.f32.mrb[6].mxu0  ;;  %v9067_v12 = vpack.c.bf16 %v2791_v58, %v2784_v44 }
 0x298   : > { %v2817_v43 = vand.u32 4294901760, %v2816_v56  ;;  %v2648_v3 = vand.u32 4294901760, %v8138_v52  ;;  %v2399_v46 = vpop.f32.mrb[7].mxu0  ;;  %v2805_v4 = vand.u32 4294901760, %v2804_v49  ;;  %v10887_v14 = vpack.c.bf16 %v2803_v18, %v2796_v40  ;;  %12089 = vst [vmem:[#allocation9_spill] sm:$0xff] %v10896_v33 }
 0x299   : > { %v2810_v57 = vand.u32 4294901760, %v2809_v38  ;;  %v2645_v62 = vand.u32 4294901760, %v2399_v46  ;;  %9060 = vmatprep.subr.bf16.mxu1 %v10885_v48  ;;  %v2798_v19 = vand.u32 4294901760, %v2797_v60  ;;  %v10890_v5 = vpack.c.bf16 %v2816_v56, %v2809_v38 }
 0x29a   : > { %v2818_v24 = vsub.f32 %v2816_v56, %v2817_v43  ;;  %v2830_v20 = vsub.f32 %v8138_v52, %v2648_v3  ;;  %9062 = vmatpush3.bf16.msra.mxu1 %v10885_v48  ;;  %v2762_v52 = vsub.f32 %v10874_v1, %v10896_v33 }
 0x29b   : > { %v2811_v2 = vsub.f32 %v2809_v38, %v2810_v57  ;;  %v10898_v16 = vpack.c.bf16 %v2648_v3, %v2645_v62  ;;  %v2823_v26 = vsub.f32 %v2399_v46, %v2645_v62  ;;  %v8141_v63 = vpop.f32.mrb[8].mxu0  ;;  %v9071_v18 = vpack.c.bf16 %v2805_v4, %v2798_v19 }
 0x29c   : > { %v2831_v30 = vand.u32 4294901760, %v2830_v20  ;;  %v3468_v54 = vand.u32 4294901760, %v8141_v63  ;;  %v2411_v58 = vpop.f32.mrb[9].mxu0  ;;  %v2819_v40 = vand.u32 4294901760, %v2818_v24  ;;  %v10900_v22 = vpack.c.bf16 %v2817_v43, %v2810_v57 }
 0x29d   : > { %v2824_v44 = vand.u32 4294901760, %v2823_v26  ;;  %v3465_v49 = vand.u32 4294901760, %v2411_v58  ;;  %9064 = vmatprep.subr.bf16.mxu1 %v10898_v16  ;;  %v2812_v50 = vand.u32 4294901760, %v2811_v2  ;;  %v10903_v56 = vpack.c.bf16 %v2830_v20, %v2823_v26 }
 0x29e   : > { %v2832_v60 = vsub.f32 %v2830_v20, %v2831_v30  ;;  %v3626_v38 = vsub.f32 %v8141_v63, %v3468_v54  ;;  %9066 = vmatpush3.bf16.msra.mxu1 %v10898_v16  ;;  %v10909_v3 = vand.u32 4294901760, %v10883_v27 }
 0x29f   : > { %v2825_v46 = vsub.f32 %v2823_v26, %v2824_v44  ;;  %v10911_v43 = vpack.c.bf16 %v3468_v54, %v3465_v49  ;;  %v3619_v4 = vsub.f32 %v2411_v58, %v3465_v49  ;;  %v8144_v57 = vpop.f32.mrb[10].mxu0  ;;  %9068 = vmatprep.subr.bf16.mxu1 %v9067_v12  ;;  %v9075_v62 = vpack.c.bf16 %v2819_v40, %v2812_v50 }
 0x2a0   : > { %v3627_v19 = vand.u32 4294901760, %v3626_v38  ;;  %v3474_v24 = vand.u32 4294901760, %v8144_v57  ;;  %v2423_v2 = vpop.f32.mrb[11].mxu0  ;;  %v2833_v20 = vand.u32 4294901760, %v2832_v60  ;;  %v10913_v63 = vpack.c.bf16 %v2831_v30, %v2824_v44 }
 0x2a1   : > { %12090 = vst [vmem:[#allocation10_spill] sm:$0xff] %v10911_v43  ;;  %v3620_v29 = vand.u32 4294901760, %v3619_v4  ;;  %v3471_v23 = vand.u32 4294901760, %v2423_v2  ;;  %8204 = vmatmul.mubr.f32.vlgmr.msra.gmra.mrb[0].mxu1 %v10844_v53  ;;  %v2826_v33 = vand.u32 4294901760, %v2825_v46  ;;  %v10916_v28 = vpack.c.bf16 %v3626_v38, %v3619_v4 }
 0x2a2   : > { %v3628_v26 = vsub.f32 %v3626_v38, %v3627_v19  ;;  %v3640_v54 = vsub.f32 %v8144_v57, %v3474_v24  ;;  %9070 = vmatpush3.bf16.msra.mxu1 %v9067_v12  ;;  %8206 = vmatprep.mubr.f32.mxu1 %v10851_v36  ;;  %v10919_v58 = vand.u32 4294901760, %v2752_v37  ;;  %v2772_v40 = vsub.f32 %v10883_v27, %v10909_v3 }
 0x2a3   : > { %12091 = vst [vmem:[#allocation11_spill] sm:$0xff] %v10916_v28  ;;  %v3621_v49 = vsub.f32 %v3619_v4, %v3620_v29  ;;  %v10923_v30 = vpack.c.bf16 %v3474_v24, %v3471_v23  ;;  %v3633_v44 = vsub.f32 %v2423_v2, %v3471_v23  ;;  %v8147_v50 = vpop.f32.mrb[12].mxu0  ;;  %9072 = vmatprep.subr.bf16.mxu1 %v9071_v18  ;;  %v10931_v23 = vand.u32 4294901760, %v2762_v52 }
 0x2a4   : > { %12092 = vst [vmem:[#allocation12_spill] sm:$0xff] %v10919_v58  ;;  %v9079_v60 = vpack.c.bf16 %v2833_v20, %v2826_v33  ;;  %v3641_v46 = vand.u32 4294901760, %v3640_v54  ;;  %v3480_v53 = vand.u32 4294901760, %v8147_v50  ;;  %v2435_v28 = vpop.f32.mrb[13].mxu0  ;;  %v3629_v38 = vand.u32 4294901760, %v3628_v26 }
 0x2a5   : > { %v10925_v57 = vpack.c.bf16 %v3627_v19, %v3620_v29  ;;  %v3634_v12 = vand.u32 4294901760, %v3633_v44  ;;  %v3477_v36 = vand.u32 4294901760, %v2435_v28  ;;  %8207 = vmatmul.mubr.f32.gmra.mrb[2].mxu1 %v10854_v51  ;;  %v3622_v37 = vand.u32 4294901760, %v3621_v49 }
 0x2a6   : > { %v10928_v43 = vpack.c.bf16 %v3640_v54, %v3633_v44  ;;  %v3642_v4 = vsub.f32 %v3640_v54, %v3641_v46  ;;  %v3654_v24 = vsub.f32 %v8147_v50, %v3480_v53  ;;  %9074 = vmatpush3.bf16.msra.mxu1 %v9071_v18  ;;  %8209 = vmatprep.mubr.f32.mxu1 %v10893_v15  ;;  %v10933_v33 = vand.u32 4294901760, %v2772_v40 }
 0x2a7   : > { %12093 = vst [vmem:[#allocation13_spill] sm:$0xff] %v10925_v57  ;;  %v3635_v2 = vsub.f32 %v3633_v44, %v3634_v12  ;;  %v10935_v20 = vpack.c.bf16 %v3480_v53, %v3477_v36  ;;  %v3647_v29 = vsub.f32 %v2435_v28, %v3477_v36  ;;  %v8150_v19 = vpop.f32.mrb[14].mxu0  ;;  %9076 = vmatprep.subr.bf16.mxu1 %v9075_v62 }
 0x2a8   : > { %12094 = vst [vmem:[#allocation14_spill] sm:$0xff] %v10928_v43  ;;  %12095 = vst [vmem:[#allocation15_spill] sm:$0xff] %v10933_v33  ;;  %v10937_v26 = vpack.c.bf16 %v3629_v38, %v3622_v37  ;;  %v3655_v49 = vand.u32 4294901760, %v3654_v24  ;;  %v3486_v57 = vand.u32 4294901760, %v8150_v19  ;;  %v2447_v43 = vpop.f32.mrb[15].mxu0  ;;  %v3643_v54 = vand.u32 4294901760, %v3642_v4 }
 0x2a9   : > { %v10939_v50 = vpack.c.bf16 %v3641_v46, %v3634_v12  ;;  %v3648_v18 = vand.u32 4294901760, %v3647_v29  ;;  %v3483_v15 = vand.u32 4294901760, %v2447_v43  ;;  %8210 = vmatmul.mubr.f32.gmra.mrb[4].mxu1 %v10919_v58  ;;  %v3636_v52 = vand.u32 4294901760, %v3635_v2 }
 0x2aa   : > { %v10942_v40 = vpack.c.bf16 %v3654_v24, %v3647_v29  ;;  %v3656_v53 = vsub.f32 %v3654_v24, %v3655_v49  ;;  %v3668_v44 = vsub.f32 %v8150_v19, %v3486_v57  ;;  %9078 = vmatpush3.bf16.msra.mxu1 %v9075_v62  ;;  %8212 = vmatprep.mubr.f32.mxu1 %v10931_v23 }
 0x2ab   : > { %12096 = vst [vmem:[#allocation16_spill] sm:$0xff] %v10939_v50  ;;  %v3649_v28 = vsub.f32 %v3647_v29, %v3648_v18  ;;  %v10945_v36 = vpack.c.bf16 %v3486_v57, %v3483_v15  ;;  %v3661_v38 = vsub.f32 %v2447_v43, %v3483_v15  ;;  %v8153_v37 = vpop.f32.mrb[16].mxu0  ;;  %9080 = vmatprep.subr.bf16.mxu1 %v9079_v60 }
 0x2ac   : > { %12097 = vst [vmem:[#allocation17_spill] sm:$0xff] %v10942_v40  ;;  %v10947_v46 = vpack.c.bf16 %v3643_v54, %v3636_v52  ;;  %v3669_v12 = vand.u32 4294901760, %v3668_v44  ;;  %v4306_v4 = vand.u32 4294901760, %v8153_v37  ;;  %v2459_v50 = vpop.f32.mrb[17].mxu0  ;;  %v3657_v58 = vand.u32 4294901760, %v3656_v53 }
 0x2ad   : > { %v10949_v2 = vpack.c.bf16 %v3655_v49, %v3648_v18  ;;  %v3662_v40 = vand.u32 4294901760, %v3661_v38  ;;  %v4303_v24 = vand.u32 4294901760, %v2459_v50  ;;  %8213 = vmatmul.mubr.f32.gmra.mrb[6].mxu1 %v10933_v33  ;;  %v3650_v62 = vand.u32 4294901760, %v3649_v28 }
 0x2ae   : > { %v10952_v19 = vpack.c.bf16 %v3668_v44, %v3661_v38  ;;  %v3670_v57 = vsub.f32 %v3668_v44, %v3669_v12  ;;  %v4464_v29 = vsub.f32 %v8153_v37, %v4306_v4  ;;  %9082 = vmatpush3.bf16.msra.mxu1 %v9079_v60  ;;  %8231 = vmatprep.mubr.f32.mxu1 %v10763_v10 }
 0x2af   : > { %12098 = vst [vmem:[#allocation19_spill] sm:$0xff] %v10949_v2  ;;  %v3663_v15 = vsub.f32 %v3661_v38, %v3662_v40  ;;  %v10955_v43 = vpack.c.bf16 %v4306_v4, %v4303_v24  ;;  %v4457_v54 = vsub.f32 %v2459_v50, %v4303_v24  ;;  %v8156_v52 = vpop.f32.mrb[18].mxu0  ;;  %9084 = vmatprep.subr.bf16.mxu1 %v10862_v13 }
 0x2b0   : > { %v10958_v49 = vpack.c.bf16 %v3657_v58, %v3650_v62  ;;  %v4465_v18 = vand.u32 4294901760, %v4464_v29  ;;  %v4312_v53 = vand.u32 4294901760, %v8156_v52  ;;  %v2471_v2 = vpop.f32.mrb[19].mxu0  ;;  %v3671_v28 = vand.u32 4294901760, %v3670_v57 }
 0x2b1   : > { %12099 = vst [vmem:[#allocation20_spill] sm:$0xff] %v10955_v43  ;;  %v10960_v33 = vpack.c.bf16 %v3669_v12, %v3662_v40  ;;  %v4458_v44 = vand.u32 4294901760, %v4457_v54  ;;  %v4309_v37 = vand.u32 4294901760, %v2471_v2  ;;  %8232 = vmatmul.mubr.f32.vlgmr.msra.gmra.mrb[0].mxu1 %v10789_v39  ;;  %v3664_v60 = vand.u32 4294901760, %v3663_v15 }
 0x2b2   : > { %v10963_v38 = vpack.c.bf16 %v4464_v29, %v4457_v54  ;;  %v4466_v4 = vsub.f32 %v4464_v29, %v4465_v18  ;;  %v4478_v50 = vsub.f32 %v8156_v52, %v4312_v53  ;;  %9086 = vmatpush3.bf16.msra.mxu1 %v10862_v13  ;;  %8234 = vmatprep.mubr.f32.mxu1 %v10791_v45 }
 0x2b3   : > { %12100 = vst [vmem:[#allocation24_spill] sm:$0xff] %v10960_v33  ;;  %v4459_v58 = vsub.f32 %v4457_v54, %v4458_v44  ;;  %v10967_v24 = vpack.c.bf16 %v4312_v53, %v4309_v37  ;;  %v4471_v62 = vsub.f32 %v2471_v2, %v4309_v37  ;;  %v8159_v57 = vpop.f32.mrb[20].mxu0  ;;  %9088 = vmatprep.subr.bf16.mxu1 %v10877_v35 }
 0x2b4   : > { %12101 = vst [vmem:[#allocation25_spill] sm:$0xff] %v10963_v38  ;;  %v10970_v40 = vpack.c.bf16 %v3671_v28, %v3664_v60  ;;  %v4479_v12 = vand.u32 4294901760, %v4478_v50  ;;  %v4318_v43 = vand.u32 4294901760, %v8159_v57  ;;  %v2483_v15 = vpop.f32.mrb[21].mxu0  ;;  %v4467_v33 = vand.u32 4294901760, %v4466_v4 }
 0x2b5   : > { %12102 = vst [vmem:[#allocation28_spill] sm:$0xff] %v10967_v24  ;;  %v10972_v38 = vpack.c.bf16 %v4465_v18, %v4458_v44  ;;  %v4472_v29 = vand.u32 4294901760, %v4471_v62  ;;  %v4315_v52 = vand.u32 4294901760, %v2483_v15  ;;  %8235 = vmatmul.mubr.f32.gmra.mrb[2].mxu1 %v10793_v59  ;;  %v4460_v13 = vand.u32 4294901760, %v4459_v58 }
 0x2b6   : > { %v10975_v54 = vpack.c.bf16 %v4478_v50, %v4471_v62  ;;  %v4480_v53 = vsub.f32 %v4478_v50, %v4479_v12  ;;  %v4492_v2 = vsub.f32 %v8159_v57, %v4318_v43  ;;  %9090 = vmatpush3.bf16.msra.mxu1 %v10877_v35  ;;  %8237 = vmatprep.mubr.f32.mxu1 %v10814_v61 }
 0x2b7   : > { %12103 = vst [vmem:[#allocation29_spill] sm:$0xff] %v10972_v38  ;;  %v4473_v28 = vsub.f32 %v4471_v62, %v4472_v29  ;;  %v10979_v37 = vpack.c.bf16 %v4318_v43, %v4315_v52  ;;  %v4485_v60 = vsub.f32 %v2483_v15, %v4315_v52  ;;  %v8162_v4 = vpop.f32.mrb[22].mxu0  ;;  %9092 = vmatprep.subr.bf16.mxu1 %v10890_v5 }
 0x2b8   : > { %12104 = vst [vmem:[#allocation31_spill] sm:$0xff] %v10975_v54  ;;  %v10982_v18 = vpack.c.bf16 %v4467_v33, %v4460_v13  ;;  %v4493_v44 = vand.u32 4294901760, %v4492_v2  ;;  %v4324_v38 = vand.u32 4294901760, %v8162_v4  ;;  %v2495_v58 = vpop.f32.mrb[23].mxu0  ;;  %v4481_v24 = vand.u32 4294901760, %v4480_v53 }
 0x2b9   : > { %v10984_v54 = vpack.c.bf16 %v4479_v12, %v4472_v29  ;;  %v4486_v50 = vand.u32 4294901760, %v4485_v60  ;;  %v4321_v57 = vand.u32 4294901760, %v2495_v58  ;;  %8238 = vmatmul.mubr.f32.gmra.mrb[4].mxu1 %v10823_v42  ;;  %v4474_v35 = vand.u32 4294901760, %v4473_v28 }
 0x2ba   : > { %12105 = vst [vmem:[#allocation34_spill] sm:$0xff] %v10982_v18  ;;  %v10987_v62 = vpack.c.bf16 %v4492_v2, %v4485_v60  ;;  %v4494_v43 = vsub.f32 %v4492_v2, %v4493_v44  ;;  %v4506_v15 = vsub.f32 %v8162_v4, %v4324_v38  ;;  %9094 = vmatpush3.bf16.msra.mxu1 %v10890_v5 }
 0x2bb   : > { %12106 = vst [vmem:[#allocation35_spill] sm:$0xff] %v10984_v54  ;;  %8240 = vmatprep.mubr.f32.mxu1 %v10856_v55  ;;  %v4487_v33 = vsub.f32 %v4485_v60, %v4486_v50  ;;  %v10991_v52 = vpack.c.bf16 %v4324_v38, %v4321_v57  ;;  %v4499_v13 = vsub.f32 %v2495_v58, %v4321_v57  ;;  %v8165_v53 = vpop.f32.mrb[24].mxu0 }
 0x2bc   : > { %12107 = vst [vmem:[#allocation36_spill] sm:$0xff] %v10987_v62  ;;  %9096 = vmatprep.subr.bf16.mxu1 %v10903_v56  ;;  %v10994_v12 = vpack.c.bf16 %v4481_v24, %v4474_v35  ;;  %v4507_v29 = vand.u32 4294901760, %v4506_v15  ;;  %v5144_v54 = vand.u32 4294901760, %v8165_v53  ;;  %v2507_v28 = vpop.f32.mrb[25].mxu0  ;;  %v4495_v18 = vand.u32 4294901760, %v4494_v43 }
 0x2bd   : > { %12108 = vst [vmem:[#allocation39_spill] sm:$0xff] %v10991_v52  ;;  %v10996_v62 = vpack.c.bf16 %v4493_v44, %v4486_v50  ;;  %v4500_v2 = vand.u32 4294901760, %v4499_v13  ;;  %v5141_v4 = vand.u32 4294901760, %v2507_v28  ;;  %8241 = vmatmul.mubr.f32.gmra.mrb[6].mxu1 %v10867_v31  ;;  %v4488_v5 = vand.u32 4294901760, %v4487_v33 }
 0x2be   : > { %12109 = vst [vmem:[#allocation40_spill] sm:$0xff] %v10994_v12  ;;  %v10999_v60 = vpack.c.bf16 %v4506_v15, %v4499_v13  ;;  %v4508_v38 = vsub.f32 %v4506_v15, %v4507_v29  ;;  %v5302_v58 = vsub.f32 %v8165_v53, %v5144_v54  ;;  %9098 = vmatpush3.bf16.msra.mxu1 %v10903_v56 }
 0x2bf   : > { %12110 = vst [vmem:[#allocation45_spill] sm:$0xff] %v10996_v62  ;;  %8259 = vmatprep.mubr.f32.mxu1 %v10766_v11  ;;  %v4501_v24 = vsub.f32 %v4499_v13, %v4500_v2  ;;  %v11003_v57 = vpack.c.bf16 %v5144_v54, %v5141_v4  ;;  %v5295_v35 = vsub.f32 %v2507_v28, %v5141_v4  ;;  %v8168_v43 = vpop.f32.mrb[26].mxu0 }
 0x2c0   : > { %12111 = vst [vmem:[#allocation46_spill] sm:$0xff] %v10999_v60  ;;  %9100 = vmatprep.subr.bf16.mxu1 %v10849_v32  ;;  %v11006_v44 = vpack.c.bf16 %v4495_v18, %v4488_v5  ;;  %v5303_v50 = vand.u32 4294901760, %v5302_v58  ;;  %v5150_v62 = vand.u32 4294901760, %v8168_v43  ;;  %v2519_v33 = vpop.f32.mrb[27].mxu0  ;;  %v4509_v12 = vand.u32 4294901760, %v4508_v38 }
 0x2c1   : > { %12112 = vst [vmem:[#allocation47_spill] sm:$0xff] %v11003_v57  ;;  %v11008_v60 = vpack.c.bf16 %v4507_v29, %v4500_v2  ;;  %v5296_v15 = vand.u32 4294901760, %v5295_v35  ;;  %v5147_v53 = vand.u32 4294901760, %v2519_v33  ;;  %8260 = vmatmul.mubr.f32.vlgmr.msra.gmra.mrb[0].mxu1 %v10799_v9  ;;  %v4502_v56 = vand.u32 4294901760, %v4501_v24 }
 0x2c2   : > { %12113 = vst [vmem:[#allocation48_spill] sm:$0xff] %v11006_v44  ;;  %v11011_v13 = vpack.c.bf16 %v5302_v58, %v5295_v35  ;;  %v5304_v54 = vsub.f32 %v5302_v58, %v5303_v50  ;;  %v5316_v28 = vsub.f32 %v8168_v43, %v5150_v62  ;;  %9102 = vmatpush3.bf16.msra.mxu1 %v10849_v32 }
 0x2c3   : > { %12114 = vst [vmem:[#allocation51_spill] sm:$0xff] %v11008_v60  ;;  %8262 = vmatprep.mubr.f32.mxu1 %v10802_v8  ;;  %v5297_v18 = vsub.f32 %v5295_v35, %v5296_v15  ;;  %v11015_v4 = vpack.c.bf16 %v5150_v62, %v5147_v53  ;;  %v5309_v5 = vsub.f32 %v2519_v33, %v5147_v53  ;;  %v8171_v38 = vpop.f32.mrb[28].mxu0 }
 0x2c4   : > { %12115 = vst [vmem:[#allocation54_spill] sm:$0xff] %v11011_v13  ;;  %9104 = vmatprep.subr.bf16.mxu1 %v10869_v21  ;;  %v11018_v29 = vpack.c.bf16 %v4509_v12, %v4502_v56  ;;  %v5317_v2 = vand.u32 4294901760, %v5316_v28  ;;  %v5156_v57 = vand.u32 4294901760, %v8171_v38  ;;  %v2531_v24 = vpop.f32.mrb[29].mxu0  ;;  %v5305_v60 = vand.u32 4294901760, %v5304_v54 }
 0x2c5   : > { %12116 = vst [vmem:[#allocation57_spill] sm:$0xff] %v11015_v4  ;;  %v11020_v13 = vpack.c.bf16 %v5303_v50, %v5296_v15  ;;  %v5310_v58 = vand.u32 4294901760, %v5309_v5  ;;  %v5153_v43 = vand.u32 4294901760, %v2531_v24  ;;  %8263 = vmatmul.mubr.f32.gmra.mrb[2].mxu1 %v10809_v6  ;;  %v5298_v44 = vand.u32 4294901760, %v5297_v18 }
 0x2c6   : > { %12117 = vst [vmem:[#allocation18_spill] sm:$0xff] %v11018_v29  ;;  %v11023_v35 = vpack.c.bf16 %v5316_v28, %v5309_v5  ;;  %v5318_v62 = vsub.f32 %v5316_v28, %v5317_v2  ;;  %v5330_v33 = vsub.f32 %v8171_v38, %v5156_v57  ;;  %9106 = vmatpush3.bf16.msra.mxu1 %v10869_v21 }
 0x2c7   : > { %12118 = vst [vmem:[#allocation21_spill] sm:$0xff] %v11020_v13  ;;  %8265 = vmatprep.mubr.f32.mxu1 %v10828_v47  ;;  %v5311_v12 = vsub.f32 %v5309_v5, %v5310_v58  ;;  %v11027_v53 = vpack.c.bf16 %v5156_v57, %v5153_v43  ;;  %v5323_v56 = vsub.f32 %v2531_v24, %v5153_v43  ;;  %v8174_v54 = vpop.f32.mrb[30].mxu0 }
 0x2c8   : > { %12119 = vst [vmem:[#allocation22_spill] sm:$0xff] %v11023_v35  ;;  %9108 = vmatprep.subr.bf16.mxu1 %v10885_v48  ;;  %v11030_v50 = vpack.c.bf16 %v5305_v60, %v5298_v44  ;;  %v5331_v15 = vand.u32 4294901760, %v5330_v33  ;;  %v5162_v13 = vand.u32 4294901760, %v8174_v54  ;;  %v2543_v18 = vpop.f32.mrb[31].mxu0  ;;  %v5319_v4 = vand.u32 4294901760, %v5318_v62 }
 0x2c9   : > { %12120 = vst [vmem:[#allocation23_spill] sm:$0xff] %v11027_v53  ;;  %v11032_v35 = vpack.c.bf16 %v5317_v2, %v5310_v58  ;;  %v5324_v28 = vand.u32 4294901760, %v5323_v56  ;;  %v5159_v38 = vand.u32 4294901760, %v2543_v18  ;;  %8266 = vmatmul.mubr.f32.gmra.mrb[4].mxu1 %v10841_v34  ;;  %v5312_v29 = vand.u32 4294901760, %v5311_v12 }
 0x2ca   : > { %12121 = vst [vmem:[#allocation26_spill] sm:$0xff] %v11030_v50  ;;  %v11035_v5 = vpack.c.bf16 %v5330_v33, %v5323_v56  ;;  %v5332_v57 = vsub.f32 %v5330_v33, %v5331_v15  ;;  %v5344_v24 = vsub.f32 %v8174_v54, %v5162_v13  ;;  %9110 = vmatpush3.bf16.msra.mxu1 %v10885_v48 }
 0x2cb   : > { %12122 = vst [vmem:[#allocation27_spill] sm:$0xff] %v11032_v35  ;;  %8268 = vmatprep.mubr.f32.mxu1 %v10874_v1  ;;  %v5325_v60 = vsub.f32 %v5323_v56, %v5324_v28  ;;  %v11039_v44 = vpack.c.bf16 %v5162_v13, %v5159_v38  ;;  %v5337_v43 = vsub.f32 %v2543_v18, %v5159_v38  ;;  %v8177_v62 = vpop.f32.mrb[32].mxu0 }
 0x2cc   : > { %12123 = vst [vmem:[#allocation30_spill] sm:$0xff] %v11035_v5  ;;  %9112 = vmatprep.subr.bf16.mxu1 %v10898_v16  ;;  %v11042_v2 = vpack.c.bf16 %v5319_v4, %v5312_v29  ;;  %v5345_v58 = vand.u32 4294901760, %v5344_v24  ;;  %v5982_v35 = vand.u32 4294901760, %v8177_v62  ;;  %v2555_v12 = vpop.f32.mrb[33].mxu0  ;;  %v5333_v50 = vand.u32 4294901760, %v5332_v57 }
 0x2cd   : > { %12124 = vst [vmem:[#allocation32_spill] sm:$0xff] %v11039_v44  ;;  %v11044_v5 = vpack.c.bf16 %v5331_v15, %v5324_v28  ;;  %v5338_v33 = vand.u32 4294901760, %v5337_v43  ;;  %v5979_v54 = vand.u32 4294901760, %v2555_v12  ;;  %8269 = vmatmul.mubr.f32.gmra.mrb[6].mxu1 %v10883_v27  ;;  %v5326_v53 = vand.u32 4294901760, %v5325_v60 }
 0x2ce   : > { %12125 = vst [vmem:[#allocation33_spill] sm:$0xff] %v11042_v2  ;;  %v11047_v56 = vpack.c.bf16 %v5344_v24, %v5337_v43  ;;  %v5346_v13 = vsub.f32 %v5344_v24, %v5345_v58  ;;  %v6140_v18 = vsub.f32 %v8177_v62, %v5982_v35  ;;  %9114 = vmatpush3.bf16.msra.mxu1 %v10898_v16 }
 0x2cf   : > { %12126 = vst [vmem:[#allocation37_spill] sm:$0xff] %v11044_v5  ;;  %8287 = vmatprep.mubr.f32.mxu1 %v10770_v17  ;;  %v5339_v4 = vsub.f32 %v5337_v43, %v5338_v33  ;;  %v11051_v29 = vpack.c.bf16 %v5982_v35, %v5979_v54  ;;  %v6133_v38 = vsub.f32 %v2555_v12, %v5979_v54  ;;  %v8180_v57 = vpop.f32.mrb[34].mxu0 }
 0x2d0   : > { %12127 = vst [vmem:[#allocation38_spill] sm:$0xff] %v11047_v56  ;;  %9116 = vmatprep.subr.bf16.mxu1 %v10871_v0  ;;  %v11054_v15 = vpack.c.bf16 %v5333_v50, %v5326_v53  ;;  %v6141_v28 = vand.u32 4294901760, %v6140_v18  ;;  %v5988_v5 = vand.u32 4294901760, %v8180_v57  ;;  %v2567_v60 = vpop.f32.mrb[35].mxu0  ;;  %v5347_v2 = vand.u32 4294901760, %v5346_v13 }
 0x2d1   : > { %12128 = vst [vmem:[#allocation41_spill] sm:$0xff] %v11051_v29  ;;  %v11056_v56 = vpack.c.bf16 %v5345_v58, %v5338_v33  ;;  %v6134_v24 = vand.u32 4294901760, %v6133_v38  ;;  %v5985_v62 = vand.u32 4294901760, %v2567_v60  ;;  %8288 = vmatmul.mubr.f32.vlgmr.msra.gmra.mrb[0].mxu1 %v10812_v7  ;;  %9516 = vmatprep.subr.bf16.mxu0 %v11051_v29  ;;  %v5340_v35 = vand.u32 4294901760, %v5339_v4 }
 0x2d2   : > { %12129 = vst [vmem:[#allocation42_spill] sm:$0xff] %v11054_v15  ;;  %v11060_v43 = vpack.c.bf16 %v6140_v18, %v6133_v38  ;;  %v6142_v12 = vsub.f32 %v6140_v18, %v6141_v28  ;;  %v6154_v54 = vsub.f32 %v8180_v57, %v5988_v5  ;;  %9118 = vmatpush3.bf16.msra.mxu1 %v10871_v0 }
 0x2d3   : > { %12130 = vst [vmem:[#allocation43_spill] sm:$0xff] %v11056_v56  ;;  %9518 = vmatpush3.bf16.msra.mxu0 %v11051_v29  ;;  %v6135_v53 = vsub.f32 %v6133_v38, %v6134_v24  ;;  %v11064_v50 = vpack.c.bf16 %v5988_v5, %v5985_v62  ;;  %v6147_v58 = vsub.f32 %v2567_v60, %v5985_v62  ;;  %v8183_v33 = vpop.f32.mrb[36].mxu0 }
 0x2d4   : > { %12131 = vst [vmem:[#allocation44_spill] sm:$0xff] %v11060_v43  ;;  %9120 = vmatprep.subr.bf16.mxu1 %v10887_v14  ;;  %8290 = vmatprep.mubr.f32.mxu1 %v10818_v41  ;;  %v6155_v13 = vand.u32 4294901760, %v6154_v54  ;;  %v5994_v56 = vand.u32 4294901760, %v8183_v33  ;;  %v2579_v4 = vpop.f32.mrb[37].mxu0  ;;  %v11068_v15 = vpack.c.bf16 %v5347_v2, %v5340_v35  ;;  %v6143_v18 = vand.u32 4294901760, %v6142_v12 }
 0x2d5   : > { %12132 = vst [vmem:[#allocation49_spill] sm:$0xff] %v11064_v50  ;;  %v6148_v57 = vand.u32 4294901760, %v6147_v58  ;;  %v5991_v43 = vand.u32 4294901760, %v2579_v4  ;;  %8291 = vmatmul.mubr.f32.gmra.mrb[2].mxu1 %v10821_v25  ;;  %9520 = vmatprep.subr.bf16.mxu0 %v11064_v50  ;;  %v6136_v0 = vand.u32 4294901760, %v6135_v53  ;;  %v11072_v5 = vpack.c.bf16 %v6154_v54, %v6147_v58 }
 0x2d6   : > { %12133 = vst [vmem:[#allocation50_spill] sm:$0xff] %v11068_v15  ;;  %v6156_v38 = vsub.f32 %v6154_v54, %v6155_v13  ;;  %v6168_v60 = vsub.f32 %v8183_v33, %v5994_v56  ;;  %9122 = vmatpush3.bf16.msra.mxu1 %v10887_v14  ;;  %v11076_v62 = vpack.c.bf16 %v6141_v28, %v6134_v24  ;;  %v12136_v15 = vld [vmem:[#allocation5_spill] sm:$0xff] }
 0x2d7   : > { %12134 = vst [vmem:[#allocation52_spill] sm:$0xff] %v11072_v5  ;;  %9522 = vmatpush3.bf16.msra.mxu0 %v11064_v50  ;;  %v6149_v2 = vsub.f32 %v6147_v58, %v6148_v57  ;;  %v11078_v35 = vpack.c.bf16 %v5994_v56, %v5991_v43  ;;  %v6161_v12 = vsub.f32 %v2579_v4, %v5991_v43  ;;  %v8186_v29 = vpop.f32.mrb[38].mxu0  ;;  %v12137_v50 = vld [vmem:[#allocation7_spill] sm:$0xff] }
 0x2d8   : > { %12135 = vst [vmem:[#allocation53_spill] sm:$0xff] %v11076_v62  ;;  %9124 = vmatprep.subr.bf16.mxu1 %v10900_v22  ;;  %8293 = vmatprep.mubr.f32.mxu1 %v12136_v15  ;;  %v6169_v53 = vand.u32 4294901760, %v6168_v60  ;;  %v6000_v44 = vand.u32 4294901760, %v8186_v29  ;;  %v2591_v5 = vpop.f32.mrb[39].mxu0  ;;  %v11082_v54 = vpack.c.bf16 %v6143_v18, %v6136_v0  ;;  %v6157_v33 = vand.u32 4294901760, %v6156_v38  ;;  %v12139_v38 = vld [vmem:[#allocation9_spill] sm:$0xff] }
 0x2d9   : > { %v6162_v14 = vand.u32 4294901760, %v6161_v12  ;;  %v5997_v52 = vand.u32 4294901760, %v2591_v5  ;;  %8294 = vmatmul.mubr.f32.gmra.mrb[4].mxu1 %v12137_v50  ;;  %9524 = vmatprep.subr.bf16.mxu0 %v11078_v35  ;;  %v6150_v56 = vand.u32 4294901760, %v6149_v2  ;;  %v11086_v28 = vpack.c.bf16 %v6168_v60, %v6161_v12 }
 0x2da   : > { %v6170_v24 = vsub.f32 %v6168_v60, %v6169_v53  ;;  %v6182_v43 = vsub.f32 %v8186_v29, %v6000_v44  ;;  %9126 = vmatpush3.bf16.msra.mxu1 %v10900_v22  ;;  %v11090_v58 = vpack.c.bf16 %v6155_v13, %v6148_v57  ;;  %8296 = vmatprep.mubr.f32.mxu1 %v12139_v38 }
 0x2db   : > { %12138 = vst [vmem:[#allocation55_spill] sm:$0xff] %v11086_v28  ;;  %9526 = vmatpush3.bf16.msra.mxu0 %v11078_v35  ;;  %v6163_v4 = vsub.f32 %v6161_v12, %v6162_v14  ;;  %v11092_v18 = vpack.c.bf16 %v6000_v44, %v5997_v52  ;;  %v6175_v0 = vsub.f32 %v2591_v5, %v5997_v52 }
 0x2dc   : > { %9128 = vmatprep.subr.bf16.mxu1 %v10913_v63  ;;  %v6183_v62 = vand.u32 4294901760, %v6182_v43  ;;  %v11096_v2 = vpack.c.bf16 %v6157_v33, %v6150_v56  ;;  %v6171_v28 = vand.u32 4294901760, %v6170_v24  ;;  %v11098_v60 = vpack.c.bf16 %v6169_v53, %v6162_v14  ;;  %v12145_v33 = vld [vmem:[#allocation12_spill] sm:$0xff]  ;;  %v12147_v14 = vld [vmem:[#allocation11_spill] sm:$0xff] }
 0x2dd   : > { %v6176_v29 = vand.u32 4294901760, %v6175_v0  ;;  %8297 = vmatmul.mubr.f32.gmra.mrb[6].mxu1 %v10909_v3  ;;  %9528 = vmatprep.subr.bf16.mxu0 %v11092_v18  ;;  %v6164_v22 = vand.u32 4294901760, %v6163_v4  ;;  %v11102_v13 = vpack.c.bf16 %v6182_v43, %v6175_v0  ;;  %v12152_v56 = vld [vmem:[#allocation19_spill] sm:$0xff]  ;;  %v12154_v24 = vld [vmem:[#allocation20_spill] sm:$0xff] }
 0x2de   : > { %v6184_v44 = vsub.f32 %v6182_v43, %v6183_v62  ;;  %9130 = vmatpush3.bf16.msra.mxu1 %v10913_v63  ;;  %8315 = vmatprep.mubr.f32.mxu1 %v10763_v10  ;;  %v12158_v43 = vld [vmem:[#allocation40_spill] sm:$0xff] }
 0x2df   : > { %9530 = vmatpush3.bf16.msra.mxu0 %v11092_v18  ;;  %v6177_v52 = vsub.f32 %v6175_v0, %v6176_v29  ;;  %9132 = vmatprep.subr.bf16.mxu1 %v10849_v32  ;;  %v11108_v57 = vpack.c.bf16 %v6171_v28, %v6164_v22  ;;  %v11110_v5 = vpack.c.bf16 %v6183_v62, %v6176_v29  ;;  %v12144_v62 = vld [vmem:[#allocation8_spill] sm:$0xff]  ;;  %v12160_v0 = vld [vmem:[#allocation18_spill] sm:$0xff]  ;;  %v12161_v29 = vld [vmem:[#allocation25_spill] sm:$0xff] }
 0x2e0   : > { %v6185_v12 = vand.u32 4294901760, %v6184_v44  ;;  %v12153_v28 = vld [vmem:[#allocation24_spill] sm:$0xff]  ;;  %v12162_v22 = vld [vmem:[#allocation31_spill] sm:$0xff] }
 0x2e1   : > { %8316 = vmatmul.mubr.f32.vlgmr.msra.gmra.mrb[0].mxu1 %v10789_v39  ;;  %v6178_v53 = vand.u32 4294901760, %v6177_v52  ;;  %v12159_v4 = vld [vmem:[#allocation48_spill] sm:$0xff]  ;;  %v12164_v52 = vld [vmem:[#allocation46_spill] sm:$0xff] }
 0x2e2   : > { %9016 = vmatmul.mubr.f32.vlgmr.msra.gmra.mrb[40].mxu0 %v10789_v39  ;;  %9134 = vmatpush3.bf16.msra.mxu1 %v10849_v32  ;;  %v12140_v32 = vld [vmem:[#allocation10_spill] sm:$0xff]  ;;  %v12163_v44 = vld [vmem:[#allocation36_spill] sm:$0xff] }
 0x2e3   : > { %8318 = vmatprep.mubr.f32.mxu1 %v10791_v45  ;;  %9136 = vmatprep.subr.bf16.mxu1 %v10869_v21  ;;  %v11117_v63 = vpack.c.bf16 %v6185_v12, %v6178_v53  ;;  %v12165_v12 = vld [vmem:[#allocation29_spill] sm:$0xff]  ;;  %v12166_v53 = vld [vmem:[#allocation35_spill] sm:$0xff] }
 0x2e5   : > { %8319 = vmatmul.mubr.f32.gmra.mrb[2].mxu1 %v10793_v59 }
 0x2e6   : > { %9138 = vmatpush3.bf16.msra.mxu1 %v10869_v21  ;;  %8321 = vmatprep.mubr.f32.mxu1 %v10814_v61  ;;  %v12141_v21 = vld [vmem:[#allocation3_spill] sm:$0xff] }
 0x2e7   : > { %9140 = vmatprep.subr.bf16.mxu1 %v10885_v48 }
 0x2e9   : > { %8322 = vmatmul.mubr.f32.gmra.mrb[4].mxu1 %v10823_v42 }
 0x2ea   : > { %9142 = vmatpush3.bf16.msra.mxu1 %v10885_v48  ;;  %8324 = vmatprep.mubr.f32.mxu1 %v10856_v55  ;;  %v12142_v48 = vld [vmem:[#allocation4_spill] sm:$0xff] }
 0x2eb   : > { %9144 = vmatprep.subr.bf16.mxu1 %v10898_v16 }
 0x2ed   : > { %8325 = vmatmul.mubr.f32.gmra.mrb[6].mxu1 %v10867_v31 }
 0x2ee   : > { %9146 = vmatpush3.bf16.msra.mxu1 %v10898_v16  ;;  %8343 = vmatprep.mubr.f32.mxu1 %v10763_v10  ;;  %v12143_v16 = vld [vmem:[#allocation6_spill] sm:$0xff] }
 0x2ef   : > { %9148 = vmatprep.subr.bf16.mxu1 %v12140_v32 }
 0x2f1   : > { %8344 = vmatmul.mubr.f32.vlgmr.msra.gmra.mrb[0].mxu1 %v10789_v39 }
 0x2f2   : > { %9150 = vmatpush3.bf16.msra.mxu1 %v12140_v32  ;;  %8346 = vmatprep.mubr.f32.mxu1 %v10791_v45 }
 0x2f3   : > { %9152 = vmatprep.subr.bf16.mxu1 %v10923_v30 }
 0x2f5   : > { %8347 = vmatmul.mubr.f32.gmra.mrb[2].mxu1 %v10793_v59 }
 0x2f6   : > { %9154 = vmatpush3.bf16.msra.mxu1 %v10923_v30  ;;  %8349 = vmatprep.mubr.f32.mxu1 %v10814_v61 }
 0x2f7   : > { %9156 = vmatprep.subr.bf16.mxu1 %v10935_v20 }
 0x2f9   : > { %8350 = vmatmul.mubr.f32.gmra.mrb[4].mxu1 %v10823_v42 }
 0x2fa   : > { %9158 = vmatpush3.bf16.msra.mxu1 %v10935_v20  ;;  %8352 = vmatprep.mubr.f32.mxu1 %v10856_v55 }
 0x2fb   : > { %9160 = vmatprep.subr.bf16.mxu1 %v10945_v36 }
 0x2fd   : > { %8353 = vmatmul.mubr.f32.gmra.mrb[6].mxu1 %v10867_v31 }
 0x2fe   : > { %9162 = vmatpush3.bf16.msra.mxu1 %v10945_v36  ;;  %8371 = vmatprep.mubr.f32.mxu1 %v12141_v21 }
 0x2ff   : > { %9164 = vmatprep.subr.bf16.mxu1 %v10937_v26 }
 0x301   : > { %8372 = vmatmul.mubr.f32.vlgmr.msra.gmra.mrb[8].mxu1 %v12142_v48 }
 0x302   : > { %9166 = vmatpush3.bf16.msra.mxu1 %v10937_v26  ;;  %8374 = vmatprep.mubr.f32.mxu1 %v12143_v16  ;;  %v12146_v26 = vld [vmem:[#allocation15_spill] sm:$0xff] }
 0x303   : > { %9168 = vmatprep.subr.bf16.mxu1 %v10947_v46 }
 0x305   : > { %8375 = vmatmul.mubr.f32.gmra.mrb[10].mxu1 %v10854_v51 }
 0x306   : > { %9170 = vmatpush3.bf16.msra.mxu1 %v10947_v46  ;;  %8377 = vmatprep.mubr.f32.mxu1 %v12144_v62  ;;  %v12148_v46 = vld [vmem:[#allocation14_spill] sm:$0xff] }
 0x307   : > { %9172 = vmatprep.subr.bf16.mxu1 %v10958_v49 }
 0x309   : > { %8378 = vmatmul.mubr.f32.gmra.mrb[12].mxu1 %v12145_v33 }
 0x30a   : > { %9174 = vmatpush3.bf16.msra.mxu1 %v10958_v49  ;;  %8380 = vmatprep.mubr.f32.mxu1 %v10931_v23  ;;  %v12149_v49 = vld [vmem:[#allocation17_spill] sm:$0xff] }
 0x30b   : > { %9176 = vmatprep.subr.bf16.mxu1 %v10970_v40 }
 0x30d   : > { %8381 = vmatmul.mubr.f32.gmra.mrb[14].mxu1 %v12146_v26 }
 0x30e   : > { %9178 = vmatpush3.bf16.msra.mxu1 %v10970_v40  ;;  %8399 = vmatprep.mubr.f32.mxu1 %v10763_v10  ;;  %v12151_v40 = vld [vmem:[#allocation16_spill] sm:$0xff] }
 0x30f   : > { %9180 = vmatprep.subr.bf16.mxu1 %v12147_v14 }
 0x311   : > { %8400 = vmatmul.mubr.f32.vlgmr.msra.gmra.mrb[8].mxu1 %v10789_v39 }
 0x312   : > { %9182 = vmatpush3.bf16.msra.mxu1 %v12147_v14  ;;  %8402 = vmatprep.mubr.f32.mxu1 %v10791_v45  ;;  %v12168_v14 = vld [vmem:[#allocation51_spill] sm:$0xff] }
 0x313   : > { %9184 = vmatprep.subr.bf16.mxu1 %v12148_v46 }
 0x315   : > { %8403 = vmatmul.mubr.f32.gmra.mrb[10].mxu1 %v10793_v59 }
 0x316   : > { %9186 = vmatpush3.bf16.msra.mxu1 %v12148_v46  ;;  %8405 = vmatprep.mubr.f32.mxu1 %v10814_v61  ;;  %v12169_v46 = vld [vmem:[#allocation47_spill] sm:$0xff] }
 0x317   : > { %9188 = vmatprep.subr.bf16.mxu1 %v12149_v49 }
 0x319   : > { %8406 = vmatmul.mubr.f32.gmra.mrb[12].mxu1 %v10823_v42 }
 0x31a   : > { %9190 = vmatpush3.bf16.msra.mxu1 %v12149_v49  ;;  %8408 = vmatprep.mubr.f32.mxu1 %v10856_v55  ;;  %v12170_v49 = vld [vmem:[#allocation57_spill] sm:$0xff] }
 0x31b   : > { %9192 = vmatprep.subr.bf16.mxu1 %v10952_v19 }
 0x31d   : > { %8409 = vmatmul.mubr.f32.gmra.mrb[14].mxu1 %v10867_v31 }
 0x31e   : > { %9194 = vmatpush3.bf16.msra.mxu1 %v10952_v19  ;;  %8427 = vmatprep.mubr.f32.mxu1 %v10766_v11  ;;  %v12150_v19 = vld [vmem:[#allocation13_spill] sm:$0xff] }
 0x31f   : > { %9196 = vmatprep.subr.bf16.mxu1 %v12140_v32 }
 0x321   : > { %8428 = vmatmul.mubr.f32.vlgmr.msra.gmra.mrb[8].mxu1 %v10799_v9 }
 0x322   : > { %9198 = vmatpush3.bf16.msra.mxu1 %v12140_v32  ;;  %8430 = vmatprep.mubr.f32.mxu1 %v10802_v8 }
 0x323   : > { %9200 = vmatprep.subr.bf16.mxu1 %v10923_v30 }
 0x325   : > { %8431 = vmatmul.mubr.f32.gmra.mrb[10].mxu1 %v10809_v6 }
 0x326   : > { %9202 = vmatpush3.bf16.msra.mxu1 %v10923_v30  ;;  %8433 = vmatprep.mubr.f32.mxu1 %v10828_v47 }
 0x327   : > { %9204 = vmatprep.subr.bf16.mxu1 %v10935_v20 }
 0x329   : > { %8434 = vmatmul.mubr.f32.gmra.mrb[12].mxu1 %v10841_v34 }
 0x32a   : > { %9206 = vmatpush3.bf16.msra.mxu1 %v10935_v20  ;;  %8436 = vmatprep.mubr.f32.mxu1 %v10874_v1 }
 0x32b   : > { %9208 = vmatprep.subr.bf16.mxu1 %v10945_v36 }
 0x32d   : > { %8437 = vmatmul.mubr.f32.gmra.mrb[14].mxu1 %v10883_v27 }
 0x32e   : > { %9210 = vmatpush3.bf16.msra.mxu1 %v10945_v36  ;;  %8455 = vmatprep.mubr.f32.mxu1 %v10770_v17 }
 0x32f   : > { %9212 = vmatprep.subr.bf16.mxu1 %v12150_v19 }
 0x331   : > { %8456 = vmatmul.mubr.f32.vlgmr.msra.gmra.mrb[8].mxu1 %v10812_v7 }
 0x332   : > { %9214 = vmatpush3.bf16.msra.mxu1 %v12150_v19  ;;  %8458 = vmatprep.mubr.f32.mxu1 %v10818_v41  ;;  %v12172_v19 = vld [vmem:[#allocation32_spill] sm:$0xff] }
 0x333   : > { %9216 = vmatprep.subr.bf16.mxu1 %v12151_v40 }
 0x335   : > { %8459 = vmatmul.mubr.f32.gmra.mrb[10].mxu1 %v10821_v25 }
 0x336   : > { %9218 = vmatpush3.bf16.msra.mxu1 %v12151_v40  ;;  %8461 = vmatprep.mubr.f32.mxu1 %v12136_v15  ;;  %v12173_v40 = vld [vmem:[#allocation26_spill] sm:$0xff] }
 0x337   : > { %9220 = vmatprep.subr.bf16.mxu1 %v12152_v56 }
 0x339   : > { %8462 = vmatmul.mubr.f32.gmra.mrb[12].mxu1 %v12137_v50 }
 0x33a   : > { %9222 = vmatpush3.bf16.msra.mxu1 %v12152_v56  ;;  %8464 = vmatprep.mubr.f32.mxu1 %v12139_v38  ;;  %v12174_v56 = vld [vmem:[#allocation33_spill] sm:$0xff] }
 0x33b   : > { %9224 = vmatprep.subr.bf16.mxu1 %v12153_v28 }
 0x33d   : > { %8465 = vmatmul.mubr.f32.gmra.mrb[14].mxu1 %v10909_v3 }
 0x33e   : > { %9226 = vmatpush3.bf16.msra.mxu1 %v12153_v28  ;;  %8483 = vmatprep.mubr.f32.mxu1 %v10763_v10 }
 0x33f   : > { %9228 = vmatprep.subr.bf16.mxu1 %v12140_v32 }
 0x341   : > { %8484 = vmatmul.mubr.f32.vlgmr.msra.gmra.mrb[8].mxu1 %v10789_v39 }
 0x342   : > { %9230 = vmatpush3.bf16.msra.mxu1 %v12140_v32  ;;  %8486 = vmatprep.mubr.f32.mxu1 %v10791_v45  ;;  %v12167_v32 = vld [vmem:[#allocation45_spill] sm:$0xff] }
 0x343   : > { %9232 = vmatprep.subr.bf16.mxu1 %v10923_v30 }
 0x345   : > { %8487 = vmatmul.mubr.f32.gmra.mrb[10].mxu1 %v10793_v59 }
 0x346   : > { %9234 = vmatpush3.bf16.msra.mxu1 %v10923_v30  ;;  %8489 = vmatprep.mubr.f32.mxu1 %v10814_v61  ;;  %v12155_v30 = vld [vmem:[#allocation28_spill] sm:$0xff] }
 0x347   : > { %9236 = vmatprep.subr.bf16.mxu1 %v10935_v20 }
 0x349   : > { %8490 = vmatmul.mubr.f32.gmra.mrb[12].mxu1 %v10823_v42 }
 0x34a   : > { %9238 = vmatpush3.bf16.msra.mxu1 %v10935_v20  ;;  %8492 = vmatprep.mubr.f32.mxu1 %v10856_v55  ;;  %v12156_v20 = vld [vmem:[#allocation39_spill] sm:$0xff] }
 0x34b   : > { %9240 = vmatprep.subr.bf16.mxu1 %v10945_v36 }
 0x34d   : > { %8493 = vmatmul.mubr.f32.gmra.mrb[14].mxu1 %v10867_v31 }
 0x34e   : > { %9242 = vmatpush3.bf16.msra.mxu1 %v10945_v36  ;;  %8511 = vmatprep.mubr.f32.mxu1 %v10763_v10  ;;  %v12157_v36 = vld [vmem:[#allocation34_spill] sm:$0xff] }
 0x34f   : > { %9244 = vmatprep.subr.bf16.mxu1 %v12154_v24 }
 0x351   : > { %8512 = vmatmul.mubr.f32.vlgmr.msra.gmra.mrb[8].mxu1 %v10789_v39 }
 0x352   : > { %9246 = vmatpush3.bf16.msra.mxu1 %v12154_v24  ;;  %8514 = vmatprep.mubr.f32.mxu1 %v10791_v45 }
 0x353   : > { %9248 = vmatprep.subr.bf16.mxu1 %v12155_v30 }
 0x355   : > { %8515 = vmatmul.mubr.f32.gmra.mrb[10].mxu1 %v10793_v59 }
 0x356   : > { %9250 = vmatpush3.bf16.msra.mxu1 %v12155_v30  ;;  %8517 = vmatprep.mubr.f32.mxu1 %v10814_v61 }
 0x357   : > { %9252 = vmatprep.subr.bf16.mxu1 %v10979_v37 }
 0x359   : > { %8518 = vmatmul.mubr.f32.gmra.mrb[12].mxu1 %v10823_v42 }
 0x35a   : > { %9254 = vmatpush3.bf16.msra.mxu1 %v10979_v37  ;;  %8520 = vmatprep.mubr.f32.mxu1 %v10856_v55 }
 0x35b   : > { %9256 = vmatprep.subr.bf16.mxu1 %v12156_v20 }
 0x35d   : > { %8521 = vmatmul.mubr.f32.gmra.mrb[14].mxu1 %v10867_v31 }
 0x35e   : > { %9258 = vmatpush3.bf16.msra.mxu1 %v12156_v20  ;;  %8539 = vmatprep.mubr.f32.mxu1 %v12141_v21 }
 0x35f   : > { %9260 = vmatprep.subr.bf16.mxu1 %v12157_v36 }
 0x361   : > { %8540 = vmatmul.mubr.f32.vlgmr.msra.gmra.mrb[16].mxu1 %v12142_v48 }
 0x362   : > { %9262 = vmatpush3.bf16.msra.mxu1 %v12157_v36  ;;  %8542 = vmatprep.mubr.f32.mxu1 %v12143_v16 }
 0x363   : > { %9264 = vmatprep.subr.bf16.mxu1 %v12158_v43 }
 0x365   : > { %8543 = vmatmul.mubr.f32.gmra.mrb[18].mxu1 %v10854_v51 }
 0x366   : > { %9266 = vmatpush3.bf16.msra.mxu1 %v12158_v43  ;;  %8545 = vmatprep.mubr.f32.mxu1 %v12144_v62  ;;  %v12176_v43 = vld [vmem:[#allocation50_spill] sm:$0xff] }
 0x367   : > { %9268 = vmatprep.subr.bf16.mxu1 %v12159_v4 }
 0x369   : > { %8546 = vmatmul.mubr.f32.gmra.mrb[20].mxu1 %v12145_v33 }
 0x36a   : > { %9270 = vmatpush3.bf16.msra.mxu1 %v12159_v4  ;;  %8548 = vmatprep.mubr.f32.mxu1 %v10931_v23 }
 0x36b   : > { %9272 = vmatprep.subr.bf16.mxu1 %v12160_v0 }
 0x36d   : > { %8549 = vmatmul.mubr.f32.gmra.mrb[22].mxu1 %v12146_v26 }
 0x36e   : > { %9274 = vmatpush3.bf16.msra.mxu1 %v12160_v0  ;;  %8567 = vmatprep.mubr.f32.mxu1 %v10763_v10 }
 0x36f   : > { %9276 = vmatprep.subr.bf16.mxu1 %v12161_v29 }
 0x371   : > { %8568 = vmatmul.mubr.f32.vlgmr.msra.gmra.mrb[16].mxu1 %v10789_v39 }
 0x372   : > { %9278 = vmatpush3.bf16.msra.mxu1 %v12161_v29  ;;  %8570 = vmatprep.mubr.f32.mxu1 %v10791_v45  ;;  %v12177_v29 = vld [vmem:[#allocation54_spill] sm:$0xff] }
 0x373   : > { %9280 = vmatprep.subr.bf16.mxu1 %v12162_v22 }
 0x375   : > { %8571 = vmatmul.mubr.f32.gmra.mrb[18].mxu1 %v10793_v59 }
 0x376   : > { %9282 = vmatpush3.bf16.msra.mxu1 %v12162_v22  ;;  %8573 = vmatprep.mubr.f32.mxu1 %v10814_v61 }
 0x377   : > { %9284 = vmatprep.subr.bf16.mxu1 %v12163_v44 }
 0x379   : > { %8574 = vmatmul.mubr.f32.gmra.mrb[20].mxu1 %v10823_v42 }
 0x37a   : > { %9286 = vmatpush3.bf16.msra.mxu1 %v12163_v44  ;;  %8576 = vmatprep.mubr.f32.mxu1 %v10856_v55 }
 0x37b   : > { %9288 = vmatprep.subr.bf16.mxu1 %v12164_v52 }
 0x37d   : > { %8577 = vmatmul.mubr.f32.gmra.mrb[22].mxu1 %v10867_v31 }
 0x37e   : > { %9290 = vmatpush3.bf16.msra.mxu1 %v12164_v52  ;;  %8595 = vmatprep.mubr.f32.mxu1 %v10766_v11  ;;  %v12178_v52 = vld [vmem:[#allocation22_spill] sm:$0xff] }
 0x37f   : > { %9292 = vmatprep.subr.bf16.mxu1 %v12154_v24 }
 0x381   : > { %8596 = vmatmul.mubr.f32.vlgmr.msra.gmra.mrb[16].mxu1 %v10799_v9 }
 0x382   : > { %9294 = vmatpush3.bf16.msra.mxu1 %v12154_v24  ;;  %8598 = vmatprep.mubr.f32.mxu1 %v10802_v8 }
 0x383   : > { %9296 = vmatprep.subr.bf16.mxu1 %v12155_v30 }
 0x385   : > { %8599 = vmatmul.mubr.f32.gmra.mrb[18].mxu1 %v10809_v6 }
 0x386   : > { %9298 = vmatpush3.bf16.msra.mxu1 %v12155_v30  ;;  %8601 = vmatprep.mubr.f32.mxu1 %v10828_v47 }
 0x387   : > { %9300 = vmatprep.subr.bf16.mxu1 %v10979_v37 }
 0x389   : > { %8602 = vmatmul.mubr.f32.gmra.mrb[20].mxu1 %v10841_v34 }
 0x38a   : > { %9302 = vmatpush3.bf16.msra.mxu1 %v10979_v37  ;;  %8604 = vmatprep.mubr.f32.mxu1 %v10874_v1 }
 0x38b   : > { %9304 = vmatprep.subr.bf16.mxu1 %v12156_v20 }
 0x38d   : > { %8605 = vmatmul.mubr.f32.gmra.mrb[22].mxu1 %v10883_v27 }
 0x38e   : > { %9306 = vmatpush3.bf16.msra.mxu1 %v12156_v20  ;;  %8623 = vmatprep.mubr.f32.mxu1 %v10770_v17 }
 0x38f   : > { %9308 = vmatprep.subr.bf16.mxu1 %v12165_v12 }
 0x391   : > { %8624 = vmatmul.mubr.f32.vlgmr.msra.gmra.mrb[16].mxu1 %v10812_v7 }
 0x392   : > { %9310 = vmatpush3.bf16.msra.mxu1 %v12165_v12  ;;  %8626 = vmatprep.mubr.f32.mxu1 %v10818_v41  ;;  %v12179_v12 = vld [vmem:[#allocation30_spill] sm:$0xff] }
 0x393   : > { %9312 = vmatprep.subr.bf16.mxu1 %v12166_v53 }
 0x395   : > { %8627 = vmatmul.mubr.f32.gmra.mrb[18].mxu1 %v10821_v25 }
 0x396   : > { %9314 = vmatpush3.bf16.msra.mxu1 %v12166_v53  ;;  %8629 = vmatprep.mubr.f32.mxu1 %v12136_v15  ;;  %v12180_v53 = vld [vmem:[#allocation38_spill] sm:$0xff] }
 0x397   : > { %9316 = vmatprep.subr.bf16.mxu1 %v12167_v32 }
 0x399   : > { %8630 = vmatmul.mubr.f32.gmra.mrb[20].mxu1 %v12137_v50 }
 0x39a   : > { %9318 = vmatpush3.bf16.msra.mxu1 %v12167_v32  ;;  %8632 = vmatprep.mubr.f32.mxu1 %v12139_v38  ;;  %v12181_v32 = vld [vmem:[#allocation21_spill] sm:$0xff] }
 0x39b   : > { %9320 = vmatprep.subr.bf16.mxu1 %v12168_v14 }
 0x39d   : > { %8633 = vmatmul.mubr.f32.gmra.mrb[22].mxu1 %v10909_v3 }
 0x39e   : > { %9322 = vmatpush3.bf16.msra.mxu1 %v12168_v14  ;;  %8651 = vmatprep.mubr.f32.mxu1 %v10763_v10  ;;  %v12182_v14 = vld [vmem:[#allocation27_spill] sm:$0xff] }
 0x39f   : > { %9324 = vmatprep.subr.bf16.mxu1 %v12154_v24 }
 0x3a1   : > { %8652 = vmatmul.mubr.f32.vlgmr.msra.gmra.mrb[16].mxu1 %v10789_v39 }
 0x3a2   : > { %9326 = vmatpush3.bf16.msra.mxu1 %v12154_v24  ;;  %8654 = vmatprep.mubr.f32.mxu1 %v10791_v45 }
 0x3a3   : > { %9328 = vmatprep.subr.bf16.mxu1 %v12155_v30 }
 0x3a5   : > { %8655 = vmatmul.mubr.f32.gmra.mrb[18].mxu1 %v10793_v59 }
 0x3a6   : > { %9330 = vmatpush3.bf16.msra.mxu1 %v12155_v30  ;;  %8657 = vmatprep.mubr.f32.mxu1 %v10814_v61  ;;  %v12175_v30 = vld [vmem:[#allocation42_spill] sm:$0xff] }
 0x3a7   : > { %9332 = vmatprep.subr.bf16.mxu1 %v10979_v37 }
 0x3a9   : > { %8658 = vmatmul.mubr.f32.gmra.mrb[20].mxu1 %v10823_v42 }
 0x3aa   : > { %9334 = vmatpush3.bf16.msra.mxu1 %v10979_v37  ;;  %8660 = vmatprep.mubr.f32.mxu1 %v10856_v55  ;;  %v12171_v37 = vld [vmem:[#allocation23_spill] sm:$0xff] }
 0x3ab   : > { %9336 = vmatprep.subr.bf16.mxu1 %v12156_v20 }
 0x3ad   : > { %8661 = vmatmul.mubr.f32.gmra.mrb[22].mxu1 %v10867_v31 }
 0x3ae   : > { %9338 = vmatpush3.bf16.msra.mxu1 %v12156_v20  ;;  %8679 = vmatprep.mubr.f32.mxu1 %v10763_v10 }
 0x3af   : > { %9340 = vmatprep.subr.bf16.mxu1 %v12169_v46 }
 0x3b1   : > { %8680 = vmatmul.mubr.f32.vlgmr.msra.gmra.mrb[16].mxu1 %v10789_v39 }
 0x3b2   : > { %9342 = vmatpush3.bf16.msra.mxu1 %v12169_v46  ;;  %8682 = vmatprep.mubr.f32.mxu1 %v10791_v45 }
 0x3b3   : > { %9344 = vmatprep.subr.bf16.mxu1 %v12170_v49 }
 0x3b5   : > { %8683 = vmatmul.mubr.f32.gmra.mrb[18].mxu1 %v10793_v59 }
 0x3b6   : > { %9346 = vmatpush3.bf16.msra.mxu1 %v12170_v49  ;;  %8685 = vmatprep.mubr.f32.mxu1 %v10814_v61 }
 0x3b7   : > { %9348 = vmatprep.subr.bf16.mxu1 %v12171_v37 }
 0x3b9   : > { %8686 = vmatmul.mubr.f32.gmra.mrb[20].mxu1 %v10823_v42 }
 0x3ba   : > { %9350 = vmatpush3.bf16.msra.mxu1 %v12171_v37  ;;  %8688 = vmatprep.mubr.f32.mxu1 %v10856_v55 }
 0x3bb   : > { %9352 = vmatprep.subr.bf16.mxu1 %v12172_v19 }
 0x3bd   : > { %8689 = vmatmul.mubr.f32.gmra.mrb[22].mxu1 %v10867_v31 }
 0x3be   : > { %9354 = vmatpush3.bf16.msra.mxu1 %v12172_v19  ;;  %8707 = vmatprep.mubr.f32.mxu1 %v12141_v21 }
 0x3bf   : > { %9356 = vmatprep.subr.bf16.mxu1 %v12173_v40 }
 0x3c1   : > { %8708 = vmatmul.mubr.f32.vlgmr.msra.gmra.mrb[24].mxu1 %v12142_v48 }
 0x3c2   : > { %9358 = vmatpush3.bf16.msra.mxu1 %v12173_v40  ;;  %8710 = vmatprep.mubr.f32.mxu1 %v12143_v16  ;;  %v12183_v40 = vld [vmem:[#allocation37_spill] sm:$0xff] }
 0x3c3   : > { %9360 = vmatprep.subr.bf16.mxu1 %v12174_v56 }
 0x3c4   : > { %v11343_v28 = vpop.f32.mrb[0].mxu1 }
 0x3c5   : > { %v11345_v24 = vpop.f32.mrb[1].mxu1  ;;  %8711 = vmatmul.mubr.f32.gmra.mrb[26].mxu1 %v10854_v51 }
 0x3c6   : > { %9362 = vmatpush3.bf16.msra.mxu1 %v12174_v56  ;;  %8713 = vmatprep.mubr.f32.mxu1 %v12144_v62  ;;  %v12184_v56 = vld [vmem:[#allocation43_spill] sm:$0xff] }
 0x3c7   : > { %9364 = vmatprep.subr.bf16.mxu1 %v12175_v30 }
 0x3c8   : > { %v11351_v20 = vpop.f32.mrb[2].mxu1 }
 0x3c9   : > { %v11353_v36 = vpop.f32.mrb[3].mxu1  ;;  %8714 = vmatmul.mubr.f32.gmra.mrb[28].mxu1 %v12145_v33 }
 0x3ca   : > { %9366 = vmatpush3.bf16.msra.mxu1 %v12175_v30  ;;  %8716 = vmatprep.mubr.f32.mxu1 %v10931_v23 }
 0x3cb   : > { %9368 = vmatprep.subr.bf16.mxu1 %v12176_v43 }
 0x3cc   : > { %v11359_v4 = vpop.f32.mrb[4].mxu1 }
 0x3cd   : > { %v11361_v0 = vpop.f32.mrb[5].mxu1  ;;  %8717 = vmatmul.mubr.f32.gmra.mrb[30].mxu1 %v12146_v26 }
 0x3ce   : > { %9370 = vmatpush3.bf16.msra.mxu1 %v12176_v43  ;;  %8735 = vmatprep.mubr.f32.mxu1 %v10763_v10 }
 0x3cf   : > { %9372 = vmatprep.subr.bf16.mxu1 %v12177_v29 }
 0x3d0   : > { %v11367_v22 = vpop.f32.mrb[6].mxu1 }
 0x3d1   : > { %v11369_v44 = vpop.f32.mrb[7].mxu1  ;;  %8736 = vmatmul.mubr.f32.vlgmr.msra.gmra.mrb[24].mxu1 %v10789_v39 }
 0x3d2   : > { %9374 = vmatpush3.bf16.msra.mxu1 %v12177_v29  ;;  %8738 = vmatprep.mubr.f32.mxu1 %v10791_v45 }
 0x3d3   : > { %9376 = vmatprep.subr.bf16.mxu1 %v12178_v52 }
 0x3d5   : > { %8739 = vmatmul.mubr.f32.gmra.mrb[26].mxu1 %v10793_v59 }
 0x3d6   : > { %9378 = vmatpush3.bf16.msra.mxu1 %v12178_v52  ;;  %8741 = vmatprep.mubr.f32.mxu1 %v10814_v61  ;;  %v11487_v52 = vmul.f32 %v11351_v20, %v11351_v20 }
 0x3d7   : > { %9380 = vmatprep.subr.bf16.mxu1 %v12179_v12 }
 0x3d9   : > { %8742 = vmatmul.mubr.f32.gmra.mrb[28].mxu1 %v10823_v42 }
 0x3da   : > { %9382 = vmatpush3.bf16.msra.mxu1 %v12179_v12  ;;  %8744 = vmatprep.mubr.f32.mxu1 %v10856_v55  ;;  %v11497_v12 = vmul.f32 %v11353_v36, %v11353_v36 }
 0x3db   : > { %9384 = vmatprep.subr.bf16.mxu1 %v12180_v53 }
 0x3dd   : > { %8745 = vmatmul.mubr.f32.gmra.mrb[30].mxu1 %v10867_v31 }
 0x3de   : > { %9386 = vmatpush3.bf16.msra.mxu1 %v12180_v53  ;;  %8763 = vmatprep.mubr.f32.mxu1 %v10766_v11 }
 0x3df   : > { %9388 = vmatprep.subr.bf16.mxu1 %v12169_v46 }
 0x3e1   : > { %8764 = vmatmul.mubr.f32.vlgmr.msra.gmra.mrb[24].mxu1 %v10799_v9 }
 0x3e2   : > { %9390 = vmatpush3.bf16.msra.mxu1 %v12169_v46  ;;  %8766 = vmatprep.mubr.f32.mxu1 %v10802_v8 }
 0x3e3   : > { %9392 = vmatprep.subr.bf16.mxu1 %v12170_v49 }
 0x3e5   : > { %8767 = vmatmul.mubr.f32.gmra.mrb[26].mxu1 %v10809_v6 }
 0x3e6   : > { %9394 = vmatpush3.bf16.msra.mxu1 %v12170_v49  ;;  %8769 = vmatprep.mubr.f32.mxu1 %v10828_v47 }
 0x3e7   : > { %9396 = vmatprep.subr.bf16.mxu1 %v12171_v37 }
 0x3e9   : > { %8770 = vmatmul.mubr.f32.gmra.mrb[28].mxu1 %v10841_v34 }
 0x3ea   : > { %9398 = vmatpush3.bf16.msra.mxu1 %v12171_v37  ;;  %8772 = vmatprep.mubr.f32.mxu1 %v10874_v1 }
 0x3eb   : > { %9400 = vmatprep.subr.bf16.mxu1 %v12172_v19 }
 0x3ed   : > { %8773 = vmatmul.mubr.f32.gmra.mrb[30].mxu1 %v10883_v27 }
 0x3ee   : > { %9402 = vmatpush3.bf16.msra.mxu1 %v12172_v19  ;;  %8791 = vmatprep.mubr.f32.mxu1 %v10770_v17 }
 0x3ef   : > { %9404 = vmatprep.subr.bf16.mxu1 %v12181_v32 }
 0x3f1   : > { %8792 = vmatmul.mubr.f32.vlgmr.msra.gmra.mrb[24].mxu1 %v10812_v7 }
 0x3f2   : > { %9406 = vmatpush3.bf16.msra.mxu1 %v12181_v32  ;;  %8794 = vmatprep.mubr.f32.mxu1 %v10818_v41 }
 0x3f3   : > { %9408 = vmatprep.subr.bf16.mxu1 %v12182_v14 }
 0x3f5   : > { %8795 = vmatmul.mubr.f32.gmra.mrb[26].mxu1 %v10821_v25 }
 0x3f6   : > { %9410 = vmatpush3.bf16.msra.mxu1 %v12182_v14  ;;  %8797 = vmatprep.mubr.f32.mxu1 %v12136_v15 }
 0x3f7   : > { %9412 = vmatprep.subr.bf16.mxu1 %v12183_v40 }
 0x3f9   : > { %8798 = vmatmul.mubr.f32.gmra.mrb[28].mxu1 %v12137_v50 }
 0x3fa   : > { %9414 = vmatpush3.bf16.msra.mxu1 %v12183_v40  ;;  %8800 = vmatprep.mubr.f32.mxu1 %v12139_v38  ;;  %v11517_v40 = vmul.f32 %v11359_v4, %v11359_v4 }
 0x3fb   : > { %9416 = vmatprep.subr.bf16.mxu1 %v12184_v56 }
 0x3fd   : > { %8801 = vmatmul.mubr.f32.gmra.mrb[30].mxu1 %v10909_v3 }
 0x3fe   : > { %9418 = vmatpush3.bf16.msra.mxu1 %v12184_v56  ;;  %8819 = vmatprep.mubr.f32.mxu1 %v10763_v10  ;;  %v11527_v56 = vmul.f32 %v11361_v0, %v11361_v0 }
 0x3ff   : > { %9420 = vmatprep.subr.bf16.mxu1 %v12169_v46 }
 0x401   : > { %8820 = vmatmul.mubr.f32.vlgmr.msra.gmra.mrb[24].mxu1 %v10789_v39 }
 0x402   : > { %9422 = vmatpush3.bf16.msra.mxu1 %v12169_v46  ;;  %8822 = vmatprep.mubr.f32.mxu1 %v10791_v45  ;;  %v12185_v46 = vld [vmem:[#allocation41_spill] sm:$0xff] }
 0x403   : > { %9424 = vmatprep.subr.bf16.mxu1 %v12170_v49 }
 0x405   : > { %8823 = vmatmul.mubr.f32.gmra.mrb[26].mxu1 %v10793_v59 }
 0x406   : > { %9426 = vmatpush3.bf16.msra.mxu1 %v12170_v49  ;;  %8825 = vmatprep.mubr.f32.mxu1 %v10814_v61  ;;  %v12186_v49 = vld [vmem:[#allocation49_spill] sm:$0xff] }
 0x407   : > { %9428 = vmatprep.subr.bf16.mxu1 %v12171_v37 }
 0x409   : > { %8826 = vmatmul.mubr.f32.gmra.mrb[28].mxu1 %v10823_v42 }
 0x40a   : > { %9430 = vmatpush3.bf16.msra.mxu1 %v12171_v37  ;;  %8828 = vmatprep.mubr.f32.mxu1 %v10856_v55 }
 0x40b   : > { %9432 = vmatprep.subr.bf16.mxu1 %v12172_v19 }
 0x40d   : > { %8829 = vmatmul.mubr.f32.gmra.mrb[30].mxu1 %v10867_v31 }
 0x40e   : > { %9434 = vmatpush3.bf16.msra.mxu1 %v12172_v19  ;;  %8847 = vmatprep.mubr.f32.mxu1 %v10763_v10  ;;  %v11457_v19 = vmul.f32 %v11343_v28, %v11343_v28 }
 0x40f   : > { %9436 = vmatprep.subr.bf16.mxu1 %v12185_v46 }
 0x411   : > { %8848 = vmatmul.mubr.f32.vlgmr.msra.gmra.mrb[24].mxu1 %v10789_v39 }
 0x412   : > { %9438 = vmatpush3.bf16.msra.mxu1 %v12185_v46  ;;  %8850 = vmatprep.mubr.f32.mxu1 %v10791_v45 }
 0x413   : > { %9440 = vmatprep.subr.bf16.mxu1 %v12186_v49 }
 0x415   : > { %8851 = vmatmul.mubr.f32.gmra.mrb[26].mxu1 %v10793_v59 }
 0x416   : > { %9442 = vmatpush3.bf16.msra.mxu1 %v12186_v49  ;;  %8853 = vmatprep.mubr.f32.mxu1 %v10814_v61 }
 0x417   : > { %9444 = vmatprep.subr.bf16.mxu1 %v11078_v35 }
 0x419   : > { %8854 = vmatmul.mubr.f32.gmra.mrb[28].mxu1 %v10823_v42 }
 0x41a   : > { %9446 = vmatpush3.bf16.msra.mxu1 %v11078_v35  ;;  %8856 = vmatprep.mubr.f32.mxu1 %v10856_v55 }
 0x41b   : > { %9448 = vmatprep.subr.bf16.mxu1 %v11092_v18 }
 0x41d   : > { %8857 = vmatmul.mubr.f32.gmra.mrb[30].mxu1 %v10867_v31 }
 0x41e   : > { %9450 = vmatpush3.bf16.msra.mxu1 %v11092_v18  ;;  %8875 = vmatprep.mubr.f32.mxu1 %v12141_v21 }
 0x41f   : > { %9452 = vmatprep.subr.bf16.mxu1 %v11082_v54 }
 0x421   : > { %8876 = vmatmul.mubr.f32.vlgmr.msra.gmra.mrb[32].mxu1 %v12142_v48 }
 0x422   : > { %9454 = vmatpush3.bf16.msra.mxu1 %v11082_v54  ;;  %8878 = vmatprep.mubr.f32.mxu1 %v12143_v16  ;;  %v11467_v54 = vmul.f32 %v11345_v24, %v11345_v24 }
 0x423   : > { %9456 = vmatprep.subr.bf16.mxu1 %v11096_v2 }
 0x424   : > { %v8513_v37 = vpop.f32.mrb[8].mxu1 }
 0x425   : > { %v11459_v30 = vmul.f32 %v8513_v37, %v8513_v37  ;;  %v11462_v43 = vmul.f32 %v8513_v37, %v11343_v28  ;;  %v4256_v21 = vpop.f32.mrb[9].mxu1  ;;  %8879 = vmatmul.mubr.f32.gmra.mrb[34].mxu1 %v10854_v51 }
 0x426   : > { %v11469_v48 = vmul.f32 %v4256_v21, %v4256_v21  ;;  %v11472_v16 = vmul.f32 %v4256_v21, %v11345_v24  ;;  %9458 = vmatpush3.bf16.msra.mxu1 %v11096_v2  ;;  %8881 = vmatprep.mubr.f32.mxu1 %v12144_v62 }
 0x427   : > { %v11478_v28 = vadd.f32 %v11459_v30, %v11457_v19  ;;  %9460 = vmatprep.subr.bf16.mxu1 %v11108_v57 }
 0x428   : > { %v11483_v51 = vadd.f32 %v11469_v48, %v11467_v54  ;;  %v8516_v29 = vpop.f32.mrb[10].mxu1 }
 0x429   : > { %v11489_v24 = vmul.f32 %v8516_v29, %v8516_v29  ;;  %v11492_v2 = vmul.f32 %v8516_v29, %v11351_v20  ;;  %v4268_v62 = vpop.f32.mrb[11].mxu1  ;;  %8882 = vmatmul.mubr.f32.gmra.mrb[36].mxu1 %v12145_v33  ;;  %v12190_v29 = vld [vmem:[#allocation44_spill] sm:$0xff] }
 0x42a   : > { %v11499_v53 = vmul.f32 %v4268_v62, %v4268_v62  ;;  %v11502_v32 = vmul.f32 %v4268_v62, %v11353_v36  ;;  %9462 = vmatpush3.bf16.msra.mxu1 %v11108_v57  ;;  %8884 = vmatprep.mubr.f32.mxu1 %v10931_v23 }
 0x42b   : > { %v11508_v20 = vadd.f32 %v11489_v24, %v11487_v52  ;;  %9464 = vmatprep.subr.bf16.mxu1 %v11117_v63 }
 0x42c   : > { %12187 = vst [vmem:[#allocation56_spill] sm:$0xff] %v11502_v32  ;;  %v11513_v33 = vadd.f32 %v11499_v53, %v11497_v12  ;;  %v8519_v14 = vpop.f32.mrb[12].mxu1 }
 0x42d   : > { %v11519_v36 = vmul.f32 %v8519_v14, %v8519_v14  ;;  %v11522_v57 = vmul.f32 %v8519_v14, %v11359_v4  ;;  %v4280_v23 = vpop.f32.mrb[13].mxu1  ;;  %8885 = vmatmul.mubr.f32.gmra.mrb[38].mxu1 %v12146_v26  ;;  %v11547_v14 = vmul.f32 %v11367_v22, %v11367_v22 }
 0x42e   : > { %v11529_v37 = vmul.f32 %v4280_v23, %v4280_v23  ;;  %v11532_v21 = vmul.f32 %v4280_v23, %v11361_v0  ;;  %9466 = vmatpush3.bf16.msra.mxu1 %v11117_v63  ;;  %8903 = vmatprep.mubr.f32.mxu1 %v10763_v10 }
 0x42f   : > { %12188 = vst [vmem:[#allocation58_spill] sm:$0xff] %v11522_v57  ;;  %v11538_v4 = vadd.f32 %v11519_v36, %v11517_v40  ;;  %9468 = vmatprep.subr.bf16.mxu1 %v12190_v29 }
 0x430   : > { %12189 = vst [vmem:[#allocation59_spill] sm:$0xff] %v11532_v21  ;;  %v11543_v26 = vadd.f32 %v11529_v37, %v11527_v56  ;;  %v8522_v62 = vpop.f32.mrb[14].mxu1  ;;  %v11557_v21 = vmul.f32 %v11369_v44, %v11369_v44 }
 0x431   : > { %v11549_v0 = vmul.f32 %v8522_v62, %v8522_v62  ;;  %v11552_v63 = vmul.f32 %v8522_v62, %v11367_v22  ;;  %v4292_v23 = vpop.f32.mrb[15].mxu1  ;;  %8904 = vmatmul.mubr.f32.vlgmr.msra.gmra.mrb[32].mxu1 %v10789_v39  ;;  %v12192_v62 = vld [vmem:[#allocation52_spill] sm:$0xff] }
 0x432   : > { %v11559_v57 = vmul.f32 %v4292_v23, %v4292_v23  ;;  %v11562_v32 = vmul.f32 %v4292_v23, %v11369_v44  ;;  %9470 = vmatpush3.bf16.msra.mxu1 %v12190_v29  ;;  %8906 = vmatprep.mubr.f32.mxu1 %v10791_v45  ;;  %v12193_v44 = vld [vmem:[#allocation55_spill] sm:$0xff]  ;;  %v6914_v29 = vadd.f32 0.0001, %v11513_v33 }
 0x433   : > { %12191 = vst [vmem:[#allocation60_spill] sm:$0xff] %v11552_v63  ;;  %v11568_v22 = vadd.f32 %v11549_v0, %v11547_v14  ;;  %9472 = vmatprep.subr.bf16.mxu1 %v12192_v62 }
 0x434   : > { %v11573_v63 = vadd.f32 %v11559_v57, %v11557_v21 }
 0x435   : > { %8907 = vmatmul.mubr.f32.gmra.mrb[34].mxu1 %v10793_v59 }
 0x436   : > { %9474 = vmatpush3.bf16.msra.mxu1 %v12192_v62  ;;  %8909 = vmatprep.mubr.f32.mxu1 %v10814_v61 }
 0x437   : > { %9476 = vmatprep.subr.bf16.mxu1 %v12193_v44 }
 0x439   : > { %8910 = vmatmul.mubr.f32.gmra.mrb[36].mxu1 %v10823_v42 }
 0x43a   : > { %9478 = vmatpush3.bf16.msra.mxu1 %v12193_v44  ;;  %8912 = vmatprep.mubr.f32.mxu1 %v10856_v55 }
 0x43b   : > { %9480 = vmatprep.subr.bf16.mxu1 %v11102_v13 }
 0x43d   : > { %8913 = vmatmul.mubr.f32.gmra.mrb[38].mxu1 %v10867_v31 }
 0x43e   : > { %9482 = vmatpush3.bf16.msra.mxu1 %v11102_v13  ;;  %8931 = vmatprep.mubr.f32.mxu1 %v10766_v11  ;;  %v12194_v11 = vld [vmem:[#allocation53_spill] sm:$0xff] }
 0x43f   : > { %9484 = vmatprep.subr.bf16.mxu1 %v12185_v46 }
 0x441   : > { %8932 = vmatmul.mubr.f32.vlgmr.msra.gmra.mrb[32].mxu1 %v10799_v9 }
 0x442   : > { %9486 = vmatpush3.bf16.msra.mxu1 %v12185_v46  ;;  %8934 = vmatprep.mubr.f32.mxu1 %v10802_v8 }
 0x443   : > { %9488 = vmatprep.subr.bf16.mxu1 %v12186_v49 }
 0x445   : > { %8935 = vmatmul.mubr.f32.gmra.mrb[34].mxu1 %v10809_v6 }
 0x446   : > { %9490 = vmatpush3.bf16.msra.mxu1 %v12186_v49  ;;  %8937 = vmatprep.mubr.f32.mxu1 %v10828_v47 }
 0x447   : > { %9492 = vmatprep.subr.bf16.mxu1 %v11078_v35 }
 0x449   : > { %8938 = vmatmul.mubr.f32.gmra.mrb[36].mxu1 %v10841_v34 }
 0x44a   : > { %9494 = vmatpush3.bf16.msra.mxu1 %v11078_v35  ;;  %8940 = vmatprep.mubr.f32.mxu1 %v10874_v1 }
 0x44b   : > { %9496 = vmatprep.subr.bf16.mxu1 %v11092_v18 }
 0x44d   : > { %8941 = vmatmul.mubr.f32.gmra.mrb[38].mxu1 %v10883_v27 }
 0x44e   : > { %9498 = vmatpush3.bf16.msra.mxu1 %v11092_v18  ;;  %8959 = vmatprep.mubr.f32.mxu1 %v10770_v17 }
 0x44f   : > { %9500 = vmatprep.subr.bf16.mxu1 %v12194_v11 }
 0x451   : > { %8960 = vmatmul.mubr.f32.vlgmr.msra.gmra.mrb[32].mxu1 %v10812_v7 }
 0x452   : > { %9502 = vmatpush3.bf16.msra.mxu1 %v12194_v11  ;;  %8962 = vmatprep.mubr.f32.mxu1 %v10818_v41  ;;  %v6917_v11 = vadd.f32 0.0001, %v11538_v4 }
 0x453   : > { %9504 = vmatprep.subr.bf16.mxu1 %v11090_v58 }
 0x455   : > { %8963 = vmatmul.mubr.f32.gmra.mrb[34].mxu1 %v10821_v25 }
 0x456   : > { %9506 = vmatpush3.bf16.msra.mxu1 %v11090_v58  ;;  %8965 = vmatprep.mubr.f32.mxu1 %v12136_v15 }
 0x457   : > { %9508 = vmatprep.subr.bf16.mxu1 %v11098_v60 }
 0x459   : > { %8966 = vmatmul.mubr.f32.gmra.mrb[36].mxu1 %v12137_v50 }
 0x45a   : > { %9510 = vmatpush3.bf16.msra.mxu1 %v11098_v60  ;;  %8968 = vmatprep.mubr.f32.mxu1 %v12139_v38  ;;  %v6913_v38 = vadd.f32 0.0001, %v11478_v28 }
 0x45b   : > { %9512 = vmatprep.subr.bf16.mxu1 %v11110_v5 }
 0x45d   : > { %8969 = vmatmul.mubr.f32.gmra.mrb[38].mxu1 %v10909_v3 }
 0x45e   : > { %9514 = vmatpush3.bf16.msra.mxu1 %v11110_v5  ;;  %8987 = vmatprep.mubr.f32.mxu1 %v10763_v10 }
 0x45f   : > { %9531 = vmatprep.subr.bf16.mxu1 %v12185_v46 }
 0x461   : > { %8988 = vmatmul.mubr.f32.vlgmr.msra.gmra.mrb[32].mxu1 %v10789_v39 }
 0x462   : > { %9535 = vmatpush3.bf16.msra.mxu1 %v12185_v46  ;;  %8990 = vmatprep.mubr.f32.mxu1 %v10791_v45  ;;  %v6912_v46 = vadd.f32 0.0001, %v11483_v51 }
 0x463   : > { %9532 = vmatprep.subr.bf16.mxu1 %v12186_v49 }
 0x465   : > { %8991 = vmatmul.mubr.f32.gmra.mrb[34].mxu1 %v10793_v59 }
 0x466   : > { %9536 = vmatpush3.bf16.msra.mxu1 %v12186_v49  ;;  %8993 = vmatprep.mubr.f32.mxu1 %v10814_v61 }
 0x467   : > { %9533 = vmatprep.subr.bf16.mxu1 %v11078_v35 }
 0x469   : > { %8994 = vmatmul.mubr.f32.gmra.mrb[36].mxu1 %v10823_v42 }
 0x46a   : > { %9537 = vmatpush3.bf16.msra.mxu1 %v11078_v35  ;;  %8996 = vmatprep.mubr.f32.mxu1 %v10856_v55 }
 0x46b   : > { %9534 = vmatprep.subr.bf16.mxu1 %v11092_v18 }
 0x46d   : > { %8997 = vmatmul.mubr.f32.gmra.mrb[38].mxu1 %v10867_v31 }
 0x46e   : > { %9538 = vmatpush3.bf16.msra.mxu1 %v11092_v18  ;;  %9018 = vmatprep.mubr.f32.mxu1 %v10791_v45 }
 0x471   : > { %9019 = vmatmul.mubr.f32.vlgmr.msra.gmra.mrb[34].mxu1 %v10793_v59 }
 0x472   : > { %9021 = vmatprep.mubr.f32.mxu1 %v10814_v61 }
 0x475   : > { %9022 = vmatmul.mubr.f32.gmra.mrb[36].mxu1 %v10823_v42 }
 0x476   : > { %9024 = vmatprep.mubr.f32.mxu1 %v10856_v55 }
 0x479   : > { %9025 = vmatmul.mubr.f32.gmra.mrb[38].mxu1 %v10867_v31  ;;  %v9017_v31 = vpop.f32.mrb[40].mxu0 }
 0x47a   : > { %v6770_v1 = vpop.f32.mrb[41].mxu0 }
 0x484   : > { %v8681_v10 = vpop.f32.mrb[16].mxu1 }
 0x485   : > { %v6841_v17 = vsub.f32 %v8681_v10, %v11457_v19  ;;  %v5094_v39 = vpop.f32.mrb[17].mxu1 }
 0x486   : > { %v6840_v9 = vsub.f32 %v5094_v39, %v11467_v54  ;;  %v6916_v39 = vadd.f32 0.0001, %v11543_v26 }
 0x488   : > { %v8684_v8 = vpop.f32.mrb[18].mxu1 }
 0x489   : > { %v6843_v6 = vsub.f32 %v8684_v8, %v11487_v52  ;;  %v5106_v45 = vpop.f32.mrb[19].mxu1 }
 0x48a   : > { %v6842_v59 = vsub.f32 %v5106_v45, %v11497_v12  ;;  %v6919_v45 = vadd.f32 0.0001, %v11568_v22 }
 0x48c   : > { %v8687_v7 = vpop.f32.mrb[20].mxu1 }
 0x48d   : > { %v6845_v61 = vsub.f32 %v8687_v7, %v11517_v40  ;;  %v5118_v41 = vpop.f32.mrb[21].mxu1  ;;  %v6918_v7 = vadd.f32 0.0001, %v11573_v63 }
 0x48e   : > { %v6844_v25 = vsub.f32 %v5118_v41, %v11527_v56 }
 0x490   : > { %v8690_v42 = vpop.f32.mrb[22].mxu1 }
 0x491   : > { %v6847_v47 = vsub.f32 %v8690_v42, %v11547_v14  ;;  %v5130_v34 = vpop.f32.mrb[23].mxu1 }
 0x492   : > { %v6846_v55 = vsub.f32 %v5130_v34, %v11557_v21  ;;  %v6864_v34 = vmul.f32 2.0, %v11472_v16 }
 0x4e4   : > { %v8849_v27 = vpop.f32.mrb[24].mxu1 }
 0x4e5   : > { %v6849_v3 = vsub.f32 %v8849_v27, %v11459_v30  ;;  %v5932_v15 = vpop.f32.mrb[25].mxu1 }
 0x4e6   : > { %v6848_v50 = vsub.f32 %v5932_v15, %v11469_v48  ;;  %v6915_v48 = vadd.f32 0.0001, %v11508_v20  ;;  %v6872_v15 = vadd.f32 0.0001, %v6864_v34 }
 0x4e7   : > { %v6921_v35 = vadd.f32 %v6849_v3, %v6841_v17 }
 0x4e8   : > { %v6920_v58 = vadd.f32 %v6848_v50, %v6840_v9  ;;  %v8852_v18 = vpop.f32.mrb[26].mxu1 }
 0x4e9   : > { %v6929_v60 = vadd.f32 0.0009, %v6921_v35  ;;  %v6851_v13 = vsub.f32 %v8852_v18, %v11489_v24  ;;  %v5944_v5 = vpop.f32.mrb[27].mxu1 }
 0x4ea   : > { %v6928_v49 = vadd.f32 0.0009, %v6920_v58  ;;  %v6850_v19 = vsub.f32 %v5944_v5, %v11499_v53 }
 0x4eb   : > { %v6937_v54 = vmul.f32 %v6929_v60, %v6913_v38  ;;  %v6923_v52 = vadd.f32 %v6851_v13, %v6843_v6 }
 0x4ec   : > { %v6936_v30 = vmul.f32 %v6928_v49, %v6912_v46  ;;  %v6922_v12 = vadd.f32 %v6850_v19, %v6842_v59  ;;  %v8855_v40 = vpop.f32.mrb[28].mxu1  ;;  %v12195_v46 = vld [vmem:[#allocation56_spill] sm:$0xff] }
 0x4ed   : > { %v6931_v56 = vadd.f32 0.0009, %v6923_v52  ;;  %v6853_v21 = vsub.f32 %v8855_v40, %v11519_v36  ;;  %v5956_v28 = vpop.f32.mrb[29].mxu1  ;;  %9947 = vrcp.f32 %v6937_v54  ;;  %v6866_v49 = vmul.f32 2.0, %v12195_v46  ;;  %v12197_v40 = vld [vmem:[#allocation59_spill] sm:$0xff] }
 0x4ee   : > { %v6930_v24 = vadd.f32 0.0009, %v6922_v12  ;;  %v6852_v14 = vsub.f32 %v5956_v28, %v11529_v37  ;;  %9949 = vrcp.f32 %v6936_v30  ;;  %v12196_v30 = vld [vmem:[#allocation58_spill] sm:$0xff] }
 0x4ef   : > { %v6939_v51 = vmul.f32 %v6931_v56, %v6915_v48  ;;  %v6925_v23 = vadd.f32 %v6853_v21, %v6845_v61  ;;  %v6869_v12 = vmul.f32 2.0, %v12196_v30  ;;  %v6868_v48 = vmul.f32 2.0, %v12197_v40 }
 0x4f0   : > { %v6938_v62 = vmul.f32 %v6930_v24, %v6914_v29  ;;  %v6924_v53 = vadd.f32 %v6852_v14, %v6844_v25  ;;  %v8858_v44 = vpop.f32.mrb[30].mxu1  ;;  %v6874_v14 = vadd.f32 0.0001, %v6866_v49 }
 0x4f1   : > { %v6933_v10 = vadd.f32 0.0009, %v6925_v23  ;;  %v6855_v17 = vsub.f32 %v8858_v44, %v11549_v0  ;;  %v5968_v20 = vpop.f32.mrb[31].mxu1  ;;  %9951 = vrcp.f32 %v6939_v51 }
 0x4f2   : > { %v6932_v36 = vadd.f32 0.0009, %v6924_v53  ;;  %v6854_v9 = vsub.f32 %v5968_v20, %v11559_v57  ;;  %v6865_v57 = vmul.f32 2.0, %v11462_v43  ;;  %9953 = vrcp.f32 %v6938_v62 }
 0x4f3   : > { %v6941_v33 = vmul.f32 %v6933_v10, %v6917_v11  ;;  %v6927_v8 = vadd.f32 %v6855_v17, %v6847_v47  ;;  %v6877_v11 = vadd.f32 0.0001, %v6869_v12  ;;  %v6876_v10 = vadd.f32 0.0001, %v6868_v48 }
 0x4f4   : > { %v6940_v6 = vmul.f32 %v6932_v36, %v6916_v39  ;;  %v6926_v37 = vadd.f32 %v6854_v9, %v6846_v55  ;;  %v6873_v63 = vadd.f32 0.0001, %v6865_v57  ;;  %v12198_v9 = vld [vmem:[#allocation60_spill] sm:$0xff] }
 0x4f5   : > { %v6935_v59 = vadd.f32 0.0009, %v6927_v8  ;;  %9955 = vrcp.f32 %v6941_v33  ;;  %v6871_v33 = vmul.f32 2.0, %v12198_v9 }
 0x4f6   : > { %v6934_v61 = vadd.f32 0.0009, %v6926_v37  ;;  %9957 = vrcp.f32 %v6940_v6 }
 0x4f7   : > { %v6943_v4 = vmul.f32 %v6935_v59, %v6919_v45  ;;  %v9948_v58 = vpop.eup %9947  ;;  %v6870_v59 = vmul.f32 2.0, %v11562_v32  ;;  %v6879_v34 = vadd.f32 0.0001, %v6871_v33 }
 0x4f8   : > { %v6942_v41 = vmul.f32 %v6934_v61, %v6918_v7 }
 0x4f9   : > { %9959 = vrcp.f32 %v6943_v4 }
 0x4fa   : > { %9961 = vrcp.f32 %v6942_v41 }
 0x534   : > { %v8989_v0 = vpop.f32.mrb[32].mxu1 }
 0x535   : > { %v9539_v25 = vadd.f32 %v9017_v31, %v8989_v0  ;;  %v6649_v26 = vpop.f32.mrb[33].mxu1  ;;  %v9950_v31 = vpop.eup %9949 }
 0x536   : > { %v9540_v42 = vadd.f32 %v6770_v1, %v6649_v26  ;;  %v9952_v44 = vpop.eup %9951 }
 0x537   : > { %v6857_v47 = vsub.f32 %v9539_v25, %v11462_v43  ;;  %v9954_v36 = vpop.eup %9953 }
 0x538   : > { %v6856_v22 = vsub.f32 %v9540_v42, %v11472_v16  ;;  %v6867_v16 = vmul.f32 2.0, %v11492_v2  ;;  %v9956_v25 = vpop.eup %9955 }
 0x539   : > { %v6881_v55 = vmul.f32 2.0, %v6857_v47  ;;  %v9958_v47 = vpop.eup %9957 }
 0x53a   : > { %v6880_v27 = vmul.f32 2.0, %v6856_v22  ;;  %v6875_v28 = vadd.f32 0.0001, %v6867_v16 }
 0x53b   : > { %v6889_v3 = vadd.f32 0.0009, %v6881_v55 }
 0x53c   : > { %v6888_v50 = vadd.f32 0.0009, %v6880_v27  ;;  %v6878_v27 = vadd.f32 0.0001, %v6870_v59 }
 0x53d   : > { %v6897_v35 = vmul.f32 %v6889_v3, %v6873_v63 }
 0x53e   : > { %v6896_v18 = vmul.f32 %v6888_v50, %v6872_v15  ;;  %v9960_v50 = vpop.eup %9959 }
 0x53f   : > { %v6947_v38 = vmul.f32 %v9948_v58, %v6897_v35 }
 0x540   : > { %v6945_v1 = vmul.f32 %v9950_v31, %v6896_v18  ;;  %v9962_v18 = vpop.eup %9961 }
 0x541   : > { %v6963_v54 = vsel %vm240_vm0, %v6947_v38, 0.0 }
 0x542   : > { %v6960_v60 = vsel %vm240_vm0, %v6945_v1, 0.0 }
 0x543   : > { %6961 = vadd.xlane.f32.xlu0 %v6960_v60 }
 0x544   : > { %v9020_v43 = vpop.f32.mrb[34].mxu1 }
 0x545   : > { %v6859_v13 = vsub.f32 %v9020_v43, %v11492_v2  ;;  %v6782_v5 = vpop.f32.mrb[35].mxu1 }
 0x546   : > { %v6858_v19 = vsub.f32 %v6782_v5, %v12195_v46 }
 0x547   : > { %v6883_v52 = vmul.f32 2.0, %v6859_v13  ;;  %6964 = vadd.xlane.f32.xlu0 %v6963_v54 }
 0x548   : > { %v6882_v56 = vmul.f32 2.0, %v6858_v19  ;;  %v9023_v21 = vpop.f32.mrb[36].mxu1 }
 0x549   : > { %v6891_v29 = vadd.f32 0.0009, %v6883_v52  ;;  %v6861_v2 = vsub.f32 %v9023_v21, %v12196_v30  ;;  %v6794_v24 = vpop.f32.mrb[37].mxu1 }
 0x54a   : > { %v6890_v51 = vadd.f32 0.0009, %v6882_v56  ;;  %v6860_v23 = vsub.f32 %v6794_v24, %v12197_v40 }
 0x54b   : > { %v6899_v62 = vmul.f32 %v6891_v29, %v6875_v28  ;;  %v6885_v53 = vmul.f32 2.0, %v6861_v2 }
 0x54c   : > { %v6898_v17 = vmul.f32 %v6890_v51, %v6874_v14  ;;  %v6884_v20 = vmul.f32 2.0, %v6860_v23  ;;  %v9026_v39 = vpop.f32.mrb[38].mxu1 }
 0x54d   : > { %v6893_v8 = vadd.f32 0.0009, %v6885_v53  ;;  %v6863_v6 = vsub.f32 %v9026_v39, %v12198_v9  ;;  %v6806_v37 = vpop.f32.mrb[39].mxu1  ;;  %v6951_v45 = vmul.f32 %v9952_v44, %v6899_v62 }
 0x54e   : > { %v6892_v7 = vadd.f32 0.0009, %v6884_v20  ;;  %v6862_v61 = vsub.f32 %v6806_v37, %v11562_v32  ;;  %v6949_v4 = vmul.f32 %v9954_v36, %v6898_v17 }
 0x54f   : > { %v6901_v41 = vmul.f32 %v6893_v8, %v6877_v11  ;;  %v6887_v0 = vmul.f32 2.0, %v6863_v6  ;;  %v6969_v32 = vsel %vm240_vm0, %v6951_v45, 0.0 }
 0x550   : > { %v6900_v26 = vmul.f32 %v6892_v7, %v6876_v10  ;;  %v6886_v42 = vmul.f32 2.0, %v6862_v61  ;;  %v6966_v57 = vsel %vm240_vm0, %v6949_v4, 0.0 }
 0x551   : > { %v6895_v22 = vadd.f32 0.0009, %v6887_v0  ;;  %6967 = vadd.xlane.f32.xlu1 %v6966_v57  ;;  %v6955_v55 = vmul.f32 %v9956_v25, %v6901_v41 }
 0x552   : > { %v6894_v63 = vadd.f32 0.0009, %v6886_v42  ;;  %v6953_v3 = vmul.f32 %v9958_v47, %v6900_v26 }
 0x553   : > { %v6903_v15 = vmul.f32 %v6895_v22, %v6879_v34  ;;  %v6975_v1 = vsel %vm240_vm0, %v6955_v55, 0.0 }
 0x554   : > { %v6902_v35 = vmul.f32 %v6894_v63, %v6878_v27  ;;  %v6972_v58 = vsel %vm240_vm0, %v6953_v3, 0.0 }
 0x555   : > { %6970 = vadd.xlane.f32.xlu1 %v6969_v32  ;;  %6973 = vadd.xlane.f32.xlu0 %v6972_v58  ;;  %v6959_v31 = vmul.f32 %v9960_v50, %v6903_v15 }
 0x556   : > { %v6957_v38 = vmul.f32 %v9962_v18, %v6902_v35 }
 0x557   : > { %v6981_v43 = vsel %vm240_vm0, %v6959_v31, 0.0 }
 0x558   : > { %v6978_v60 = vsel %vm240_vm0, %v6957_v38, 0.0 }
 0x559   : > { %6976 = vadd.xlane.f32.xlu1 %v6975_v1  ;;  %6979 = vadd.xlane.f32.xlu0 %v6978_v60 }
 0x55d   : > { %6982 = vadd.xlane.f32.xlu1 %v6981_v43 }
 0x5d0   : > { %v6962_v16 = vpop.xlane.xlu0 %6961 }
 0x5d4   : > { %v6965_v13 = vpop.xlane.xlu0 %6964 }
 0x5d5   : > { %v6984_v46 = vadd.f32 %v6965_v13, %v6962_v16 }
 0x5de   : > { %v6968_v5 = vpop.xlane.xlu1 %6967 }
 0x5df   : > { %v6985_v49 = vadd.f32 %v6984_v46, %v6968_v5 }
 0x5e2   : > { %v6971_v19 = vpop.xlane.xlu1 %6970  ;;  %v6974_v54 = vpop.xlane.xlu0 %6973 }
 0x5e3   : > { %v6986_v52 = vadd.f32 %v6985_v49, %v6971_v19 }
 0x5e5   : > { %v6987_v30 = vadd.f32 %v6986_v52, %v6974_v54 }
 0x5e6   : > { %v6977_v12 = vpop.xlane.xlu1 %6976  ;;  %v6980_v48 = vpop.xlane.xlu0 %6979 }
 0x5e7   : > { %v6988_v40 = vadd.f32 %v6987_v30, %v6977_v12 }
 0x5e9   : > { %v6989_v56 = vadd.f32 %v6988_v40, %v6980_v48 }
 0x5ea   : > { %v6983_v21 = vpop.xlane.xlu1 %6982 }
 0x5eb   : > { %v6990_v28 = vadd.f32 %v6989_v56, %v6983_v21 }
 0x5ed   : > { %v6991_v29 = vrot.slane %v6990_v28, 4 }
 0x5ef   : > { %v6992_v2 = vadd.f32 %v6991_v29, %v6990_v28 }
 0x5f1   : > { %v6993_v24 = vrot.slane %v6992_v2, 2 }
 0x5f3   : > { %v6994_v14 = vadd.f32 %v6993_v24, %v6992_v2 }
 0x5f5   : > { %v6995_v51 = vrot.slane %v6994_v14, 1 }
 0x5f7   : > { %v6996_v23 = vadd.f32 %v6995_v51, %v6994_v14 }
 0x5f9   : > { %6998 = vst.msk [vmem:[%s213_s22] sm:$0x1] %vm6997_vm2, %v6996_v23 }
 0x5fa PF: > { %s14_s15 = sadd.s32 1, %s9969_s15  }
 0x5fb   : > { %p11_p4 = scmp.ge.s32.totalorder %s14_s15, 4  }
 0x5fd   :  { %13 = sbr.rel (!%p11_p4) target bundleno = 1 (0x1), region = 69 }

</bundles_post_ra>
